<compile_context>
chip_gen: v7x
topology: tpu7x:2x2x1
jax: 0.10.0
libtpu: 0.0.40
codegen_flags: <defaults>
</compile_context>

<pallas_src>
import functools

import jax
import jax.numpy as jnp
from jax.experimental import pallas as pl
from jax.experimental.pallas import tpu as pltpu

BN_EPS = 1e-5
LANE = 128                       # channel dims padded to this -> lane-dense stores
MATMUL_DTYPE = jnp.bfloat16      # MXU-native operand/activation dtype; accumulation is f32
VMEM_LIMIT = 32 * 1024 * 1024    # >= v5e default (16 MiB), == v6e/v7x default, < v7x physical


def _round_up(n, m):
    return ((n + m - 1) // m) * m


def _pick_div(total, prefs, fallback):
    for t in prefs:
        if total % t == 0:
            return t
    return fallback


# ----------------------------------------------------------------------------
# Pallas kernels
# ----------------------------------------------------------------------------
def _matmul_stats_kernel(a_ref, b_ref, y_ref, sum_ref, sq_ref, acc_ref):
    """Tiled (tm,tk)@(tk,tn) with an f32 VMEM accumulator.  At the last K step the
    accumulator is written back in bf16 and per-channel BatchNorm statistics
    (column sum + per-tile-CENTERED sum of squares) are emitted from the f32
    accumulator, so the activation never has to be re-read just for statistics."""
    k = pl.program_id(2)

    @pl.when(k == 0)
    def _():
        acc_ref[...] = jnp.zeros_like(acc_ref)

    acc_ref[...] += jnp.dot(a_ref[...], b_ref[...],
                            preferred_element_type=jnp.float32)

    # NOTE: y/sum/sq blocks are indexed (i, j) / (i, 0, j) -- constant over the
    # reduction axis k -- so their HBM writeback happens once, after the k loop, with
    # the contents stored here at k == last.  Keep k as the innermost grid axis.
    @pl.when(k == pl.num_programs(2) - 1)
    def _():
        acc = acc_ref[...]
        y_ref[...] = acc.astype(y_ref.dtype)             # bf16 writeback (halves y traffic)
        col_sum = jnp.sum(acc, axis=0, keepdims=True)    # exact: padded rows are 0
        centered = acc - col_sum / acc.shape[0]          # per-tile centering (variance accuracy)
        sum_ref[...] = col_sum[None]
        sq_ref[...] = jnp.sum(centered * centered, axis=0, keepdims=True)[None]


def _bn_relu_kernel(y_ref, sc_ref, sh_ref, o_ref):
    # relu(BN(y)) with BN folded to per-channel scale/shift; bf16 in/out.
    t = y_ref[...].astype(jnp.float32) * sc_ref[...] + sh_ref[...]
    o_ref[...] = jnp.maximum(t, 0.0).astype(o_ref.dtype)


def _bn_add_identity_relu_kernel(y_ref, s_ref, sc_ref, sh_ref, o_ref):
    # relu(BN(y) + shortcut): identity shortcut is added as the raw bf16 activation
    # (no wasted scale=1/shift=0 multiplies, no f32 materialization).
    t = (y_ref[...].astype(jnp.float32) * sc_ref[...] + sh_ref[...]
         + s_ref[...].astype(jnp.float32))
    o_ref[...] = jnp.maximum(t, 0.0).astype(o_ref.dtype)


def _dual_bn_add_relu_kernel(y_ref, s_ref, sc1_ref, sh1_ref, sc2_ref, sh2_ref, o_ref):
    # relu(BN(y) + BN(projection shortcut)); both BNs folded to scale/shift.
    t = (y_ref[...].astype(jnp.float32) * sc1_ref[...] + sh1_ref[...]
         + s_ref[...].astype(jnp.float32) * sc2_ref[...] + sh2_ref[...])
    o_ref[...] = jnp.maximum(t, 0.0).astype(o_ref.dtype)


# ----------------------------------------------------------------------------
# pallas_call wrappers
# ----------------------------------------------------------------------------
def pallas_matmul_stats(a, b):
    """(M,K)@(K,N) with bf16 operands on the MXU and f32 accumulation.
    Returns (y (Mp,N) bf16, per-M-tile column sums (gm,1,N) f32,
             per-M-tile centered column sum-of-squares (gm,1,N) f32, tm)."""
    M, K = a.shape
    K2, N = b.shape
    assert K == K2 and N % LANE == 0

    # M tiling: keep >=2 steps on the parallel axes where possible (v7x's two
    # TensorCores only share work via parallel grid axes); shrink rather than serialize.
    Mp = _round_up(M, 256)
    if Mp % 512 == 0 and Mp // 512 >= 2:
        tm = 512
    elif Mp // 256 >= 2:
        tm = 256
    else:
        tm = 128
    # N tiling: prefer 256-multiples (v6e/v7x MXU is 2x256x256); 128 = v5e fallback.
    tn = _pick_div(N, (512, 256), 128)
    # K: small K runs as a single step with the full K as the block (no K-pad copy of
    # the big patch tensor); large K uses 256-multiple tiles.
    if K <= 2048:
        Kp = _round_up(K, 8)
        tk = Kp
    else:
        Kp = _round_up(K, 256)
        tk = 512 if Kp % 512 == 0 else 256

    a_p = a if (Mp == M and Kp == K) else jnp.pad(a, ((0, Mp - M), (0, Kp - K)))
    b_p = b if Kp == K else jnp.pad(b, ((0, Kp - K), (0, 0)))
    gm, gn, gk = Mp // tm, N // tn, Kp // tk

    y, s1, s2 = pl.pallas_call(
        _matmul_stats_kernel,
        out_shape=(
            jax.ShapeDtypeStruct((Mp, N), MATMUL_DTYPE),
            jax.ShapeDtypeStruct((gm, 1, N), jnp.float32),
            jax.ShapeDtypeStruct((gm, 1, N), jnp.float32),
        ),
        grid=(gm, gn, gk),
        in_specs=[
            pl.BlockSpec((tm, tk), lambda i, j, k: (i, k)),
            pl.BlockSpec((tk, tn), lambda i, j, k: (k, j)),
        ],
        out_specs=(
            pl.BlockSpec((tm, tn), lambda i, j, k: (i, j)),
            pl.BlockSpec((1, 1, tn), lambda i, j, k: (i, 0, j)),
            pl.BlockSpec((1, 1, tn), lambda i, j, k: (i, 0, j)),
        ),
        scratch_shapes=[pltpu.VMEM((tm, tn), jnp.float32)],
        compiler_params=pltpu.CompilerParams(
            dimension_semantics=("parallel", "parallel", "arbitrary"),
            vmem_limit_bytes=VMEM_LIMIT),
        cost_estimate=pl.CostEstimate(
            flops=2 * Mp * N * Kp, transcendentals=0,
            bytes_accessed=a_p.size * 2 + b_p.size * 2 + Mp * N * 2),
    )(a_p, b_p)
    return y, s1, s2, tm


def _apply_rows_tile(mp):
    # Largest row tile that divides Mp, keeps >=2 grid steps (v7x's two TensorCores)
    # and stays comfortably inside VMEM.  512+ rows reach ~85% of HBM roofline vs
    # ~63% at 256 rows (per-grid-step overhead ~0.35us).
    for t in (1024, 512, 256):
        if mp % t == 0 and mp // t >= 2:
            return t
    return 128 if (mp % 128 == 0 and mp // 128 >= 2) else mp


def _elementwise_call(kernel, mats, vecs, mp, n_lanes):
    tr = _apply_rows_tile(mp)
    mat = pl.BlockSpec((tr, n_lanes), lambda i: (i, 0))
    vec = pl.BlockSpec((1, n_lanes), lambda i: (0, 0))
    return pl.pallas_call(
        kernel,
        out_shape=jax.ShapeDtypeStruct((mp, n_lanes), MATMUL_DTYPE),
        grid=(mp // tr,),
        in_specs=[mat] * len(mats) + [vec] * len(vecs),
        out_specs=mat,
        compiler_params=pltpu.CompilerParams(
            dimension_semantics=("parallel",),
            vmem_limit_bytes=VMEM_LIMIT),
    )(*mats, *vecs)


def pallas_bn_relu(y, scale, shift):
    mp, n_lanes = y.shape
    return _elementwise_call(_bn_relu_kernel, [y], [scale, shift], mp, n_lanes)


def pallas_bn_add_relu(y, shortcut, sc1, sh1, sc2=None, sh2=None):
    """relu(BN2(y) + shortcut_term).  With sc2/sh2 given the shortcut is the
    projection path (its BN folded to scale/shift); otherwise `shortcut` is the raw
    bf16 identity activation and is added directly."""
    mp, n_lanes = y.shape
    if sc2 is None:
        return _elementwise_call(_bn_add_identity_relu_kernel,
                                 [y, shortcut], [sc1, sh1], mp, n_lanes)
    return _elementwise_call(_dual_bn_add_relu_kernel,
                             [y, shortcut], [sc1, sh1, sc2, sh2], mp, n_lanes)


# ----------------------------------------------------------------------------
# BatchNorm folding from the fused per-tile statistics (tiny per-channel math)
# ----------------------------------------------------------------------------
def _bn_fold_from_tiles(col_sum, centered_sq, tm, m_real, gamma, beta, n_lanes):
    """Combine the per-M-tile statistics emitted by the matmul kernel (tile i covers
    rows [i*tm, (i+1)*tm); rows >= m_real are exact zeros) into the global mean and
    biased variance over the m_real real rows, then fold the affine BatchNorm into
    per-channel scale/shift so BN(x) == x*scale + shift.  The per-tile centering +
    Chan-style combine avoids the E[x^2]-E[x]^2 cancellation for large M."""
    s = col_sum[:, 0, :].astype(jnp.float32)         # (gm, N) exact column sums
    q = centered_sq[:, 0, :].astype(jnp.float32)     # (gm, N) sum over tm rows of (x - c_i)^2
    gm = s.shape[0]
    n_i = jnp.clip(m_real - jnp.arange(gm) * tm, 0, tm).astype(jnp.float32)[:, None]
    p_i = float(tm) - n_i                            # zero-padded rows in tile i
    c_i = s / float(tm)                              # the centering shift used in-kernel
    mean = jnp.sum(s, axis=0) / float(m_real)
    d = c_i - mean[None, :]
    # sum over the real rows of tile i of (x - mean)^2:
    ss = (q - p_i * c_i * c_i) + 2.0 * d * (s - n_i * c_i) + n_i * d * d
    var = jnp.maximum(jnp.sum(ss, axis=0) / float(m_real), 0.0)   # biased, as PyTorch training fwd
    g = jnp.pad(gamma.astype(jnp.float32), (0, n_lanes - gamma.shape[0]))
    b = jnp.pad(beta.astype(jnp.float32), (0, n_lanes - beta.shape[0]))
    scale = g * jax.lax.rsqrt(var + BN_EPS)
    shift = b - mean * scale
    return scale.reshape(1, n_lanes), shift.reshape(1, n_lanes)


# ----------------------------------------------------------------------------
# im2col glue (plain JAX, bf16) + forward pass
# ----------------------------------------------------------------------------
def _im2col(x_nhwc, k, stride, pad):
    # Patch extraction in bf16: cast + spatial pad happen on the SMALL activation,
    # never on the 9x-duplicated patch tensor.
    # TODO(synk): replace with a direct 3x3 conv inside the matmul kernel.
    N, H, W, C = x_nhwc.shape
    xp = jnp.pad(x_nhwc, ((0, 0), (pad, pad), (pad, pad), (0, 0)))
    Ho = (H + 2 * pad - k) // stride + 1
    Wo = (W + 2 * pad - k) // stride + 1
    cols = [xp[:, dh:dh + stride * Ho:stride, dw:dw + stride * Wo:stride, :]
            for dh in range(k) for dw in range(k)]
    patches = jnp.concatenate(cols, axis=-1)                    # (N, Ho, Wo, k*k*C), bf16
    return patches.reshape(N * Ho * Wo, k * k * C), (N, Ho, Wo)


def _conv_weight_to_mat(w_oihw, cin_total, cout_total):
    # (Cout, Cin, kh, kw) -> (kh*kw*cin_total, cout_total) bf16, zero-padding input
    # channels (to match channel-padded patches) and output channels (lane-dense
    # outputs).  Matches _im2col's (dh, dw, c) ordering.
    O, I, kh, kw = w_oihw.shape
    w = jnp.pad(w_oihw, ((0, cout_total - O), (0, cin_total - I), (0, 0), (0, 0)))
    return jnp.transpose(w, (2, 3, 1, 0)).reshape(kh * kw * cin_total,
                                                  cout_total).astype(MATMUL_DTYPE)


def basic_block_forward(x_nchw, params, stride):
    in_planes = x_nchw.shape[1]
    planes = params["w1"].shape[0]
    use_shortcut = (stride != 1) or (in_planes != planes)
    n_lanes = _round_up(planes, LANE)          # channel-padded lane width

    # One layout-conversion copy at the block boundary: NCHW -> NHWC bf16.  For
    # identity-shortcut blocks the channel pad is fused into this same copy so the raw
    # activation can be streamed straight into the final add kernel.
    x = jnp.transpose(x_nchw, (0, 2, 3, 1)).astype(MATMUL_DTYPE)
    cin_lanes = in_planes
    if not use_shortcut:
        cin_lanes = n_lanes
        x = jnp.pad(x, ((0, 0), (0, 0), (0, 0), (0, n_lanes - in_planes)))

    # --- conv1 (3x3 / stride, pad 1) with fused BN stats, then folded BN + ReLU.
    p1, (N, Ho, Wo) = _im2col(x, 3, stride, 1)
    M = N * Ho * Wo
    y1, s1, q1, tm1 = pallas_matmul_stats(
        p1, _conv_weight_to_mat(params["w1"], cin_lanes, n_lanes))
    sc1, sh1 = _bn_fold_from_tiles(s1, q1, tm1, M, params["g1"], params["b1"], n_lanes)
    h = pallas_bn_relu(y1, sc1, sh1)           # (Mp, n_lanes) bf16

    # --- conv2 (3x3 / 1, pad 1) on the channel-padded activation (no channel slice;
    # the row prefix-slice + reshape fuse into conv2's im2col pad/concat fusion).
    h_img = h[:M].reshape(N, Ho, Wo, n_lanes)
    p2, _ = _im2col(h_img, 3, 1, 1)
    y2, s2, q2, tm2 = pallas_matmul_stats(
        p2, _conv_weight_to_mat(params["w2"], n_lanes, n_lanes))
    sc2, sh2 = _bn_fold_from_tiles(s2, q2, tm2, M, params["g2"], params["b2"], n_lanes)
    Mp = y2.shape[0]

    if use_shortcut:
        # Projection shortcut: 1x1 strided conv == strided slice + matmul, own folded BN.
        xs = x[:, ::stride, ::stride, :].reshape(M, in_planes)
        ys, ss, qs, tms = pallas_matmul_stats(
            xs, _conv_weight_to_mat(params["wsc"], in_planes, n_lanes))
        scs, shs = _bn_fold_from_tiles(ss, qs, tms, M, params["gsc"], params["bsc"], n_lanes)
        out = pallas_bn_add_relu(y2, ys, sc2, sh2, scs, shs)
    else:
        # Identity shortcut: raw bf16 activation streamed into the add kernel.  The row
        # pad is a no-op whenever M is already a tile multiple (as in the shapes below).
        s_raw = x.reshape(M, n_lanes)
        if Mp != M:
            s_raw = jnp.pad(s_raw, ((0, Mp - M), (0, 0)))
        out = pallas_bn_add_relu(y2, s_raw, sc2, sh2)

    # Final slice/reshape fuses into the single interface transpose back to NCHW.
    out = out[:M, :planes].reshape(N, Ho, Wo, planes)
    return jnp.transpose(out, (0, 3, 1, 2)).astype(jnp.float32)


# ----------------------------------------------------------------------------
# Pure-JAX reference (convs use bf16 inputs / f32 accumulation like the MXU path,
# so the comparison isolates kernel correctness; intermediates stay f32).
# ----------------------------------------------------------------------------
def _ref_conv(x, w, stride, pad):
    return jax.lax.conv_general_dilated(
        x.astype(MATMUL_DTYPE), w.astype(MATMUL_DTYPE),
        (stride, stride), [(pad, pad), (pad, pad)],
        dimension_numbers=("NCHW", "OIHW", "NCHW"),
        preferred_element_type=jnp.float32)


def _ref_bn(x, g, b):
    mean = x.mean(axis=(0, 2, 3), keepdims=True)
    var = ((x - mean) ** 2).mean(axis=(0, 2, 3), keepdims=True)
    return ((x - mean) * jax.lax.rsqrt(var + BN_EPS)
            * g.reshape(1, -1, 1, 1) + b.reshape(1, -1, 1, 1))


def ref_forward(x, params, stride):
    in_planes = x.shape[1]
    planes = params["w1"].shape[0]
    out = jax.nn.relu(_ref_bn(_ref_conv(x, params["w1"], stride, 1),
                              params["g1"], params["b1"]))
    out = _ref_bn(_ref_conv(out, params["w2"], 1, 1), params["g2"], params["b2"])
    if (stride != 1) or (in_planes != planes):
        sc = _ref_bn(_ref_conv(x, params["wsc"], stride, 0),
                     params["gsc"], params["bsc"])
    else:
        sc = x
    return jax.nn.relu(out + sc)


# ----------------------------------------------------------------------------
if __name__ == "__main__":
    key = jax.random.PRNGKey(0)

    def make_params(k, in_planes, planes, use_shortcut):
        ks = jax.random.split(k, 9)
        p = {
            "w1": 0.1 * jax.random.normal(ks[0], (planes, in_planes, 3, 3), jnp.float32),
            "g1": 1.0 + 0.1 * jax.random.normal(ks[1], (planes,), jnp.float32),
            "b1": 0.1 * jax.random.normal(ks[2], (planes,), jnp.float32),
            "w2": 0.1 * jax.random.normal(ks[3], (planes, planes, 3, 3), jnp.float32),
            "g2": 1.0 + 0.1 * jax.random.normal(ks[4], (planes,), jnp.float32),
            "b2": 0.1 * jax.random.normal(ks[5], (planes,), jnp.float32),
        }
        if use_shortcut:
            p["wsc"] = 0.1 * jax.random.normal(ks[6], (planes, in_planes, 1, 1), jnp.float32)
            p["gsc"] = 1.0 + 0.1 * jax.random.normal(ks[7], (planes,), jnp.float32)
            p["bsc"] = 0.1 * jax.random.normal(ks[8], (planes,), jnp.float32)
        return p

    configs = [
        ("projection-shortcut", 4, 8, 1),   # in_planes != planes -> conv+BN shortcut
        ("identity-shortcut", 8, 8, 1),     # identity shortcut (raw-add kernel path)
        ("strided-projection", 4, 8, 2),    # stride 2: strided conv1 + 1x1 shortcut
    ]
    kc = jax.random.split(key, len(configs) + 1)
    for idx, (name, in_planes, planes, stride) in enumerate(configs):
        use_sc = (stride != 1) or (in_planes != planes)
        params = make_params(kc[idx], in_planes, planes, use_sc)
        x = jax.random.normal(kc[-1], (2, in_planes, 16, 16), jnp.float32)

        fwd = jax.jit(functools.partial(basic_block_forward, stride=stride))
        out = jax.block_until_ready(fwd(x, params))
        ref = jax.block_until_ready(ref_forward(x, params, stride))

        assert out.shape == ref.shape, (name, out.shape, ref.shape)
        # Tolerance accounts for bf16 storage of the intermediates (y1, h, y2, out).
        if not jnp.allclose(out, ref, atol=2e-2, rtol=2e-2):
            err = float(jnp.max(jnp.abs(out - ref)))
            raise AssertionError(f"{name}: Pallas BasicBlock mismatch (max abs err {err:.3e})")

    print("KERNEL_OK")
</pallas_src>

<mosaic_0001>
module attributes {stable_mosaic.version = 11 : i64} {
  func.func @_matmul_stats_kernel(%arg0: i32, %arg1: i32, %arg2: i32, %arg3: memref<256x40xbf16, #tpu.memory_space<vmem>>, %arg4: memref<40x128xbf16, #tpu.memory_space<vmem>>, %arg5: memref<256x128xbf16, #tpu.memory_space<vmem>>, %arg6: memref<1x1x128xf32, #tpu.memory_space<vmem>>, %arg7: memref<1x1x128xf32, #tpu.memory_space<vmem>>, %arg8: memref<256x128xf32, #tpu.memory_space<vmem>>) attributes {dimension_semantics = [#tpu.dimension_semantics<parallel>, #tpu.dimension_semantics<parallel>, #tpu.dimension_semantics<arbitrary>], iteration_bounds = array<i64: 2, 1, 1>, scalar_prefetch = 0 : i64, scratch_operands = 1 : i64, tpu.core_type = #tpu.core_type<tc>, window_params = [{transform_indices = @transform_0, window_bounds = array<i64: 256, 40>}, {transform_indices = @transform_1, window_bounds = array<i64: 40, 128>}, {transform_indices = @transform_2, window_bounds = array<i64: 256, 128>}, {transform_indices = @transform_3, window_bounds = array<i64: 1, 1, 128>}, {transform_indices = @transform_4, window_bounds = array<i64: 1, 1, 128>}]} {
    %c0_i32 = arith.constant 0 : i32
    %0 = arith.cmpi eq, %arg2, %c0_i32 : i32
    %1 = arith.extui %0 : i1 to i32
    %c0_i32_0 = arith.constant 0 : i32
    %2 = arith.cmpi ne, %1, %c0_i32_0 : i32
    scf.if %2 {
      %cst_10 = arith.constant 0.000000e+00 : f32
      %12 = vector.broadcast %cst_10 : f32 to vector<256x128xf32>
      %c0_11 = arith.constant 0 : index
      %c0_12 = arith.constant 0 : index
      %13 = vector.load %arg8[%c0_11, %c0_12] : memref<256x128xf32, #tpu.memory_space<vmem>>, vector<256x128xf32>
      tpu.vector_store %arg8[%c0_11, %c0_12], %12 {strides = array<i32>} : memref<256x128xf32, #tpu.memory_space<vmem>>, vector<256x128xf32>,
    } else {
    }
    %c0 = arith.constant 0 : index
    %c0_1 = arith.constant 0 : index
    %3 = vector.load %arg8[%c0, %c0_1] : memref<256x128xf32, #tpu.memory_space<vmem>>, vector<256x128xf32>
    %c0_2 = arith.constant 0 : index
    %c0_3 = arith.constant 0 : index
    %4 = vector.load %arg3[%c0_2, %c0_3] : memref<256x40xbf16, #tpu.memory_space<vmem>>, vector<256x40xbf16>
    %c0_4 = arith.constant 0 : index
    %c0_5 = arith.constant 0 : index
    %5 = vector.load %arg4[%c0_4, %c0_5] : memref<40x128xbf16, #tpu.memory_space<vmem>>, vector<40x128xbf16>
    %cst = arith.constant dense<0.000000e+00> : vector<256x128xf32>
    %6 = tpu.matmul %4, %5, %cst {dimension_numbers = #tpu.dot_dimension_numbers<[1], [0], [0], [1], [0, 0, 1, 1], [], []>} : vector<256x40xbf16>, vector<40x128xbf16>, vector<256x128xf32> -> vector<256x128xf32>
    %7 = arith.addf %3, %6 : vector<256x128xf32>
    %c0_6 = arith.constant 0 : index
    %c0_7 = arith.constant 0 : index
    %8 = vector.load %arg8[%c0_6, %c0_7] : memref<256x128xf32, #tpu.memory_space<vmem>>, vector<256x128xf32>
    tpu.vector_store %arg8[%c0_6, %c0_7], %7 {strides = array<i32>} : memref<256x128xf32, #tpu.memory_space<vmem>>, vector<256x128xf32>,
    %c0_i32_8 = arith.constant 0 : i32
    %9 = arith.cmpi eq, %arg2, %c0_i32_8 : i32
    %10 = arith.extui %9 : i1 to i32
    %c0_i32_9 = arith.constant 0 : i32
    %11 = arith.cmpi ne, %10, %c0_i32_9 : i32
    scf.if %11 {
      %c0_10 = arith.constant 0 : index
      %c0_11 = arith.constant 0 : index
      %12 = vector.load %arg8[%c0_10, %c0_11] : memref<256x128xf32, #tpu.memory_space<vmem>>, vector<256x128xf32>
      %13 = arith.truncf %12 : vector<256x128xf32> to vector<256x128xbf16>
      %c0_12 = arith.constant 0 : index
      %c0_13 = arith.constant 0 : index
      %14 = vector.load %arg5[%c0_12, %c0_13] : memref<256x128xbf16, #tpu.memory_space<vmem>>, vector<256x128xbf16>
      tpu.vector_store %arg5[%c0_12, %c0_13], %13 {strides = array<i32>} : memref<256x128xbf16, #tpu.memory_space<vmem>>, vector<256x128xbf16>,
      %cst_14 = arith.constant dense<0.000000e+00> : vector<128xf32>
      %15 = vector.multi_reduction <add>, %12, %cst_14 [0] : vector<256x128xf32> to vector<128xf32>
      %16 = vector.shape_cast %15 : vector<128xf32> to vector<1x128xf32>
      %cst_15 = arith.constant 2.560000e+02 : f32
      %17 = vector.broadcast %cst_15 : f32 to vector<1x128xf32>
      %18 = arith.divf %16, %17 : vector<1x128xf32>
      %19 = vector.broadcast %18 : vector<1x128xf32> to vector<256x128xf32>
      %20 = arith.subf %12, %19 : vector<256x128xf32>
      %21 = vector.shape_cast %16 : vector<1x128xf32> to vector<1x1x128xf32>
      %c0_16 = arith.constant 0 : index
      %c0_17 = arith.constant 0 : index
      %c0_18 = arith.constant 0 : index
      %22 = vector.load %arg6[%c0_16, %c0_17, %c0_18] : memref<1x1x128xf32, #tpu.memory_space<vmem>>, vector<1x1x128xf32>
      tpu.vector_store %arg6[%c0_16, %c0_17, %c0_18], %21 {strides = array<i32>} : memref<1x1x128xf32, #tpu.memory_space<vmem>>, vector<1x1x128xf32>,
      %23 = arith.mulf %20, %20 : vector<256x128xf32>
      %cst_19 = arith.constant dense<0.000000e+00> : vector<128xf32>
      %24 = vector.multi_reduction <add>, %23, %cst_19 [0] : vector<256x128xf32> to vector<128xf32>
      %25 = vector.shape_cast %24 : vector<128xf32> to vector<1x128xf32>
      %26 = vector.shape_cast %25 : vector<1x128xf32> to vector<1x1x128xf32>
      %c0_20 = arith.constant 0 : index
      %c0_21 = arith.constant 0 : index
      %c0_22 = arith.constant 0 : index
      %27 = vector.load %arg7[%c0_20, %c0_21, %c0_22] : memref<1x1x128xf32, #tpu.memory_space<vmem>>, vector<1x1x128xf32>
      tpu.vector_store %arg7[%c0_20, %c0_21, %c0_22], %26 {strides = array<i32>} : memref<1x1x128xf32, #tpu.memory_space<vmem>>, vector<1x1x128xf32>,
    } else {
    }
    return
  }
  func.func @transform_0(%arg0: i32, %arg1: i32, %arg2: i32) -> (i32, i32) {
    %c0_i32 = arith.constant 0 : i32
    return %arg0, %arg2 : i32, i32
  }
  func.func @transform_1(%arg0: i32, %arg1: i32, %arg2: i32) -> (i32, i32) {
    %c0_i32 = arith.constant 0 : i32
    return %arg2, %arg1 : i32, i32
  }
  func.func @transform_2(%arg0: i32, %arg1: i32, %arg2: i32) -> (i32, i32) {
    %c0_i32 = arith.constant 0 : i32
    return %arg0, %arg1 : i32, i32
  }
  func.func @transform_3(%arg0: i32, %arg1: i32, %arg2: i32) -> (i32, i32, i32) {
    %c0_i32 = arith.constant 0 : i32
    %c0_i32_0 = arith.constant 0 : i32
    return %arg0, %c0_i32, %arg1 : i32, i32, i32
  }
  func.func @transform_4(%arg0: i32, %arg1: i32, %arg2: i32) -> (i32, i32, i32) {
    %c0_i32 = arith.constant 0 : i32
    %c0_i32_0 = arith.constant 0 : i32
    return %arg0, %c0_i32, %arg1 : i32, i32, i32
  }
}

module attributes {stable_mosaic.version = 11 : i64} {
  func.func @_bn_relu_kernel(%arg0: i32, %arg1: memref<256x128xbf16, #tpu.memory_space<vmem>>, %arg2: memref<1x128xf32, #tpu.memory_space<vmem>>, %arg3: memref<1x128xf32, #tpu.memory_space<vmem>>, %arg4: memref<256x128xbf16, #tpu.memory_space<vmem>>) attributes {dimension_semantics = [#tpu.dimension_semantics<parallel>], iteration_bounds = array<i64: 2>, scalar_prefetch = 0 : i64, scratch_operands = 0 : i64, tpu.core_type = #tpu.core_type<tc>, window_params = [{transform_indices = @transform_0, window_bounds = array<i64: 256, 128>}, {pipeline_mode = #tpu.pipeline_mode<synchronous>, transform_indices = @transform_1, window_bounds = array<i64: 1, 128>}, {pipeline_mode = #tpu.pipeline_mode<synchronous>, transform_indices = @transform_2, window_bounds = array<i64: 1, 128>}, {transform_indices = @transform_3, window_bounds = array<i64: 256, 128>}]} {
    %c0 = arith.constant 0 : index
    %c0_0 = arith.constant 0 : index
    %0 = vector.load %arg1[%c0, %c0_0] : memref<256x128xbf16, #tpu.memory_space<vmem>>, vector<256x128xbf16>
    %1 = arith.extf %0 : vector<256x128xbf16> to vector<256x128xf32>
    %c0_1 = arith.constant 0 : index
    %c0_2 = arith.constant 0 : index
    %2 = vector.load %arg2[%c0_1, %c0_2] : memref<1x128xf32, #tpu.memory_space<vmem>>, vector<1x128xf32>
    %3 = vector.broadcast %2 : vector<1x128xf32> to vector<256x128xf32>
    %4 = arith.mulf %1, %3 : vector<256x128xf32>
    %c0_3 = arith.constant 0 : index
    %c0_4 = arith.constant 0 : index
    %5 = vector.load %arg3[%c0_3, %c0_4] : memref<1x128xf32, #tpu.memory_space<vmem>>, vector<1x128xf32>
    %6 = vector.broadcast %5 : vector<1x128xf32> to vector<256x128xf32>
    %7 = arith.addf %4, %6 : vector<256x128xf32>
    %cst = arith.constant 0.000000e+00 : f32
    %8 = vector.broadcast %cst : f32 to vector<256x128xf32>
    %9 = arith.maximumf %7, %8 : vector<256x128xf32>
    %10 = arith.truncf %9 : vector<256x128xf32> to vector<256x128xbf16>
    %c0_5 = arith.constant 0 : index
    %c0_6 = arith.constant 0 : index
    %11 = vector.load %arg4[%c0_5, %c0_6] : memref<256x128xbf16, #tpu.memory_space<vmem>>, vector<256x128xbf16>
    tpu.vector_store %arg4[%c0_5, %c0_6], %10 {strides = array<i32>} : memref<256x128xbf16, #tpu.memory_space<vmem>>, vector<256x128xbf16>,
    return
  }
  func.func @transform_0(%arg0: i32) -> (i32, i32) {
    %c0_i32 = arith.constant 0 : i32
    %c0_i32_0 = arith.constant 0 : i32
    return %arg0, %c0_i32 : i32, i32
  }
  func.func @transform_1(%arg0: i32) -> (i32, i32) {
    %c0_i32 = arith.constant 0 : i32
    %c0_i32_0 = arith.constant 0 : i32
    %c0_i32_1 = arith.constant 0 : i32
    return %c0_i32, %c0_i32_0 : i32, i32
  }
  func.func @transform_2(%arg0: i32) -> (i32, i32) {
    %c0_i32 = arith.constant 0 : i32
    %c0_i32_0 = arith.constant 0 : i32
    %c0_i32_1 = arith.constant 0 : i32
    return %c0_i32, %c0_i32_0 : i32, i32
  }
  func.func @transform_3(%arg0: i32) -> (i32, i32) {
    %c0_i32 = arith.constant 0 : i32
    %c0_i32_0 = arith.constant 0 : i32
    return %arg0, %c0_i32 : i32, i32
  }
}

module attributes {stable_mosaic.version = 11 : i64} {
  func.func @_matmul_stats_kernel(%arg0: i32, %arg1: i32, %arg2: i32, %arg3: memref<256x1152xbf16, #tpu.memory_space<vmem>>, %arg4: memref<1152x128xbf16, #tpu.memory_space<vmem>>, %arg5: memref<256x128xbf16, #tpu.memory_space<vmem>>, %arg6: memref<1x1x128xf32, #tpu.memory_space<vmem>>, %arg7: memref<1x1x128xf32, #tpu.memory_space<vmem>>, %arg8: memref<256x128xf32, #tpu.memory_space<vmem>>) attributes {dimension_semantics = [#tpu.dimension_semantics<parallel>, #tpu.dimension_semantics<parallel>, #tpu.dimension_semantics<arbitrary>], iteration_bounds = array<i64: 2, 1, 1>, scalar_prefetch = 0 : i64, scratch_operands = 1 : i64, tpu.core_type = #tpu.core_type<tc>, window_params = [{transform_indices = @transform_0, window_bounds = array<i64: 256, 1152>}, {transform_indices = @transform_1, window_bounds = array<i64: 1152, 128>}, {transform_indices = @transform_2, window_bounds = array<i64: 256, 128>}, {transform_indices = @transform_3, window_bounds = array<i64: 1, 1, 128>}, {transform_indices = @transform_4, window_bounds = array<i64: 1, 1, 128>}]} {
    %c0_i32 = arith.constant 0 : i32
    %0 = arith.cmpi eq, %arg2, %c0_i32 : i32
    %1 = arith.extui %0 : i1 to i32
    %c0_i32_0 = arith.constant 0 : i32
    %2 = arith.cmpi ne, %1, %c0_i32_0 : i32
    scf.if %2 {
      %cst_10 = arith.constant 0.000000e+00 : f32
      %12 = vector.broadcast %cst_10 : f32 to vector<256x128xf32>
      %c0_11 = arith.constant 0 : index
      %c0_12 = arith.constant 0 : index
      %13 = vector.load %arg8[%c0_11, %c0_12] : memref<256x128xf32, #tpu.memory_space<vmem>>, vector<256x128xf32>
      tpu.vector_store %arg8[%c0_11, %c0_12], %12 {strides = array<i32>} : memref<256x128xf32, #tpu.memory_space<vmem>>, vector<256x128xf32>,
    } else {
    }
    %c0 = arith.constant 0 : index
    %c0_1 = arith.constant 0 : index
    %3 = vector.load %arg8[%c0, %c0_1] : memref<256x128xf32, #tpu.memory_space<vmem>>, vector<256x128xf32>
    %c0_2 = arith.constant 0 : index
    %c0_3 = arith.constant 0 : index
    %4 = vector.load %arg3[%c0_2, %c0_3] : memref<256x1152xbf16, #tpu.memory_space<vmem>>, vector<256x1152xbf16>
    %c0_4 = arith.constant 0 : index
    %c0_5 = arith.constant 0 : index
    %5 = vector.load %arg4[%c0_4, %c0_5] : memref<1152x128xbf16, #tpu.memory_space<vmem>>, vector<1152x128xbf16>
    %cst = arith.constant dense<0.000000e+00> : vector<256x128xf32>
    %6 = tpu.matmul %4, %5, %cst {dimension_numbers = #tpu.dot_dimension_numbers<[1], [0], [0], [1], [0, 0, 1, 1], [], []>} : vector<256x1152xbf16>, vector<1152x128xbf16>, vector<256x128xf32> -> vector<256x128xf32>
    %7 = arith.addf %3, %6 : vector<256x128xf32>
    %c0_6 = arith.constant 0 : index
    %c0_7 = arith.constant 0 : index
    %8 = vector.load %arg8[%c0_6, %c0_7] : memref<256x128xf32, #tpu.memory_space<vmem>>, vector<256x128xf32>
    tpu.vector_store %arg8[%c0_6, %c0_7], %7 {strides = array<i32>} : memref<256x128xf32, #tpu.memory_space<vmem>>, vector<256x128xf32>,
    %c0_i32_8 = arith.constant 0 : i32
    %9 = arith.cmpi eq, %arg2, %c0_i32_8 : i32
    %10 = arith.extui %9 : i1 to i32
    %c0_i32_9 = arith.constant 0 : i32
    %11 = arith.cmpi ne, %10, %c0_i32_9 : i32
    scf.if %11 {
      %c0_10 = arith.constant 0 : index
      %c0_11 = arith.constant 0 : index
      %12 = vector.load %arg8[%c0_10, %c0_11] : memref<256x128xf32, #tpu.memory_space<vmem>>, vector<256x128xf32>
      %13 = arith.truncf %12 : vector<256x128xf32> to vector<256x128xbf16>
      %c0_12 = arith.constant 0 : index
      %c0_13 = arith.constant 0 : index
      %14 = vector.load %arg5[%c0_12, %c0_13] : memref<256x128xbf16, #tpu.memory_space<vmem>>, vector<256x128xbf16>
      tpu.vector_store %arg5[%c0_12, %c0_13], %13 {strides = array<i32>} : memref<256x128xbf16, #tpu.memory_space<vmem>>, vector<256x128xbf16>,
      %cst_14 = arith.constant dense<0.000000e+00> : vector<128xf32>
      %15 = vector.multi_reduction <add>, %12, %cst_14 [0] : vector<256x128xf32> to vector<128xf32>
      %16 = vector.shape_cast %15 : vector<128xf32> to vector<1x128xf32>
      %cst_15 = arith.constant 2.560000e+02 : f32
      %17 = vector.broadcast %cst_15 : f32 to vector<1x128xf32>
      %18 = arith.divf %16, %17 : vector<1x128xf32>
      %19 = vector.broadcast %18 : vector<1x128xf32> to vector<256x128xf32>
      %20 = arith.subf %12, %19 : vector<256x128xf32>
      %21 = vector.shape_cast %16 : vector<1x128xf32> to vector<1x1x128xf32>
      %c0_16 = arith.constant 0 : index
      %c0_17 = arith.constant 0 : index
      %c0_18 = arith.constant 0 : index
      %22 = vector.load %arg6[%c0_16, %c0_17, %c0_18] : memref<1x1x128xf32, #tpu.memory_space<vmem>>, vector<1x1x128xf32>
      tpu.vector_store %arg6[%c0_16, %c0_17, %c0_18], %21 {strides = array<i32>} : memref<1x1x128xf32, #tpu.memory_space<vmem>>, vector<1x1x128xf32>,
      %23 = arith.mulf %20, %20 : vector<256x128xf32>
      %cst_19 = arith.constant dense<0.000000e+00> : vector<128xf32>
      %24 = vector.multi_reduction <add>, %23, %cst_19 [0] : vector<256x128xf32> to vector<128xf32>
      %25 = vector.shape_cast %24 : vector<128xf32> to vector<1x128xf32>
      %26 = vector.shape_cast %25 : vector<1x128xf32> to vector<1x1x128xf32>
      %c0_20 = arith.constant 0 : index
      %c0_21 = arith.constant 0 : index
      %c0_22 = arith.constant 0 : index
      %27 = vector.load %arg7[%c0_20, %c0_21, %c0_22] : memref<1x1x128xf32, #tpu.memory_space<vmem>>, vector<1x1x128xf32>
      tpu.vector_store %arg7[%c0_20, %c0_21, %c0_22], %26 {strides = array<i32>} : memref<1x1x128xf32, #tpu.memory_space<vmem>>, vector<1x1x128xf32>,
    } else {
    }
    return
  }
  func.func @transform_0(%arg0: i32, %arg1: i32, %arg2: i32) -> (i32, i32) {
    %c0_i32 = arith.constant 0 : i32
    return %arg0, %arg2 : i32, i32
  }
  func.func @transform_1(%arg0: i32, %arg1: i32, %arg2: i32) -> (i32, i32) {
    %c0_i32 = arith.constant 0 : i32
    return %arg2, %arg1 : i32, i32
  }
  func.func @transform_2(%arg0: i32, %arg1: i32, %arg2: i32) -> (i32, i32) {
    %c0_i32 = arith.constant 0 : i32
    return %arg0, %arg1 : i32, i32
  }
  func.func @transform_3(%arg0: i32, %arg1: i32, %arg2: i32) -> (i32, i32, i32) {
    %c0_i32 = arith.constant 0 : i32
    %c0_i32_0 = arith.constant 0 : i32
    return %arg0, %c0_i32, %arg1 : i32, i32, i32
  }
  func.func @transform_4(%arg0: i32, %arg1: i32, %arg2: i32) -> (i32, i32, i32) {
    %c0_i32 = arith.constant 0 : i32
    %c0_i32_0 = arith.constant 0 : i32
    return %arg0, %c0_i32, %arg1 : i32, i32, i32
  }
}

module attributes {stable_mosaic.version = 11 : i64} {
  func.func @_matmul_stats_kernel(%arg0: i32, %arg1: i32, %arg2: i32, %arg3: memref<256x8xbf16, #tpu.memory_space<vmem>>, %arg4: memref<8x128xbf16, #tpu.memory_space<vmem>>, %arg5: memref<256x128xbf16, #tpu.memory_space<vmem>>, %arg6: memref<1x1x128xf32, #tpu.memory_space<vmem>>, %arg7: memref<1x1x128xf32, #tpu.memory_space<vmem>>, %arg8: memref<256x128xf32, #tpu.memory_space<vmem>>) attributes {dimension_semantics = [#tpu.dimension_semantics<parallel>, #tpu.dimension_semantics<parallel>, #tpu.dimension_semantics<arbitrary>], iteration_bounds = array<i64: 2, 1, 1>, scalar_prefetch = 0 : i64, scratch_operands = 1 : i64, tpu.core_type = #tpu.core_type<tc>, window_params = [{transform_indices = @transform_0, window_bounds = array<i64: 256, 8>}, {transform_indices = @transform_1, window_bounds = array<i64: 8, 128>}, {transform_indices = @transform_2, window_bounds = array<i64: 256, 128>}, {transform_indices = @transform_3, window_bounds = array<i64: 1, 1, 128>}, {transform_indices = @transform_4, window_bounds = array<i64: 1, 1, 128>}]} {
    %c0_i32 = arith.constant 0 : i32
    %0 = arith.cmpi eq, %arg2, %c0_i32 : i32
    %1 = arith.extui %0 : i1 to i32
    %c0_i32_0 = arith.constant 0 : i32
    %2 = arith.cmpi ne, %1, %c0_i32_0 : i32
    scf.if %2 {
      %cst_10 = arith.constant 0.000000e+00 : f32
      %12 = vector.broadcast %cst_10 : f32 to vector<256x128xf32>
      %c0_11 = arith.constant 0 : index
      %c0_12 = arith.constant 0 : index
      %13 = vector.load %arg8[%c0_11, %c0_12] : memref<256x128xf32, #tpu.memory_space<vmem>>, vector<256x128xf32>
      tpu.vector_store %arg8[%c0_11, %c0_12], %12 {strides = array<i32>} : memref<256x128xf32, #tpu.memory_space<vmem>>, vector<256x128xf32>,
    } else {
    }
    %c0 = arith.constant 0 : index
    %c0_1 = arith.constant 0 : index
    %3 = vector.load %arg8[%c0, %c0_1] : memref<256x128xf32, #tpu.memory_space<vmem>>, vector<256x128xf32>
    %c0_2 = arith.constant 0 : index
    %c0_3 = arith.constant 0 : index
    %4 = vector.load %arg3[%c0_2, %c0_3] : memref<256x8xbf16, #tpu.memory_space<vmem>>, vector<256x8xbf16>
    %c0_4 = arith.constant 0 : index
    %c0_5 = arith.constant 0 : index
    %5 = vector.load %arg4[%c0_4, %c0_5] : memref<8x128xbf16, #tpu.memory_space<vmem>>, vector<8x128xbf16>
    %cst = arith.constant dense<0.000000e+00> : vector<256x128xf32>
    %6 = tpu.matmul %4, %5, %cst {dimension_numbers = #tpu.dot_dimension_numbers<[1], [0], [0], [1], [0, 0, 1, 1], [], []>} : vector<256x8xbf16>, vector<8x128xbf16>, vector<256x128xf32> -> vector<256x128xf32>
    %7 = arith.addf %3, %6 : vector<256x128xf32>
    %c0_6 = arith.constant 0 : index
    %c0_7 = arith.constant 0 : index
    %8 = vector.load %arg8[%c0_6, %c0_7] : memref<256x128xf32, #tpu.memory_space<vmem>>, vector<256x128xf32>
    tpu.vector_store %arg8[%c0_6, %c0_7], %7 {strides = array<i32>} : memref<256x128xf32, #tpu.memory_space<vmem>>, vector<256x128xf32>,
    %c0_i32_8 = arith.constant 0 : i32
    %9 = arith.cmpi eq, %arg2, %c0_i32_8 : i32
    %10 = arith.extui %9 : i1 to i32
    %c0_i32_9 = arith.constant 0 : i32
    %11 = arith.cmpi ne, %10, %c0_i32_9 : i32
    scf.if %11 {
      %c0_10 = arith.constant 0 : index
      %c0_11 = arith.constant 0 : index
      %12 = vector.load %arg8[%c0_10, %c0_11] : memref<256x128xf32, #tpu.memory_space<vmem>>, vector<256x128xf32>
      %13 = arith.truncf %12 : vector<256x128xf32> to vector<256x128xbf16>
      %c0_12 = arith.constant 0 : index
      %c0_13 = arith.constant 0 : index
      %14 = vector.load %arg5[%c0_12, %c0_13] : memref<256x128xbf16, #tpu.memory_space<vmem>>, vector<256x128xbf16>
      tpu.vector_store %arg5[%c0_12, %c0_13], %13 {strides = array<i32>} : memref<256x128xbf16, #tpu.memory_space<vmem>>, vector<256x128xbf16>,
      %cst_14 = arith.constant dense<0.000000e+00> : vector<128xf32>
      %15 = vector.multi_reduction <add>, %12, %cst_14 [0] : vector<256x128xf32> to vector<128xf32>
      %16 = vector.shape_cast %15 : vector<128xf32> to vector<1x128xf32>
      %cst_15 = arith.constant 2.560000e+02 : f32
      %17 = vector.broadcast %cst_15 : f32 to vector<1x128xf32>
      %18 = arith.divf %16, %17 : vector<1x128xf32>
      %19 = vector.broadcast %18 : vector<1x128xf32> to vector<256x128xf32>
      %20 = arith.subf %12, %19 : vector<256x128xf32>
      %21 = vector.shape_cast %16 : vector<1x128xf32> to vector<1x1x128xf32>
      %c0_16 = arith.constant 0 : index
      %c0_17 = arith.constant 0 : index
      %c0_18 = arith.constant 0 : index
      %22 = vector.load %arg6[%c0_16, %c0_17, %c0_18] : memref<1x1x128xf32, #tpu.memory_space<vmem>>, vector<1x1x128xf32>
      tpu.vector_store %arg6[%c0_16, %c0_17, %c0_18], %21 {strides = array<i32>} : memref<1x1x128xf32, #tpu.memory_space<vmem>>, vector<1x1x128xf32>,
      %23 = arith.mulf %20, %20 : vector<256x128xf32>
      %cst_19 = arith.constant dense<0.000000e+00> : vector<128xf32>
      %24 = vector.multi_reduction <add>, %23, %cst_19 [0] : vector<256x128xf32> to vector<128xf32>
      %25 = vector.shape_cast %24 : vector<128xf32> to vector<1x128xf32>
      %26 = vector.shape_cast %25 : vector<1x128xf32> to vector<1x1x128xf32>
      %c0_20 = arith.constant 0 : index
      %c0_21 = arith.constant 0 : index
      %c0_22 = arith.constant 0 : index
      %27 = vector.load %arg7[%c0_20, %c0_21, %c0_22] : memref<1x1x128xf32, #tpu.memory_space<vmem>>, vector<1x1x128xf32>
      tpu.vector_store %arg7[%c0_20, %c0_21, %c0_22], %26 {strides = array<i32>} : memref<1x1x128xf32, #tpu.memory_space<vmem>>, vector<1x1x128xf32>,
    } else {
    }
    return
  }
  func.func @transform_0(%arg0: i32, %arg1: i32, %arg2: i32) -> (i32, i32) {
    %c0_i32 = arith.constant 0 : i32
    return %arg0, %arg2 : i32, i32
  }
  func.func @transform_1(%arg0: i32, %arg1: i32, %arg2: i32) -> (i32, i32) {
    %c0_i32 = arith.constant 0 : i32
    return %arg2, %arg1 : i32, i32
  }
  func.func @transform_2(%arg0: i32, %arg1: i32, %arg2: i32) -> (i32, i32) {
    %c0_i32 = arith.constant 0 : i32
    return %arg0, %arg1 : i32, i32
  }
  func.func @transform_3(%arg0: i32, %arg1: i32, %arg2: i32) -> (i32, i32, i32) {
    %c0_i32 = arith.constant 0 : i32
    %c0_i32_0 = arith.constant 0 : i32
    return %arg0, %c0_i32, %arg1 : i32, i32, i32
  }
  func.func @transform_4(%arg0: i32, %arg1: i32, %arg2: i32) -> (i32, i32, i32) {
    %c0_i32 = arith.constant 0 : i32
    %c0_i32_0 = arith.constant 0 : i32
    return %arg0, %c0_i32, %arg1 : i32, i32, i32
  }
}

module attributes {stable_mosaic.version = 11 : i64} {
  func.func @_dual_bn_add_relu_kernel(%arg0: i32, %arg1: memref<256x128xbf16, #tpu.memory_space<vmem>>, %arg2: memref<256x128xbf16, #tpu.memory_space<vmem>>, %arg3: memref<1x128xf32, #tpu.memory_space<vmem>>, %arg4: memref<1x128xf32, #tpu.memory_space<vmem>>, %arg5: memref<1x128xf32, #tpu.memory_space<vmem>>, %arg6: memref<1x128xf32, #tpu.memory_space<vmem>>, %arg7: memref<256x128xbf16, #tpu.memory_space<vmem>>) attributes {dimension_semantics = [#tpu.dimension_semantics<parallel>], iteration_bounds = array<i64: 2>, scalar_prefetch = 0 : i64, scratch_operands = 0 : i64, tpu.core_type = #tpu.core_type<tc>, window_params = [{transform_indices = @transform_0, window_bounds = array<i64: 256, 128>}, {transform_indices = @transform_1, window_bounds = array<i64: 256, 128>}, {pipeline_mode = #tpu.pipeline_mode<synchronous>, transform_indices = @transform_2, window_bounds = array<i64: 1, 128>}, {pipeline_mode = #tpu.pipeline_mode<synchronous>, transform_indices = @transform_3, window_bounds = array<i64: 1, 128>}, {pipeline_mode = #tpu.pipeline_mode<synchronous>, transform_indices = @transform_4, window_bounds = array<i64: 1, 128>}, {pipeline_mode = #tpu.pipeline_mode<synchronous>, transform_indices = @transform_5, window_bounds = array<i64: 1, 128>}, {transform_indices = @transform_6, window_bounds = array<i64: 256, 128>}]} {
    %c0 = arith.constant 0 : index
    %c0_0 = arith.constant 0 : index
    %0 = vector.load %arg1[%c0, %c0_0] : memref<256x128xbf16, #tpu.memory_space<vmem>>, vector<256x128xbf16>
    %1 = arith.extf %0 : vector<256x128xbf16> to vector<256x128xf32>
    %c0_1 = arith.constant 0 : index
    %c0_2 = arith.constant 0 : index
    %2 = vector.load %arg3[%c0_1, %c0_2] : memref<1x128xf32, #tpu.memory_space<vmem>>, vector<1x128xf32>
    %3 = vector.broadcast %2 : vector<1x128xf32> to vector<256x128xf32>
    %4 = arith.mulf %1, %3 : vector<256x128xf32>
    %c0_3 = arith.constant 0 : index
    %c0_4 = arith.constant 0 : index
    %5 = vector.load %arg4[%c0_3, %c0_4] : memref<1x128xf32, #tpu.memory_space<vmem>>, vector<1x128xf32>
    %6 = vector.broadcast %5 : vector<1x128xf32> to vector<256x128xf32>
    %7 = arith.addf %4, %6 : vector<256x128xf32>
    %c0_5 = arith.constant 0 : index
    %c0_6 = arith.constant 0 : index
    %8 = vector.load %arg2[%c0_5, %c0_6] : memref<256x128xbf16, #tpu.memory_space<vmem>>, vector<256x128xbf16>
    %9 = arith.extf %8 : vector<256x128xbf16> to vector<256x128xf32>
    %c0_7 = arith.constant 0 : index
    %c0_8 = arith.constant 0 : index
    %10 = vector.load %arg5[%c0_7, %c0_8] : memref<1x128xf32, #tpu.memory_space<vmem>>, vector<1x128xf32>
    %11 = vector.broadcast %10 : vector<1x128xf32> to vector<256x128xf32>
    %12 = arith.mulf %9, %11 : vector<256x128xf32>
    %13 = arith.addf %7, %12 : vector<256x128xf32>
    %c0_9 = arith.constant 0 : index
    %c0_10 = arith.constant 0 : index
    %14 = vector.load %arg6[%c0_9, %c0_10] : memref<1x128xf32, #tpu.memory_space<vmem>>, vector<1x128xf32>
    %15 = vector.broadcast %14 : vector<1x128xf32> to vector<256x128xf32>
    %16 = arith.addf %13, %15 : vector<256x128xf32>
    %cst = arith.constant 0.000000e+00 : f32
    %17 = vector.broadcast %cst : f32 to vector<256x128xf32>
    %18 = arith.maximumf %16, %17 : vector<256x128xf32>
    %19 = arith.truncf %18 : vector<256x128xf32> to vector<256x128xbf16>
    %c0_11 = arith.constant 0 : index
    %c0_12 = arith.constant 0 : index
    %20 = vector.load %arg7[%c0_11, %c0_12] : memref<256x128xbf16, #tpu.memory_space<vmem>>, vector<256x128xbf16>
    tpu.vector_store %arg7[%c0_11, %c0_12], %19 {strides = array<i32>} : memref<256x128xbf16, #tpu.memory_space<vmem>>, vector<256x128xbf16>,
    return
  }
  func.func @transform_0(%arg0: i32) -> (i32, i32) {
    %c0_i32 = arith.constant 0 : i32
    %c0_i32_0 = arith.constant 0 : i32
    return %arg0, %c0_i32 : i32, i32
  }
  func.func @transform_1(%arg0: i32) -> (i32, i32) {
    %c0_i32 = arith.constant 0 : i32
    %c0_i32_0 = arith.constant 0 : i32
    return %arg0, %c0_i32 : i32, i32
  }
  func.func @transform_2(%arg0: i32) -> (i32, i32) {
    %c0_i32 = arith.constant 0 : i32
    %c0_i32_0 = arith.constant 0 : i32
    %c0_i32_1 = arith.constant 0 : i32
    return %c0_i32, %c0_i32_0 : i32, i32
  }
  func.func @transform_3(%arg0: i32) -> (i32, i32) {
    %c0_i32 = arith.constant 0 : i32
    %c0_i32_0 = arith.constant 0 : i32
    %c0_i32_1 = arith.constant 0 : i32
    return %c0_i32, %c0_i32_0 : i32, i32
  }
  func.func @transform_4(%arg0: i32) -> (i32, i32) {
    %c0_i32 = arith.constant 0 : i32
    %c0_i32_0 = arith.constant 0 : i32
    %c0_i32_1 = arith.constant 0 : i32
    return %c0_i32, %c0_i32_0 : i32, i32
  }
  func.func @transform_5(%arg0: i32) -> (i32, i32) {
    %c0_i32 = arith.constant 0 : i32
    %c0_i32_0 = arith.constant 0 : i32
    %c0_i32_1 = arith.constant 0 : i32
    return %c0_i32, %c0_i32_0 : i32, i32
  }
  func.func @transform_6(%arg0: i32) -> (i32, i32) {
    %c0_i32 = arith.constant 0 : i32
    %c0_i32_0 = arith.constant 0 : i32
    return %arg0, %c0_i32 : i32, i32
  }
}

</mosaic_0001>

<bundles_post_ra>
// kernel: basic_block_forward.6
= control target key start
LH: loop header
LB: loop body
LE: loop exit
PB: predicated region body
PF: predicated region fallthrough
CT: control target
= control target key end

     0   :  { %s851_s12 = smov 0   ;;  %s985_s0 = inlined_call_operand.vmem [shape: bf16[512,128], index: 0, kind: input, shape index: {}]   ;;  %s986_s1 = inlined_call_operand.vmem [shape: f32[1,128], index: 1, kind: input, shape index: {}]   ;;  %s987_s2 = inlined_call_operand.vmem [shape: f32[1,128], index: 2, kind: input, shape index: {}]   ;;  %s988_s3 = inlined_call_operand.vmem [shape: bf16[512,128], index: 3, kind: output, shape index: {}]  }
   0x1 LB: > { %s564_s13 = sadd.s32 4294967295, %s829_s12   ;;  %p568_p0 = scmp.ge.s32.totalorder %s829_s12, 1  ;;  %s829_s12 = sphi %s851_s12, %s13_s12  }
   0x2   : > { %p138_p1 = scmp.lt.s32.totalorder %s829_s12, 3 }
   0x4   : > { %p139_p2 = pnand %p568_p0, %p138_p1 }
   0x5   : > { %s569_s14 = sshll.u32 (!%p139_p2), %s564_s13, 5  ;;  %v872_v0 = vld [vmem:[%s986_s1] ss:$0 sm:$0xff] (!%p139_p2) }
   0x6   : > { %142 = sbr.rel (%p139_p2) target bundleno = 59 (0x3b), region = 32  ;;  %p163_p3 = scmp.lt.s32.totalorder (!%p139_p2), %s569_s14, 63  ;;  %v881_v9 = vld [vmem:[%s987_s2] ss:$0 sm:$0xff] (!%p139_p2) }
   0xd   : > { %s990_s14 = smov (!%p163_p3, %s569_s14), 63 }
   0xe   : > { %s570_s15 = sshll.u32 %s990_s14, 2 }
   0xf   : > { %s867_s18 = scalar_lea.vmem %s985_s0, %s570_s15  ;;  %s906_s25 = scalar_lea.vmem %s988_s3, %s570_s15 }
  0x10   : > { %v642_v1 = vld [vmem:[%s867_s18] sm:$0xff]   ;;  %v785_v2 = vld [vmem:[%s867_s18 + $0x8] sm:$0xff]   ;;  %v786_v3 = vld [vmem:[%s867_s18 + $0x10] sm:$0xff]  }
  0x11   : > { %v643_v4 = vunpack.c.l.bf16 %v642_v1  ;;  %v644_v5 = vunpack.c.h.bf16 %v642_v1  ;;  %v647_v6 = vunpack.c.l.bf16 %v785_v2  ;;  %v648_v7 = vunpack.c.h.bf16 %v785_v2  ;;  %v787_v8 = vld [vmem:[%s867_s18 + $0x18] sm:$0xff]   ;;  %v788_v30 = vld [vmem:[%s867_s18 + $0x20] sm:$0xff]   ;;  %v789_v35 = vld [vmem:[%s867_s18 + $0x28] sm:$0xff]  }
  0x12   : > { %v651_v10 = vunpack.c.l.bf16 %v786_v3  ;;  %v652_v11 = vunpack.c.h.bf16 %v786_v3  ;;  %v655_v12 = vunpack.c.l.bf16 %v787_v8  ;;  %v656_v13 = vunpack.c.h.bf16 %v787_v8  ;;  %v790_v40 = vld [vmem:[%s867_s18 + $0x30] sm:$0xff]   ;;  %v791_v45 = vld [vmem:[%s867_s18 + $0x38] sm:$0xff]   ;;  %v792_v3 = vld [vmem:[%s867_s18 + $0x40] sm:$0xff]  }
  0x13   : > { %v245_v14 = vmul.f32 %v643_v4, %v872_v0  ;;  %v246_v15 = vmul.f32 %v644_v5, %v872_v0  ;;  %v247_v16 = vmul.f32 %v647_v6, %v872_v0  ;;  %v248_v17 = vmul.f32 %v648_v7, %v872_v0 }
  0x14   : > { %v249_v18 = vmul.f32 %v651_v10, %v872_v0  ;;  %v250_v19 = vmul.f32 %v652_v11, %v872_v0  ;;  %v251_v20 = vmul.f32 %v655_v12, %v872_v0  ;;  %v252_v21 = vmul.f32 %v656_v13, %v872_v0  ;;  %v793_v13 = vld [vmem:[%s867_s18 + $0x48] sm:$0xff]  }
  0x15   : > { %v284_v22 = vadd.f32 %v881_v9, %v245_v14  ;;  %v285_v23 = vadd.f32 %v881_v9, %v246_v15  ;;  %v286_v24 = vadd.f32 %v881_v9, %v247_v16  ;;  %v287_v25 = vadd.f32 %v881_v9, %v248_v17 }
  0x16   : > { %v288_v26 = vadd.f32 %v881_v9, %v249_v18  ;;  %v289_v27 = vadd.f32 %v881_v9, %v250_v19  ;;  %v290_v28 = vadd.f32 %v881_v9, %v251_v20  ;;  %v291_v29 = vadd.f32 %v881_v9, %v252_v21  ;;  %v794_v18 = vld [vmem:[%s867_s18 + $0x50] sm:$0xff]  }
  0x17   : > { %v316_v31 = vmax.f32 %v284_v22, 0.0  ;;  %v317_v32 = vmax.f32 %v285_v23, 0.0  ;;  %v318_v33 = vmax.f32 %v286_v24, 0.0  ;;  %v319_v34 = vmax.f32 %v287_v25, 0.0  ;;  %v795_v23 = vld [vmem:[%s867_s18 + $0x58] sm:$0xff]  }
  0x18   : > { %v320_v36 = vmax.f32 %v288_v26, 0.0  ;;  %v321_v37 = vmax.f32 %v289_v27, 0.0  ;;  %v322_v38 = vmax.f32 %v290_v28, 0.0  ;;  %v323_v39 = vmax.f32 %v291_v29, 0.0 }
  0x19   : > { %v708_v41 = vpack.c.bf16 %v317_v32, %v316_v31  ;;  %v713_v42 = vpack.c.bf16 %v319_v34, %v318_v33  ;;  %v659_v43 = vunpack.c.l.bf16 %v788_v30  ;;  %v660_v44 = vunpack.c.h.bf16 %v788_v30 }
  0x1a   : > { %v718_v46 = vpack.c.bf16 %v321_v37, %v320_v36  ;;  %v723_v47 = vpack.c.bf16 %v323_v39, %v322_v38  ;;  %v663_v48 = vunpack.c.l.bf16 %v789_v35  ;;  %v664_v49 = vunpack.c.h.bf16 %v789_v35 }
  0x1b   : > { %709 = vst [vmem:[%s906_s25] sm:$0xff] %v708_v41   ;;  %800 = vst [vmem:[%s906_s25 + $0x8] sm:$0xff] %v713_v42   ;;  %v253_v50 = vmul.f32 %v659_v43, %v872_v0  ;;  %v254_v51 = vmul.f32 %v660_v44, %v872_v0  ;;  %v667_v52 = vunpack.c.l.bf16 %v790_v40  ;;  %v668_v53 = vunpack.c.h.bf16 %v790_v40  ;;  %v796_v40 = vld [vmem:[%s867_s18 + $0x60] sm:$0xff]  }
  0x1c   : > { %801 = vst [vmem:[%s906_s25 + $0x10] sm:$0xff] %v718_v46   ;;  %802 = vst [vmem:[%s906_s25 + $0x18] sm:$0xff] %v723_v47   ;;  %v255_v54 = vmul.f32 %v663_v48, %v872_v0  ;;  %v256_v55 = vmul.f32 %v664_v49, %v872_v0  ;;  %v671_v56 = vunpack.c.l.bf16 %v791_v45  ;;  %v672_v57 = vunpack.c.h.bf16 %v791_v45 }
  0x1d   : > { %v292_v58 = vadd.f32 %v881_v9, %v253_v50  ;;  %v293_v59 = vadd.f32 %v881_v9, %v254_v51  ;;  %v257_v60 = vmul.f32 %v667_v52, %v872_v0  ;;  %v258_v61 = vmul.f32 %v668_v53, %v872_v0  ;;  %v797_v53 = vld [vmem:[%s867_s18 + $0x68] sm:$0xff]  }
  0x1e   : > { %v294_v62 = vadd.f32 %v881_v9, %v255_v54  ;;  %v295_v63 = vadd.f32 %v881_v9, %v256_v55  ;;  %v259_v1 = vmul.f32 %v671_v56, %v872_v0  ;;  %v260_v2 = vmul.f32 %v672_v57, %v872_v0 }
  0x1f   : > { %v324_v4 = vmax.f32 %v292_v58, 0.0  ;;  %v325_v5 = vmax.f32 %v293_v59, 0.0  ;;  %v296_v6 = vadd.f32 %v881_v9, %v257_v60  ;;  %v297_v7 = vadd.f32 %v881_v9, %v258_v61  ;;  %v798_v58 = vld [vmem:[%s867_s18 + $0x70] sm:$0xff]  }
  0x20   : > { %v326_v8 = vmax.f32 %v294_v62, 0.0  ;;  %v327_v10 = vmax.f32 %v295_v63, 0.0  ;;  %v298_v11 = vadd.f32 %v881_v9, %v259_v1  ;;  %v299_v12 = vadd.f32 %v881_v9, %v260_v2  ;;  %v799_v63 = vld [vmem:[%s867_s18 + $0x78] sm:$0xff]  }
  0x21   : > { %v728_v14 = vpack.c.bf16 %v325_v5, %v324_v4  ;;  %v328_v15 = vmax.f32 %v296_v6, 0.0  ;;  %v329_v16 = vmax.f32 %v297_v7, 0.0  ;;  %v675_v17 = vunpack.c.l.bf16 %v792_v3 }
  0x22   : > { %v733_v19 = vpack.c.bf16 %v327_v10, %v326_v8  ;;  %v330_v20 = vmax.f32 %v298_v11, 0.0  ;;  %v331_v21 = vmax.f32 %v299_v12, 0.0  ;;  %v676_v22 = vunpack.c.h.bf16 %v792_v3 }
  0x23   : > { %803 = vst [vmem:[%s906_s25 + $0x20] sm:$0xff] %v728_v14   ;;  %v738_v24 = vpack.c.bf16 %v329_v16, %v328_v15  ;;  %v261_v25 = vmul.f32 %v675_v17, %v872_v0  ;;  %v679_v26 = vunpack.c.l.bf16 %v793_v13  ;;  %v680_v27 = vunpack.c.h.bf16 %v793_v13 }
  0x24   : > { %804 = vst [vmem:[%s906_s25 + $0x28] sm:$0xff] %v733_v19   ;;  %v743_v28 = vpack.c.bf16 %v331_v21, %v330_v20  ;;  %v262_v29 = vmul.f32 %v676_v22, %v872_v0  ;;  %v683_v30 = vunpack.c.l.bf16 %v794_v18  ;;  %v684_v31 = vunpack.c.h.bf16 %v794_v18 }
  0x25   : > { %805 = vst [vmem:[%s906_s25 + $0x30] sm:$0xff] %v738_v24   ;;  %v300_v32 = vadd.f32 %v881_v9, %v261_v25  ;;  %v263_v33 = vmul.f32 %v679_v26, %v872_v0  ;;  %v264_v34 = vmul.f32 %v680_v27, %v872_v0  ;;  %v687_v35 = vunpack.c.l.bf16 %v795_v23 }
  0x26   : > { %806 = vst [vmem:[%s906_s25 + $0x38] sm:$0xff] %v743_v28   ;;  %v301_v36 = vadd.f32 %v881_v9, %v262_v29  ;;  %v265_v37 = vmul.f32 %v683_v30, %v872_v0  ;;  %v266_v38 = vmul.f32 %v684_v31, %v872_v0  ;;  %v688_v39 = vunpack.c.h.bf16 %v795_v23 }
  0x27   : > { %v332_v41 = vmax.f32 %v300_v32, 0.0  ;;  %v302_v42 = vadd.f32 %v881_v9, %v263_v33  ;;  %v303_v43 = vadd.f32 %v881_v9, %v264_v34  ;;  %v267_v44 = vmul.f32 %v687_v35, %v872_v0 }
  0x28   : > { %v333_v45 = vmax.f32 %v301_v36, 0.0  ;;  %v304_v46 = vadd.f32 %v881_v9, %v265_v37  ;;  %v305_v47 = vadd.f32 %v881_v9, %v266_v38  ;;  %v268_v48 = vmul.f32 %v688_v39, %v872_v0 }
  0x29   : > { %v334_v49 = vmax.f32 %v302_v42, 0.0  ;;  %v335_v50 = vmax.f32 %v303_v43, 0.0  ;;  %v306_v51 = vadd.f32 %v881_v9, %v267_v44  ;;  %v691_v52 = vunpack.c.l.bf16 %v796_v40 }
  0x2a   : > { %v748_v54 = vpack.c.bf16 %v333_v45, %v332_v41  ;;  %v336_v55 = vmax.f32 %v304_v46, 0.0  ;;  %v337_v56 = vmax.f32 %v305_v47, 0.0  ;;  %v307_v57 = vadd.f32 %v881_v9, %v268_v48 }
  0x2b   : > { %v753_v59 = vpack.c.bf16 %v335_v50, %v334_v49  ;;  %v338_v60 = vmax.f32 %v306_v51, 0.0  ;;  %v692_v61 = vunpack.c.h.bf16 %v796_v40  ;;  %v269_v62 = vmul.f32 %v691_v52, %v872_v0 }
  0x2c   : > { %807 = vst [vmem:[%s906_s25 + $0x40] sm:$0xff] %v748_v54   ;;  %v758_v1 = vpack.c.bf16 %v337_v56, %v336_v55  ;;  %v339_v2 = vmax.f32 %v307_v57, 0.0  ;;  %v695_v3 = vunpack.c.l.bf16 %v797_v53  ;;  %v696_v4 = vunpack.c.h.bf16 %v797_v53 }
  0x2d   : > { %808 = vst [vmem:[%s906_s25 + $0x48] sm:$0xff] %v753_v59   ;;  %v270_v5 = vmul.f32 %v692_v61, %v872_v0  ;;  %v308_v6 = vadd.f32 %v881_v9, %v269_v62  ;;  %v699_v7 = vunpack.c.l.bf16 %v798_v58  ;;  %v700_v8 = vunpack.c.h.bf16 %v798_v58 }
  0x2e   : > { %809 = vst [vmem:[%s906_s25 + $0x50] sm:$0xff] %v758_v1   ;;  %v763_v10 = vpack.c.bf16 %v339_v2, %v338_v60  ;;  %v271_v11 = vmul.f32 %v695_v3, %v872_v0  ;;  %v272_v12 = vmul.f32 %v696_v4, %v872_v0  ;;  %v703_v13 = vunpack.c.l.bf16 %v799_v63 }
  0x2f   : > { %v309_v14 = vadd.f32 %v881_v9, %v270_v5  ;;  %v340_v15 = vmax.f32 %v308_v6, 0.0  ;;  %v273_v16 = vmul.f32 %v699_v7, %v872_v0  ;;  %v274_v17 = vmul.f32 %v700_v8, %v872_v0 }
  0x30   : > { %810 = vst [vmem:[%s906_s25 + $0x58] sm:$0xff] %v763_v10   ;;  %v310_v18 = vadd.f32 %v881_v9, %v271_v11  ;;  %v311_v19 = vadd.f32 %v881_v9, %v272_v12  ;;  %v704_v20 = vunpack.c.h.bf16 %v799_v63  ;;  %v275_v21 = vmul.f32 %v703_v13, %v872_v0 }
  0x31   : > { %v341_v22 = vmax.f32 %v309_v14, 0.0  ;;  %v312_v23 = vadd.f32 %v881_v9, %v273_v16  ;;  %v313_v24 = vadd.f32 %v881_v9, %v274_v17 }
  0x32   : > { %v342_v25 = vmax.f32 %v310_v18, 0.0  ;;  %v343_v26 = vmax.f32 %v311_v19, 0.0  ;;  %v276_v27 = vmul.f32 %v704_v20, %v872_v0  ;;  %v314_v28 = vadd.f32 %v881_v9, %v275_v21 }
  0x33   : > { %v768_v29 = vpack.c.bf16 %v341_v22, %v340_v15  ;;  %v344_v30 = vmax.f32 %v312_v23, 0.0  ;;  %v345_v31 = vmax.f32 %v313_v24, 0.0 }
  0x34   : > { %v773_v32 = vpack.c.bf16 %v343_v26, %v342_v25  ;;  %v315_v33 = vadd.f32 %v881_v9, %v276_v27  ;;  %v346_v34 = vmax.f32 %v314_v28, 0.0 }
  0x35   : > { %811 = vst [vmem:[%s906_s25 + $0x60] sm:$0xff] %v768_v29   ;;  %v778_v35 = vpack.c.bf16 %v345_v31, %v344_v30 }
  0x36   : > { %812 = vst [vmem:[%s906_s25 + $0x68] sm:$0xff] %v773_v32   ;;  %v347_v36 = vmax.f32 %v315_v33, 0.0 }
  0x37   : > { %813 = vst [vmem:[%s906_s25 + $0x70] sm:$0xff] %v778_v35  }
  0x38   : > { %v783_v37 = vpack.c.bf16 %v347_v36, %v346_v34 }
  0x3a   : > { %814 = vst [vmem:[%s906_s25 + $0x78] sm:$0xff] %v783_v37  }
  0x3b PF: > { %s13_s12 = sadd.s32 1, %s829_s12  }
  0x3c   : > { %p10_p4 = scmp.ge.s32.totalorder %s13_s12, 4  }
  0x3e   :  { %12 = sbr.rel (!%p10_p4) target bundleno = 1 (0x1), region = 62 }

// kernel: basic_block_forward.5
= control target key start
LH: loop header
LB: loop body
LE: loop exit
PB: predicated region body
PF: predicated region fallthrough
CT: control target
= control target key end

     0   :  { %s1653_s15 = smov 0   ;;  %s1655_s16 = smov 0   ;;  %s1909_s0 = inlined_call_operand.vmem [shape: bf16[512,40], index: 0, kind: input, shape index: {}]   ;;  %s1910_s1 = inlined_call_operand.vmem [shape: bf16[40,128], index: 1, kind: input, shape index: {}]   ;;  %s1911_s2 = inlined_call_operand.vmem [shape: bf16[512,128], index: 2, kind: output, shape index: {0}]   ;;  %s1912_s3 = inlined_call_operand.vmem [shape: f32[2,1,128], index: 3, kind: output, shape index: {1}]   ;;  %s1913_s4 = inlined_call_operand.vmem [shape: f32[2,1,128], index: 4, kind: output, shape index: {2}]  }
   0x1   :  { %s1657_s17 = smov 0  }
   0x2 LB: > { %s34_s18 = sadd.s32 1, %s1622_s16  ;;  %p1295_p0 = scmp.ge.s32.totalorder %s1626_s17, 1  ;;  %s1626_s17 = sphi %s1657_s17, %s15_s17   ;;  %s1622_s16 = sphi %s1655_s16, %s1915_s16   ;;  %s1618_s15 = sphi %s1653_s15, %s1914_s15  }
   0x3   : > { %p36_p1 = scmp.ge.s32.totalorder %s34_s18, 2  ;;  %p214_p2 = scmp.lt.s32.totalorder %s1626_s17, 3 }
   0x5   : > { %s1917_s18 = smov (%p36_p1, %s34_s18), 0  ;;  %p215_p3 = pnand %p1295_p0, %p214_p2 }
   0x6   : > { %v1585_v0 = vld [vmem:[%s1910_s1] sm:$0xff] (!%p215_p3)   ;;  %v1586_v1 = vld [vmem:[%s1910_s1 + $0x8] sm:$0xff] (!%p215_p3)   ;;  %s1296_s23 = sshll.u32 (!%p215_p3), %s1618_s15, 5  ;;  %v1587_v2 = vld [vmem:[%s1910_s1 + $0x10] ss:$0 sps:$4 sm:$0xff] (!%p215_p3)   ;;  %vm555_vm0 = vcmask (!%p215_p3), 1043456  }
   0x7   : > { %218 = sbr.rel (%p215_p3) target bundleno = 395 (0x18b), region = 28  ;;  %1515 = vmatprep.subr.bf16.mxu0 (!%p215_p3), %v1585_v0  ;;  %p267_p4 = scmp.lt.s32.totalorder (!%p215_p3), %s1296_s23, 63  ;;  %1553 = vmatprep.subr.bf16.mxu1 (!%p215_p3), %v1585_v0  ;;  %vm506_vm1 = vcmask (!%p215_p3), 326656   ;;  %v557_v3 = vsel (!%p215_p3), %vm555_vm0, %v1587_v2, 0 }
   0x8   : > { %1516 = vmatpush3.bf16.msra.mxu0 (!%p215_p3), %v1585_v0  ;;  %1556 = vmatpush3.bf16.msra.mxu1 (!%p215_p3), %v1585_v0  ;;  %p293_p5 = scmp.lt.s32.totalorder (!%p215_p3), %s1618_s15, 1 }
   0x9   : > { %1517 = vmatprep.subr.bf16.mxu0 (!%p215_p3), %v1586_v1  ;;  %1554 = vmatprep.subr.bf16.mxu1 (!%p215_p3), %v1586_v1 }
   0xc   : > { %1518 = vmatpush3.bf16.msra.mxu0 (!%p215_p3), %v1586_v1  ;;  %1557 = vmatpush3.bf16.msra.mxu1 (!%p215_p3), %v1586_v1 }
   0xd   : > { %1559 = vmatprep.subr.msk.bf16.mxu0 (!%p215_p3), %vm555_vm0, %v1587_v2  ;;  %1560 = vmatprep.subr.msk.bf16.mxu1 (!%p215_p3), %vm555_vm0, %v1587_v2 }
   0xe   : > { %s1919_s23 = smov (!%p267_p4, %s1296_s23), 63  ;;  %s1921_s15 = smov (!%p293_p5, %s1618_s15), 1 }
   0xf   : > { %s1297_s26 = sshll.u32 %s1919_s23, 2  ;;  %s298_s9 = scalar_lea.vmem %s1912_s3, %s1921_s15 }
  0x10   : > { %s1691_s29 = scalar_lea.vmem %s1909_s0, %s1297_s26  ;;  %1520 = vmatpush3.bf16.msra.mxu0 %v557_v3  ;;  %1558 = vmatpush3.bf16.msra.mxu1 %v557_v3  ;;  %s1734_s6 = scalar_lea.vmem %s1911_s2, %s1297_s26 }
  0x11   : > { %v1588_v4 = vld [vmem:[%s1691_s29] sm:$0xff]   ;;  %v1589_v5 = vld [vmem:[%s1691_s29 + $0x8] sm:$0xff]   ;;  %v1590_v6 = vld [vmem:[%s1691_s29 + $0x10] sm:$0xff]   ;;  %s304_s12 = scalar_lea.vmem %s1913_s4, %s1921_s15 }
  0x12   : > { %1521 = vmatprep.mubr.msk.bf16.mxu0 %vm506_vm1, %v1588_v4  ;;  %v1591_v7 = vld [vmem:[%s1691_s29 + $0x18] sm:$0xff]   ;;  %v1596_v8 = vld [vmem:[%s1691_s29 + $0x40] sm:$0xff]   ;;  %v1597_v9 = vld [vmem:[%s1691_s29 + $0x48] sm:$0xff]  }
  0x13   : > { %1522 = vmatmul.mubr.msk.bf16.vlgmr.msra.gmra.mrb[0].mxu0 %vm506_vm1, %v1589_v5  ;;  %1537 = vmatprep.mubr.msk.bf16.mxu1 %vm506_vm1, %v1596_v8  ;;  %v1598_v10 = vld [vmem:[%s1691_s29 + $0x50] sm:$0xff]   ;;  %v1592_v11 = vld [vmem:[%s1691_s29 + $0x20] sm:$0xff]   ;;  %v1599_v12 = vld [vmem:[%s1691_s29 + $0x58] sm:$0xff]  }
  0x14   : > { %1525 = vmatprep.mubr.msk.bf16.mxu0 %vm506_vm1, %v1590_v6  ;;  %1538 = vmatmul.mubr.msk.bf16.vlgmr.msra.gmra.mrb[0].mxu1 %vm506_vm1, %v1597_v9  ;;  %v1600_v13 = vld [vmem:[%s1691_s29 + $0x60] sm:$0xff]   ;;  %v1593_v14 = vld [vmem:[%s1691_s29 + $0x28] sm:$0xff]   ;;  %v1594_v15 = vld [vmem:[%s1691_s29 + $0x30] sm:$0xff]  }
  0x15   : > { %1541 = vmatprep.mubr.msk.bf16.mxu1 %vm506_vm1, %v1598_v10  ;;  %v1601_v16 = vld [vmem:[%s1691_s29 + $0x68] sm:$0xff]   ;;  %v1602_v17 = vld [vmem:[%s1691_s29 + $0x70] sm:$0xff]   ;;  %v1595_v18 = vld [vmem:[%s1691_s29 + $0x38] sm:$0xff]  }
  0x16   : > { %v1603_v19 = vld [vmem:[%s1691_s29 + $0x78] sm:$0xff]  }
  0x1b   : > { %1526 = vmatmul.mubr.msk.bf16.gmra.mrb[4].mxu0 %vm506_vm1, %v1591_v7 }
  0x1c   : > { %1529 = vmatprep.mubr.msk.bf16.mxu0 %vm506_vm1, %v1592_v11  ;;  %1542 = vmatmul.mubr.msk.bf16.gmra.mrb[4].mxu1 %vm506_vm1, %v1599_v12 }
  0x1d   : > { %1545 = vmatprep.mubr.msk.bf16.mxu1 %vm506_vm1, %v1600_v13 }
  0x23   : > { %1530 = vmatmul.mubr.msk.bf16.gmra.mrb[8].mxu0 %vm506_vm1, %v1593_v14 }
  0x24   : > { %1533 = vmatprep.mubr.msk.bf16.mxu0 %vm506_vm1, %v1594_v15  ;;  %1546 = vmatmul.mubr.msk.bf16.gmra.mrb[8].mxu1 %vm506_vm1, %v1601_v16 }
  0x25   : > { %1549 = vmatprep.mubr.msk.bf16.mxu1 %vm506_vm1, %v1602_v17 }
  0x2b   : > { %1534 = vmatmul.mubr.msk.bf16.gmra.mrb[12].mxu0 %vm506_vm1, %v1595_v18 }
  0x2c   : > { %1550 = vmatmul.mubr.msk.bf16.gmra.mrb[12].mxu1 %vm506_vm1, %v1603_v19 }
  0xe6   : > { %v1725_v20 = vpop.f32.mrb[0].mxu0 }
  0xe7   : > { %v1727_v21 = vpop.f32.mrb[1].mxu0  ;;  %v1747_v27 = vpop.f32.mrb[0].mxu1 }
  0xe8   : > { %v1736_v22 = vpop.f32.mrb[2].mxu0  ;;  %v1751_v29 = vpop.f32.mrb[1].mxu1 }
  0xe9   : > { %v1409_v23 = vpack.c.bf16 %v1736_v22, %v1725_v20  ;;  %v1740_v24 = vpop.f32.mrb[3].mxu0  ;;  %v1753_v30 = vpop.f32.mrb[2].mxu1 }
  0xea   : > { %v1404_v25 = vpack.c.bf16 %v1740_v24, %v1727_v21  ;;  %v979_v26 = vadd.f32 %v1740_v24, %v1727_v21  ;;  %v1449_v33 = vpack.c.bf16 %v1753_v30, %v1747_v27  ;;  %v1760_v34 = vpop.f32.mrb[3].mxu1 }
  0xeb   : > { %1481 = vst [vmem:[%s1734_s6 + $0x8] sm:$0xff] %v1409_v23   ;;  %v1444_v36 = vpack.c.bf16 %v1760_v34, %v1751_v29 }
  0xec   : > { %1405 = vst [vmem:[%s1734_s6] sm:$0xff] %v1404_v25   ;;  %v980_v28 = vadd.f32 %v1725_v20, %v979_v26  ;;  %1489 = vst [vmem:[%s1734_s6 + $0x48] sm:$0xff] %v1449_v33  }
  0xed   : > { %1488 = vst [vmem:[%s1734_s6 + $0x40] sm:$0xff] %v1444_v36  }
  0xee   : > { %v1755_v31 = vpop.f32.mrb[4].mxu0  ;;  %v981_v32 = vadd.f32 %v1736_v22, %v980_v28 }
  0xef   : > { %v1762_v35 = vpop.f32.mrb[5].mxu0  ;;  %v1779_v43 = vpop.f32.mrb[4].mxu1 }
  0xf0   : > { %v982_v37 = vadd.f32 %v981_v32, %v1762_v35  ;;  %v1767_v38 = vpop.f32.mrb[6].mxu0  ;;  %v1783_v45 = vpop.f32.mrb[5].mxu1 }
  0xf1   : > { %v1419_v39 = vpack.c.bf16 %v1767_v38, %v1755_v31  ;;  %v1772_v40 = vpop.f32.mrb[7].mxu0  ;;  %v1785_v46 = vpop.f32.mrb[6].mxu1 }
  0xf2   : > { %v1414_v41 = vpack.c.bf16 %v1772_v40, %v1762_v35  ;;  %v983_v42 = vadd.f32 %v982_v37, %v1772_v40  ;;  %v1459_v49 = vpack.c.bf16 %v1785_v46, %v1779_v43  ;;  %v1792_v50 = vpop.f32.mrb[7].mxu1 }
  0xf3   : > { %1483 = vst [vmem:[%s1734_s6 + $0x18] sm:$0xff] %v1419_v39   ;;  %v1454_v52 = vpack.c.bf16 %v1792_v50, %v1783_v45 }
  0xf4   : > { %1482 = vst [vmem:[%s1734_s6 + $0x10] sm:$0xff] %v1414_v41   ;;  %v984_v44 = vadd.f32 %v1755_v31, %v983_v42  ;;  %1491 = vst [vmem:[%s1734_s6 + $0x58] sm:$0xff] %v1459_v49  }
  0xf5   : > { %1490 = vst [vmem:[%s1734_s6 + $0x50] sm:$0xff] %v1454_v52  }
  0xf6   : > { %v1787_v47 = vpop.f32.mrb[8].mxu0  ;;  %v985_v48 = vadd.f32 %v1767_v38, %v984_v44 }
  0xf7   : > { %v1794_v51 = vpop.f32.mrb[9].mxu0  ;;  %v1811_v59 = vpop.f32.mrb[8].mxu1 }
  0xf8   : > { %v986_v53 = vadd.f32 %v985_v48, %v1794_v51  ;;  %v1799_v54 = vpop.f32.mrb[10].mxu0  ;;  %v1815_v61 = vpop.f32.mrb[9].mxu1 }
  0xf9   : > { %v1429_v55 = vpack.c.bf16 %v1799_v54, %v1787_v47  ;;  %v1804_v56 = vpop.f32.mrb[11].mxu0  ;;  %v1817_v62 = vpop.f32.mrb[10].mxu1 }
  0xfa   : > { %v1424_v57 = vpack.c.bf16 %v1804_v56, %v1794_v51  ;;  %v987_v58 = vadd.f32 %v986_v53, %v1804_v56  ;;  %v1469_v1 = vpack.c.bf16 %v1817_v62, %v1811_v59  ;;  %v1824_v2 = vpop.f32.mrb[11].mxu1 }
  0xfb   : > { %1485 = vst [vmem:[%s1734_s6 + $0x28] sm:$0xff] %v1429_v55   ;;  %v1464_v4 = vpack.c.bf16 %v1824_v2, %v1815_v61 }
  0xfc   : > { %1484 = vst [vmem:[%s1734_s6 + $0x20] sm:$0xff] %v1424_v57   ;;  %v988_v60 = vadd.f32 %v1787_v47, %v987_v58  ;;  %1493 = vst [vmem:[%s1734_s6 + $0x68] sm:$0xff] %v1469_v1  }
  0xfd   : > { %1492 = vst [vmem:[%s1734_s6 + $0x60] sm:$0xff] %v1464_v4  }
  0xfe   : > { %v1819_v63 = vpop.f32.mrb[12].mxu0  ;;  %v989_v0 = vadd.f32 %v1799_v54, %v988_v60 }
  0xff   : > { %v641_v3 = vpop.f32.mrb[13].mxu0  ;;  %v1832_v11 = vpop.f32.mrb[12].mxu1 }
 0x100   : > { %v990_v5 = vadd.f32 %v989_v0, %v641_v3  ;;  %v1536_v6 = vpop.f32.mrb[14].mxu0  ;;  %v1836_v13 = vpop.f32.mrb[13].mxu1 }
 0x101   : > { %v1439_v7 = vpack.c.bf16 %v1536_v6, %v1819_v63  ;;  %v644_v8 = vpop.f32.mrb[15].mxu0  ;;  %v1838_v14 = vpop.f32.mrb[14].mxu1 }
 0x102   : > { %v1434_v9 = vpack.c.bf16 %v644_v8, %v641_v3  ;;  %v991_v10 = vadd.f32 %v990_v5, %v644_v8  ;;  %v1479_v16 = vpack.c.bf16 %v1838_v14, %v1832_v11  ;;  %v708_v17 = vpop.f32.mrb[15].mxu1 }
 0x103   : > { %1487 = vst [vmem:[%s1734_s6 + $0x38] sm:$0xff] %v1439_v7   ;;  %v1474_v18 = vpack.c.bf16 %v708_v17, %v1836_v13 }
 0x104   : > { %1486 = vst [vmem:[%s1734_s6 + $0x30] sm:$0xff] %v1434_v9   ;;  %v992_v12 = vadd.f32 %v1819_v63, %v991_v10  ;;  %1495 = vst [vmem:[%s1734_s6 + $0x78] sm:$0xff] %v1479_v16  }
 0x105   : > { %1494 = vst [vmem:[%s1734_s6 + $0x70] sm:$0xff] %v1474_v18  }
 0x106   : > { %v993_v15 = vadd.f32 %v1536_v6, %v992_v12 }
 0x108   : > { %v994_v19 = vadd.f32 %v993_v15, %v1751_v29 }
 0x10a   : > { %v995_v23 = vadd.f32 %v994_v19, %v1760_v34 }
 0x10c   : > { %v996_v25 = vadd.f32 %v1747_v27, %v995_v23 }
 0x10e   : > { %v997_v26 = vadd.f32 %v1753_v30, %v996_v25 }
 0x110   : > { %v998_v28 = vadd.f32 %v997_v26, %v1783_v45 }
 0x112   : > { %v999_v32 = vadd.f32 %v998_v28, %v1792_v50 }
 0x114   : > { %v1000_v33 = vadd.f32 %v1779_v43, %v999_v32 }
 0x116   : > { %v1001_v36 = vadd.f32 %v1785_v46, %v1000_v33 }
 0x118   : > { %v1002_v37 = vadd.f32 %v1001_v36, %v1815_v61 }
 0x11a   : > { %v1003_v39 = vadd.f32 %v1002_v37, %v1824_v2 }
 0x11c   : > { %v1004_v41 = vadd.f32 %v1811_v59, %v1003_v39 }
 0x11e   : > { %v1005_v42 = vadd.f32 %v1817_v62, %v1004_v41 }
 0x120   : > { %v1006_v44 = vadd.f32 %v1005_v42, %v1836_v13 }
 0x122   : > { %v1007_v48 = vadd.f32 %v1006_v44, %v708_v17 }
 0x124   : > { %v1008_v49 = vadd.f32 %v1832_v11, %v1007_v48 }
 0x126   : > { %v1009_v52 = vadd.f32 %v1838_v14, %v1008_v49 }
 0x128   : > { %v1010_v53 = vrot.slane %v1009_v52, 4 }
 0x12a   : > { %v1011_v55 = vadd.f32 %v1010_v53, %v1009_v52 }
 0x12c   : > { %v1012_v57 = vrot.slane %v1011_v55, 2 }
 0x12e   : > { %v1013_v58 = vadd.f32 %v1012_v57, %v1011_v55 }
 0x130   : > { %v1014_v60 = vrot.slane %v1013_v58, 1 }
 0x132   : > { %v1015_v0 = vadd.f32 %v1014_v60, %v1013_v58 }
 0x134   : > { %v1017_v1 = vmul.f32 0.00390625, %v1015_v0  ;;  %1050 = vst [vmem:[%s298_s9] sm:$0x1] %v1015_v0 }
 0x136   : > { %v1018_v4 = vsub.f32 %v1727_v21, %v1017_v1  ;;  %v1019_v5 = vsub.f32 %v1740_v24, %v1017_v1  ;;  %v1020_v7 = vsub.f32 %v1725_v20, %v1017_v1  ;;  %v1021_v9 = vsub.f32 %v1736_v22, %v1017_v1 }
 0x137   : > { %v1022_v10 = vsub.f32 %v1762_v35, %v1017_v1  ;;  %v1023_v12 = vsub.f32 %v1772_v40, %v1017_v1  ;;  %v1024_v15 = vsub.f32 %v1755_v31, %v1017_v1  ;;  %v1025_v16 = vsub.f32 %v1767_v38, %v1017_v1 }
 0x138   : > { %v1026_v18 = vsub.f32 %v1794_v51, %v1017_v1  ;;  %v1027_v19 = vsub.f32 %v1804_v56, %v1017_v1  ;;  %v1028_v21 = vsub.f32 %v1787_v47, %v1017_v1  ;;  %v1029_v24 = vsub.f32 %v1799_v54, %v1017_v1 }
 0x139   : > { %v1030_v23 = vsub.f32 %v641_v3, %v1017_v1  ;;  %v1031_v20 = vsub.f32 %v644_v8, %v1017_v1  ;;  %v1032_v22 = vsub.f32 %v1819_v63, %v1017_v1  ;;  %v1033_v25 = vsub.f32 %v1536_v6, %v1017_v1 }
 0x13a   : > { %v1034_v35 = vsub.f32 %v1751_v29, %v1017_v1  ;;  %v1035_v40 = vsub.f32 %v1760_v34, %v1017_v1  ;;  %v1036_v31 = vsub.f32 %v1747_v27, %v1017_v1  ;;  %v1037_v38 = vsub.f32 %v1753_v30, %v1017_v1 }
 0x13b   : > { %v1038_v51 = vsub.f32 %v1783_v45, %v1017_v1  ;;  %v1039_v56 = vsub.f32 %v1792_v50, %v1017_v1  ;;  %v1040_v47 = vsub.f32 %v1779_v43, %v1017_v1  ;;  %v1041_v54 = vsub.f32 %v1785_v46, %v1017_v1 }
 0x13c   : > { %v1042_v3 = vsub.f32 %v1815_v61, %v1017_v1  ;;  %v1043_v63 = vsub.f32 %v1824_v2, %v1017_v1  ;;  %v1044_v29 = vsub.f32 %v1811_v59, %v1017_v1  ;;  %v1045_v34 = vsub.f32 %v1817_v62, %v1017_v1 }
 0x13d   : > { %v1046_v27 = vsub.f32 %v1836_v13, %v1017_v1  ;;  %v1047_v6 = vsub.f32 %v708_v17, %v1017_v1  ;;  %v1048_v30 = vsub.f32 %v1832_v11, %v1017_v1  ;;  %v1049_v45 = vsub.f32 %v1838_v14, %v1017_v1 }
 0x13e   : > { %v1051_v50 = vmul.f32 %v1018_v4, %v1018_v4  ;;  %v1052_v8 = vmul.f32 %v1019_v5, %v1019_v5  ;;  %v1053_v43 = vmul.f32 %v1020_v7, %v1020_v7  ;;  %v1054_v46 = vmul.f32 %v1021_v9, %v1021_v9 }
 0x13f   : > { %v1055_v61 = vmul.f32 %v1022_v10, %v1022_v10  ;;  %v1056_v2 = vmul.f32 %v1023_v12, %v1023_v12  ;;  %v1057_v59 = vmul.f32 %v1024_v15, %v1024_v15  ;;  %v1058_v62 = vmul.f32 %v1025_v16, %v1025_v16 }
 0x140   : > { %v1083_v26 = vadd.f32 %v1052_v8, %v1051_v50  ;;  %v1059_v13 = vmul.f32 %v1026_v18, %v1026_v18  ;;  %v1060_v39 = vmul.f32 %v1027_v19, %v1027_v19  ;;  %v1061_v41 = vmul.f32 %v1028_v21, %v1028_v21 }
 0x141   : > { %v1062_v42 = vmul.f32 %v1029_v24, %v1029_v24  ;;  %v1063_v48 = vmul.f32 %v1030_v23, %v1030_v23  ;;  %v1064_v52 = vmul.f32 %v1031_v20, %v1031_v20  ;;  %v1065_v55 = vmul.f32 %v1032_v22, %v1032_v22 }
 0x142   : > { %v1084_v28 = vadd.f32 %v1083_v26, %v1053_v43  ;;  %v1066_v58 = vmul.f32 %v1033_v25, %v1033_v25  ;;  %v1067_v0 = vmul.f32 %v1034_v35, %v1034_v35  ;;  %v1068_v4 = vmul.f32 %v1035_v40, %v1035_v40 }
 0x143   : > { %v1069_v7 = vmul.f32 %v1036_v31, %v1036_v31  ;;  %v1070_v10 = vmul.f32 %v1037_v38, %v1037_v38  ;;  %v1071_v15 = vmul.f32 %v1038_v51, %v1038_v51  ;;  %v1072_v18 = vmul.f32 %v1039_v56, %v1039_v56 }
 0x144   : > { %v1085_v32 = vadd.f32 %v1084_v28, %v1054_v46  ;;  %v1073_v21 = vmul.f32 %v1040_v47, %v1040_v47  ;;  %v1074_v23 = vmul.f32 %v1041_v54, %v1041_v54  ;;  %v1075_v22 = vmul.f32 %v1042_v3, %v1042_v3 }
 0x145   : > { %v1076_v25 = vmul.f32 %v1043_v63, %v1043_v63  ;;  %v1077_v35 = vmul.f32 %v1044_v29, %v1044_v29  ;;  %v1078_v40 = vmul.f32 %v1045_v34, %v1045_v34  ;;  %v1079_v26 = vmul.f32 %v1046_v27, %v1046_v27 }
 0x146   : > { %v1086_v33 = vadd.f32 %v1085_v32, %v1055_v61  ;;  %v1080_v46 = vmul.f32 %v1047_v6, %v1047_v6  ;;  %v1081_v28 = vmul.f32 %v1048_v30, %v1048_v30  ;;  %v1082_v61 = vmul.f32 %v1049_v45, %v1049_v45 }
 0x148   : > { %v1087_v36 = vadd.f32 %v1086_v33, %v1056_v2 }
 0x14a   : > { %v1088_v37 = vadd.f32 %v1087_v36, %v1057_v59 }
 0x14c   : > { %v1089_v17 = vadd.f32 %v1088_v37, %v1058_v62 }
 0x14e   : > { %v1090_v11 = vadd.f32 %v1089_v17, %v1059_v13 }
 0x150   : > { %v1091_v14 = vadd.f32 %v1090_v11, %v1060_v39 }
 0x152   : > { %v1092_v44 = vadd.f32 %v1091_v14, %v1061_v41 }
 0x154   : > { %v1093_v49 = vadd.f32 %v1092_v44, %v1062_v42 }
 0x156   : > { %v1094_v53 = vadd.f32 %v1093_v49, %v1063_v48 }
 0x158   : > { %v1095_v57 = vadd.f32 %v1094_v53, %v1064_v52 }
 0x15a   : > { %v1096_v60 = vadd.f32 %v1095_v57, %v1065_v55 }
 0x15c   : > { %v1097_v1 = vadd.f32 %v1096_v60, %v1066_v58 }
 0x15e   : > { %v1098_v5 = vadd.f32 %v1097_v1, %v1067_v0 }
 0x160   : > { %v1099_v9 = vadd.f32 %v1098_v5, %v1068_v4 }
 0x162   : > { %v1100_v12 = vadd.f32 %v1099_v9, %v1069_v7 }
 0x164   : > { %v1101_v16 = vadd.f32 %v1100_v12, %v1070_v10 }
 0x166   : > { %v1102_v19 = vadd.f32 %v1101_v16, %v1071_v15 }
 0x168   : > { %v1103_v24 = vadd.f32 %v1102_v19, %v1072_v18 }
 0x16a   : > { %v1104_v20 = vadd.f32 %v1103_v24, %v1073_v21 }
 0x16c   : > { %v1105_v50 = vadd.f32 %v1104_v20, %v1074_v23 }
 0x16e   : > { %v1106_v8 = vadd.f32 %v1105_v50, %v1075_v22 }
 0x170   : > { %v1107_v43 = vadd.f32 %v1106_v8, %v1076_v25 }
 0x172   : > { %v1108_v31 = vadd.f32 %v1107_v43, %v1077_v35 }
 0x174   : > { %v1109_v38 = vadd.f32 %v1108_v31, %v1078_v40 }
 0x176   : > { %v1110_v51 = vadd.f32 %v1109_v38, %v1079_v26 }
 0x178   : > { %v1111_v56 = vadd.f32 %v1110_v51, %v1080_v46 }
 0x17a   : > { %v1112_v47 = vadd.f32 %v1111_v56, %v1081_v28 }
 0x17c   : > { %v1113_v32 = vadd.f32 %v1112_v47, %v1082_v61 }
 0x17e   : > { %v1114_v54 = vrot.slane %v1113_v32, 4 }
 0x180   : > { %v1115_v2 = vadd.f32 %v1114_v54, %v1113_v32 }
 0x182   : > { %v1116_v3 = vrot.slane %v1115_v2, 2 }
 0x184   : > { %v1117_v33 = vadd.f32 %v1116_v3, %v1115_v2 }
 0x186   : > { %v1118_v63 = vrot.slane %v1117_v33, 1 }
 0x188   : > { %v1119_v29 = vadd.f32 %v1118_v63, %v1117_v33 }
 0x18a   : > { %1120 = vst [vmem:[%s304_s12] sm:$0x1] %v1119_v29 }
 0x18b PF: > { %s15_s17 = sadd.s32 1, %s1626_s17   ;;  %s1914_s15 = smov %s1622_s16 }
 0x18c   : > { %p12_p6 = scmp.ge.s32.totalorder %s15_s17, 4   ;;  %s1915_s16 = smov %s1917_s18 }
 0x18e   :  { %14 = sbr.rel (!%p12_p6) target bundleno = 2 (0x2), region = 93 }

// kernel: basic_block_forward.8
= control target key start
LH: loop header
LB: loop body
LE: loop exit
PB: predicated region body
PF: predicated region fallthrough
CT: control target
= control target key end

     0   :  { %s1613_s15 = smov 0   ;;  %s1615_s16 = smov 0   ;;  %s1868_s0 = inlined_call_operand.vmem [shape: bf16[512,8], index: 0, kind: input, shape index: {}]   ;;  %s1869_s1 = inlined_call_operand.vmem [shape: bf16[8,128], index: 1, kind: input, shape index: {}]   ;;  %s1870_s2 = inlined_call_operand.vmem [shape: bf16[512,128], index: 2, kind: output, shape index: {0}]   ;;  %s1871_s3 = inlined_call_operand.vmem [shape: f32[2,1,128], index: 3, kind: output, shape index: {1}]   ;;  %s1872_s4 = inlined_call_operand.vmem [shape: f32[2,1,128], index: 4, kind: output, shape index: {2}]  }
   0x1   :  { %s1617_s17 = smov 0  }
   0x2 LB: > { %s34_s18 = sadd.s32 1, %s1582_s16  ;;  %p1271_p0 = scmp.ge.s32.totalorder %s1586_s17, 1  ;;  %s1586_s17 = sphi %s1617_s17, %s15_s17   ;;  %s1582_s16 = sphi %s1615_s16, %s1874_s16   ;;  %s1578_s15 = sphi %s1613_s15, %s1873_s15  }
   0x3   : > { %p36_p1 = scmp.ge.s32.totalorder %s34_s18, 2  ;;  %p212_p2 = scmp.lt.s32.totalorder %s1586_s17, 3 }
   0x5   : > { %s1876_s18 = smov (%p36_p1, %s34_s18), 0  ;;  %p213_p3 = pnand %p1271_p0, %p212_p2 }
   0x6   : > { %v401_v0 = vld [vmem:[%s1869_s1] sm:$0xf] (!%p213_p3)  ;;  %vm531_vm0 = vcmask (!%p213_p3), 1043456   ;;  %s1272_s21 = sshll.u32 (!%p213_p3), %s1578_s15, 5  ;;  %vm482_vm1 = vcmask (!%p213_p3), 64512   ;;  %p288_p5 = scmp.lt.s32.totalorder (!%p213_p3), %s1578_s15, 1 }
   0x7   : > { %216 = sbr.rel (%p213_p3) target bundleno = 395 (0x18b), region = 28  ;;  %1522 = vmatprep.subr.msk.bf16.mxu0 (!%p213_p3), %vm531_vm0, %v401_v0  ;;  %v533_v1 = vsel (!%p213_p3), %vm531_vm0, %v401_v0, 0  ;;  %p264_p4 = scmp.lt.s32.totalorder (!%p213_p3), %s1272_s21, 63  ;;  %1523 = vmatprep.subr.msk.bf16.mxu1 (!%p213_p3), %vm531_vm0, %v401_v0 }
   0x8   : > { %1487 = vmatpush3.bf16.msra.mxu0 (!%p213_p3), %v533_v1  ;;  %1521 = vmatpush3.bf16.msra.mxu1 (!%p213_p3), %v533_v1 }
   0xe   : > { %s1878_s21 = smov (!%p264_p4, %s1272_s21), 63  ;;  %s1880_s15 = smov (!%p288_p5, %s1578_s15), 1 }
   0xf   : > { %s1273_s22 = sshll.u32 %s1878_s21, 2  ;;  %s293_s5 = scalar_lea.vmem %s1871_s3, %s1880_s15 }
  0x10   : > { %s1645_s25 = scalar_lea.vmem %s1868_s0, %s1273_s22  ;;  %s1688_s28 = scalar_lea.vmem %s1870_s2, %s1273_s22 }
  0x11   : > { %v1548_v2 = vld [vmem:[%s1645_s25] sm:$0xff]   ;;  %v1549_v3 = vld [vmem:[%s1645_s25 + $0x8] sm:$0xff]   ;;  %v1550_v4 = vld [vmem:[%s1645_s25 + $0x10] sm:$0xff]   ;;  %s299_s8 = scalar_lea.vmem %s1872_s4, %s1880_s15 }
  0x12   : > { %1488 = vmatprep.mubr.msk.bf16.mxu0 %vm482_vm1, %v1548_v2  ;;  %v1551_v5 = vld [vmem:[%s1645_s25 + $0x18] sm:$0xff]   ;;  %v1552_v6 = vld [vmem:[%s1645_s25 + $0x20] sm:$0xff]   ;;  %v1557_v8 = vld [vmem:[%s1645_s25 + $0x48] sm:$0xff]  }
  0x13   : > { %1489 = vmatmul.mubr.msk.bf16.vlgmr.msra.gmra.mrb[0].mxu0 %vm482_vm1, %v1549_v3  ;;  %v1556_v7 = vld [vmem:[%s1645_s25 + $0x40] sm:$0xff]   ;;  %v1558_v9 = vld [vmem:[%s1645_s25 + $0x50] sm:$0xff]   ;;  %v1553_v10 = vld [vmem:[%s1645_s25 + $0x28] sm:$0xff]  }
  0x14   : > { %1492 = vmatprep.mubr.msk.bf16.mxu0 %vm482_vm1, %v1550_v4  ;;  %1504 = vmatprep.mubr.msk.bf16.mxu1 %vm482_vm1, %v1556_v7  ;;  %v1559_v11 = vld [vmem:[%s1645_s25 + $0x58] sm:$0xff]   ;;  %v1554_v12 = vld [vmem:[%s1645_s25 + $0x30] sm:$0xff]   ;;  %v1560_v13 = vld [vmem:[%s1645_s25 + $0x60] sm:$0xff]  }
  0x15   : > { %1505 = vmatmul.mubr.msk.bf16.vlgmr.msra.gmra.mrb[0].mxu1 %vm482_vm1, %v1557_v8  ;;  %v1555_v14 = vld [vmem:[%s1645_s25 + $0x38] sm:$0xff]   ;;  %v1561_v15 = vld [vmem:[%s1645_s25 + $0x68] sm:$0xff]   ;;  %v1562_v16 = vld [vmem:[%s1645_s25 + $0x70] sm:$0xff]  }
  0x16   : > { %1508 = vmatprep.mubr.msk.bf16.mxu1 %vm482_vm1, %v1558_v9  ;;  %v1563_v17 = vld [vmem:[%s1645_s25 + $0x78] sm:$0xff]  }
  0x1b   : > { %1493 = vmatmul.mubr.msk.bf16.gmra.mrb[4].mxu0 %vm482_vm1, %v1551_v5 }
  0x1c   : > { %1496 = vmatprep.mubr.msk.bf16.mxu0 %vm482_vm1, %v1552_v6 }
  0x1d   : > { %1509 = vmatmul.mubr.msk.bf16.gmra.mrb[4].mxu1 %vm482_vm1, %v1559_v11 }
  0x1e   : > { %1512 = vmatprep.mubr.msk.bf16.mxu1 %vm482_vm1, %v1560_v13 }
  0x23   : > { %1497 = vmatmul.mubr.msk.bf16.gmra.mrb[8].mxu0 %vm482_vm1, %v1553_v10 }
  0x24   : > { %1500 = vmatprep.mubr.msk.bf16.mxu0 %vm482_vm1, %v1554_v12 }
  0x25   : > { %1513 = vmatmul.mubr.msk.bf16.gmra.mrb[8].mxu1 %vm482_vm1, %v1561_v15 }
  0x26   : > { %1516 = vmatprep.mubr.msk.bf16.mxu1 %vm482_vm1, %v1562_v16 }
  0x2b   : > { %1501 = vmatmul.mubr.msk.bf16.gmra.mrb[12].mxu0 %vm482_vm1, %v1555_v14 }
  0x2d   : > { %1517 = vmatmul.mubr.msk.bf16.gmra.mrb[12].mxu1 %vm482_vm1, %v1563_v17 }
  0xe6   : > { %v1679_v18 = vpop.f32.mrb[0].mxu0 }
  0xe7   : > { %v1681_v19 = vpop.f32.mrb[1].mxu0 }
  0xe8   : > { %v1690_v20 = vpop.f32.mrb[2].mxu0  ;;  %v1706_v28 = vpop.f32.mrb[0].mxu1 }
  0xe9   : > { %v1382_v21 = vpack.c.bf16 %v1690_v20, %v1679_v18  ;;  %v1694_v22 = vpop.f32.mrb[3].mxu0  ;;  %v1710_v30 = vpop.f32.mrb[1].mxu1 }
  0xea   : > { %v1377_v23 = vpack.c.bf16 %v1694_v22, %v1681_v19  ;;  %v955_v24 = vadd.f32 %v1694_v22, %v1681_v19  ;;  %v1715_v33 = vpop.f32.mrb[2].mxu1 }
  0xeb   : > { %1454 = vst [vmem:[%s1688_s28 + $0x8] sm:$0xff] %v1382_v21   ;;  %v1422_v36 = vpack.c.bf16 %v1715_v33, %v1706_v28  ;;  %v1723_v37 = vpop.f32.mrb[3].mxu1 }
  0xec   : > { %1378 = vst [vmem:[%s1688_s28] sm:$0xff] %v1377_v23   ;;  %v956_v25 = vadd.f32 %v1679_v18, %v955_v24  ;;  %v1417_v40 = vpack.c.bf16 %v1723_v37, %v1710_v30 }
  0xed   : > { %1462 = vst [vmem:[%s1688_s28 + $0x48] sm:$0xff] %v1422_v36  }
  0xee   : > { %v1703_v26 = vpop.f32.mrb[4].mxu0  ;;  %v957_v27 = vadd.f32 %v1690_v20, %v956_v25  ;;  %1461 = vst [vmem:[%s1688_s28 + $0x40] sm:$0xff] %v1417_v40  }
  0xef   : > { %v1708_v29 = vpop.f32.mrb[5].mxu0 }
  0xf0   : > { %v958_v31 = vadd.f32 %v957_v27, %v1708_v29  ;;  %v1713_v32 = vpop.f32.mrb[6].mxu0  ;;  %v1738_v44 = vpop.f32.mrb[4].mxu1 }
  0xf1   : > { %v1392_v34 = vpack.c.bf16 %v1713_v32, %v1703_v26  ;;  %v1719_v35 = vpop.f32.mrb[7].mxu0  ;;  %v1742_v46 = vpop.f32.mrb[5].mxu1 }
  0xf2   : > { %v1387_v38 = vpack.c.bf16 %v1719_v35, %v1708_v29  ;;  %v959_v39 = vadd.f32 %v958_v31, %v1719_v35  ;;  %v1747_v49 = vpop.f32.mrb[6].mxu1 }
  0xf3   : > { %1456 = vst [vmem:[%s1688_s28 + $0x18] sm:$0xff] %v1392_v34   ;;  %v1432_v52 = vpack.c.bf16 %v1747_v49, %v1738_v44  ;;  %v1755_v53 = vpop.f32.mrb[7].mxu1 }
  0xf4   : > { %1455 = vst [vmem:[%s1688_s28 + $0x10] sm:$0xff] %v1387_v38   ;;  %v960_v41 = vadd.f32 %v1703_v26, %v959_v39  ;;  %v1427_v56 = vpack.c.bf16 %v1755_v53, %v1742_v46 }
  0xf5   : > { %1464 = vst [vmem:[%s1688_s28 + $0x58] sm:$0xff] %v1432_v52  }
  0xf6   : > { %v1735_v42 = vpop.f32.mrb[8].mxu0  ;;  %v961_v43 = vadd.f32 %v1713_v32, %v960_v41  ;;  %1463 = vst [vmem:[%s1688_s28 + $0x50] sm:$0xff] %v1427_v56  }
  0xf7   : > { %v1740_v45 = vpop.f32.mrb[9].mxu0 }
  0xf8   : > { %v962_v47 = vadd.f32 %v961_v43, %v1740_v45  ;;  %v1745_v48 = vpop.f32.mrb[10].mxu0  ;;  %v1770_v60 = vpop.f32.mrb[8].mxu1 }
  0xf9   : > { %v1402_v50 = vpack.c.bf16 %v1745_v48, %v1735_v42  ;;  %v1751_v51 = vpop.f32.mrb[11].mxu0  ;;  %v1774_v62 = vpop.f32.mrb[9].mxu1 }
  0xfa   : > { %v1397_v54 = vpack.c.bf16 %v1751_v51, %v1740_v45  ;;  %v963_v55 = vadd.f32 %v962_v47, %v1751_v51  ;;  %v1779_v1 = vpop.f32.mrb[10].mxu1 }
  0xfb   : > { %1458 = vst [vmem:[%s1688_s28 + $0x28] sm:$0xff] %v1402_v50   ;;  %v1442_v4 = vpack.c.bf16 %v1779_v1, %v1770_v60  ;;  %v1785_v5 = vpop.f32.mrb[11].mxu1 }
  0xfc   : > { %1457 = vst [vmem:[%s1688_s28 + $0x20] sm:$0xff] %v1397_v54   ;;  %v964_v57 = vadd.f32 %v1735_v42, %v963_v55  ;;  %v1437_v8 = vpack.c.bf16 %v1785_v5, %v1774_v62 }
  0xfd   : > { %1466 = vst [vmem:[%s1688_s28 + $0x68] sm:$0xff] %v1442_v4  }
  0xfe   : > { %v1767_v58 = vpop.f32.mrb[12].mxu0  ;;  %v965_v59 = vadd.f32 %v1745_v48, %v964_v57  ;;  %1465 = vst [vmem:[%s1688_s28 + $0x60] sm:$0xff] %v1437_v8  }
  0xff   : > { %v1772_v61 = vpop.f32.mrb[13].mxu0 }
 0x100   : > { %v966_v63 = vadd.f32 %v965_v59, %v1772_v61  ;;  %v1777_v0 = vpop.f32.mrb[14].mxu0  ;;  %v1796_v11 = vpop.f32.mrb[12].mxu1 }
 0x101   : > { %v1412_v2 = vpack.c.bf16 %v1777_v0, %v1767_v58  ;;  %v620_v3 = vpop.f32.mrb[15].mxu0  ;;  %v681_v12 = vpop.f32.mrb[13].mxu1 }
 0x102   : > { %v1407_v6 = vpack.c.bf16 %v620_v3, %v1772_v61  ;;  %v967_v7 = vadd.f32 %v966_v63, %v620_v3  ;;  %v1799_v14 = vpop.f32.mrb[14].mxu1 }
 0x103   : > { %1460 = vst [vmem:[%s1688_s28 + $0x38] sm:$0xff] %v1412_v2   ;;  %v1452_v15 = vpack.c.bf16 %v1799_v14, %v1796_v11  ;;  %v684_v16 = vpop.f32.mrb[15].mxu1 }
 0x104   : > { %1459 = vst [vmem:[%s1688_s28 + $0x30] sm:$0xff] %v1407_v6   ;;  %v968_v9 = vadd.f32 %v1767_v58, %v967_v7  ;;  %v1447_v21 = vpack.c.bf16 %v684_v16, %v681_v12 }
 0x105   : > { %1468 = vst [vmem:[%s1688_s28 + $0x78] sm:$0xff] %v1452_v15  }
 0x106   : > { %v969_v10 = vadd.f32 %v1777_v0, %v968_v9  ;;  %1467 = vst [vmem:[%s1688_s28 + $0x70] sm:$0xff] %v1447_v21  }
 0x108   : > { %v970_v13 = vadd.f32 %v969_v10, %v1710_v30 }
 0x10a   : > { %v971_v17 = vadd.f32 %v970_v13, %v1723_v37 }
 0x10c   : > { %v972_v23 = vadd.f32 %v1706_v28, %v971_v17 }
 0x10e   : > { %v973_v24 = vadd.f32 %v1715_v33, %v972_v23 }
 0x110   : > { %v974_v25 = vadd.f32 %v973_v24, %v1742_v46 }
 0x112   : > { %v975_v27 = vadd.f32 %v974_v25, %v1755_v53 }
 0x114   : > { %v976_v31 = vadd.f32 %v1738_v44, %v975_v27 }
 0x116   : > { %v977_v34 = vadd.f32 %v1747_v49, %v976_v31 }
 0x118   : > { %v978_v36 = vadd.f32 %v977_v34, %v1774_v62 }
 0x11a   : > { %v979_v38 = vadd.f32 %v978_v36, %v1785_v5 }
 0x11c   : > { %v980_v39 = vadd.f32 %v1770_v60, %v979_v38 }
 0x11e   : > { %v981_v40 = vadd.f32 %v1779_v1, %v980_v39 }
 0x120   : > { %v982_v41 = vadd.f32 %v981_v40, %v681_v12 }
 0x122   : > { %v983_v43 = vadd.f32 %v982_v41, %v684_v16 }
 0x124   : > { %v984_v47 = vadd.f32 %v1796_v11, %v983_v43 }
 0x126   : > { %v985_v50 = vadd.f32 %v1799_v14, %v984_v47 }
 0x128   : > { %v986_v52 = vrot.slane %v985_v50, 4 }
 0x12a   : > { %v987_v54 = vadd.f32 %v986_v52, %v985_v50 }
 0x12c   : > { %v988_v55 = vrot.slane %v987_v54, 2 }
 0x12e   : > { %v989_v56 = vadd.f32 %v988_v55, %v987_v54 }
 0x130   : > { %v990_v57 = vrot.slane %v989_v56, 1 }
 0x132   : > { %v991_v59 = vadd.f32 %v990_v57, %v989_v56 }
 0x134   : > { %v993_v63 = vmul.f32 0.00390625, %v991_v59  ;;  %1026 = vst [vmem:[%s293_s5] sm:$0x1] %v991_v59 }
 0x136   : > { %v994_v2 = vsub.f32 %v1681_v19, %v993_v63  ;;  %v995_v4 = vsub.f32 %v1694_v22, %v993_v63  ;;  %v996_v6 = vsub.f32 %v1679_v18, %v993_v63  ;;  %v997_v7 = vsub.f32 %v1690_v20, %v993_v63 }
 0x137   : > { %v998_v8 = vsub.f32 %v1708_v29, %v993_v63  ;;  %v999_v9 = vsub.f32 %v1719_v35, %v993_v63  ;;  %v1000_v10 = vsub.f32 %v1703_v26, %v993_v63  ;;  %v1001_v13 = vsub.f32 %v1713_v32, %v993_v63 }
 0x138   : > { %v1002_v15 = vsub.f32 %v1740_v45, %v993_v63  ;;  %v1003_v17 = vsub.f32 %v1751_v51, %v993_v63  ;;  %v1004_v19 = vsub.f32 %v1735_v42, %v993_v63  ;;  %v1005_v22 = vsub.f32 %v1745_v48, %v993_v63 }
 0x139   : > { %v1006_v18 = vsub.f32 %v1772_v61, %v993_v63  ;;  %v1007_v21 = vsub.f32 %v620_v3, %v993_v63  ;;  %v1008_v20 = vsub.f32 %v1767_v58, %v993_v63  ;;  %v1009_v29 = vsub.f32 %v1777_v0, %v993_v63 }
 0x13a   : > { %v1010_v35 = vsub.f32 %v1710_v30, %v993_v63  ;;  %v1011_v26 = vsub.f32 %v1723_v37, %v993_v63  ;;  %v1012_v32 = vsub.f32 %v1706_v28, %v993_v63  ;;  %v1013_v45 = vsub.f32 %v1715_v33, %v993_v63 }
 0x13b   : > { %v1014_v51 = vsub.f32 %v1742_v46, %v993_v63  ;;  %v1015_v42 = vsub.f32 %v1755_v53, %v993_v63  ;;  %v1016_v48 = vsub.f32 %v1738_v44, %v993_v63  ;;  %v1017_v61 = vsub.f32 %v1747_v49, %v993_v63 }
 0x13c   : > { %v1018_v58 = vsub.f32 %v1774_v62, %v993_v63  ;;  %v1019_v0 = vsub.f32 %v1785_v5, %v993_v63  ;;  %v1020_v30 = vsub.f32 %v1770_v60, %v993_v63  ;;  %v1021_v37 = vsub.f32 %v1779_v1, %v993_v63 }
 0x13d   : > { %v1022_v3 = vsub.f32 %v681_v12, %v993_v63  ;;  %v1023_v28 = vsub.f32 %v684_v16, %v993_v63  ;;  %v1024_v33 = vsub.f32 %v1796_v11, %v993_v63  ;;  %v1025_v46 = vsub.f32 %v1799_v14, %v993_v63 }
 0x13e   : > { %v1027_v23 = vmul.f32 %v994_v2, %v994_v2  ;;  %v1028_v53 = vmul.f32 %v995_v4, %v995_v4  ;;  %v1029_v24 = vmul.f32 %v996_v6, %v996_v6  ;;  %v1030_v25 = vmul.f32 %v997_v7, %v997_v7 }
 0x13f   : > { %v1031_v27 = vmul.f32 %v998_v8, %v998_v8  ;;  %v1032_v31 = vmul.f32 %v999_v9, %v999_v9  ;;  %v1033_v34 = vmul.f32 %v1000_v10, %v1000_v10  ;;  %v1034_v36 = vmul.f32 %v1001_v13, %v1001_v13 }
 0x140   : > { %v1059_v44 = vadd.f32 %v1028_v53, %v1027_v23  ;;  %v1035_v12 = vmul.f32 %v1002_v15, %v1002_v15  ;;  %v1036_v38 = vmul.f32 %v1003_v17, %v1003_v17  ;;  %v1037_v39 = vmul.f32 %v1004_v19, %v1004_v19 }
 0x141   : > { %v1038_v40 = vmul.f32 %v1005_v22, %v1005_v22  ;;  %v1039_v43 = vmul.f32 %v1006_v18, %v1006_v18  ;;  %v1040_v50 = vmul.f32 %v1007_v21, %v1007_v21  ;;  %v1041_v54 = vmul.f32 %v1008_v20, %v1008_v20 }
 0x142   : > { %v1060_v49 = vadd.f32 %v1059_v44, %v1029_v24  ;;  %v1042_v56 = vmul.f32 %v1009_v29, %v1009_v29  ;;  %v1043_v59 = vmul.f32 %v1010_v35, %v1010_v35  ;;  %v1044_v2 = vmul.f32 %v1011_v26, %v1011_v26 }
 0x143   : > { %v1045_v6 = vmul.f32 %v1012_v32, %v1012_v32  ;;  %v1046_v8 = vmul.f32 %v1013_v45, %v1013_v45  ;;  %v1047_v10 = vmul.f32 %v1014_v51, %v1014_v51  ;;  %v1048_v15 = vmul.f32 %v1015_v42, %v1015_v42 }
 0x144   : > { %v1061_v62 = vadd.f32 %v1060_v49, %v1030_v25  ;;  %v1049_v19 = vmul.f32 %v1016_v48, %v1016_v48  ;;  %v1050_v18 = vmul.f32 %v1017_v61, %v1017_v61  ;;  %v1051_v20 = vmul.f32 %v1018_v58, %v1018_v58 }
 0x145   : > { %v1052_v29 = vmul.f32 %v1019_v0, %v1019_v0  ;;  %v1053_v35 = vmul.f32 %v1020_v30, %v1020_v30  ;;  %v1054_v26 = vmul.f32 %v1021_v37, %v1021_v37  ;;  %v1055_v44 = vmul.f32 %v1022_v3, %v1022_v3 }
 0x146   : > { %v1062_v5 = vadd.f32 %v1061_v62, %v1031_v27  ;;  %v1056_v25 = vmul.f32 %v1023_v28, %v1023_v28  ;;  %v1057_v49 = vmul.f32 %v1024_v33, %v1024_v33  ;;  %v1058_v27 = vmul.f32 %v1025_v46, %v1025_v46 }
 0x148   : > { %v1063_v60 = vadd.f32 %v1062_v5, %v1032_v31 }
 0x14a   : > { %v1064_v1 = vadd.f32 %v1063_v60, %v1033_v34 }
 0x14c   : > { %v1065_v16 = vadd.f32 %v1064_v1, %v1034_v36 }
 0x14e   : > { %v1066_v11 = vadd.f32 %v1065_v16, %v1035_v12 }
 0x150   : > { %v1067_v14 = vadd.f32 %v1066_v11, %v1036_v38 }
 0x152   : > { %v1068_v41 = vadd.f32 %v1067_v14, %v1037_v39 }
 0x154   : > { %v1069_v47 = vadd.f32 %v1068_v41, %v1038_v40 }
 0x156   : > { %v1070_v52 = vadd.f32 %v1069_v47, %v1039_v43 }
 0x158   : > { %v1071_v55 = vadd.f32 %v1070_v52, %v1040_v50 }
 0x15a   : > { %v1072_v57 = vadd.f32 %v1071_v55, %v1041_v54 }
 0x15c   : > { %v1073_v63 = vadd.f32 %v1072_v57, %v1042_v56 }
 0x15e   : > { %v1074_v4 = vadd.f32 %v1073_v63, %v1043_v59 }
 0x160   : > { %v1075_v7 = vadd.f32 %v1074_v4, %v1044_v2 }
 0x162   : > { %v1076_v9 = vadd.f32 %v1075_v7, %v1045_v6 }
 0x164   : > { %v1077_v13 = vadd.f32 %v1076_v9, %v1046_v8 }
 0x166   : > { %v1078_v17 = vadd.f32 %v1077_v13, %v1047_v10 }
 0x168   : > { %v1079_v22 = vadd.f32 %v1078_v17, %v1048_v15 }
 0x16a   : > { %v1080_v21 = vadd.f32 %v1079_v22, %v1049_v19 }
 0x16c   : > { %v1081_v23 = vadd.f32 %v1080_v21, %v1050_v18 }
 0x16e   : > { %v1082_v53 = vadd.f32 %v1081_v23, %v1051_v20 }
 0x170   : > { %v1083_v24 = vadd.f32 %v1082_v53, %v1052_v29 }
 0x172   : > { %v1084_v32 = vadd.f32 %v1083_v24, %v1053_v35 }
 0x174   : > { %v1085_v45 = vadd.f32 %v1084_v32, %v1054_v26 }
 0x176   : > { %v1086_v51 = vadd.f32 %v1085_v45, %v1055_v44 }
 0x178   : > { %v1087_v42 = vadd.f32 %v1086_v51, %v1056_v25 }
 0x17a   : > { %v1088_v48 = vadd.f32 %v1087_v42, %v1057_v49 }
 0x17c   : > { %v1089_v62 = vadd.f32 %v1088_v48, %v1058_v27 }
 0x17e   : > { %v1090_v61 = vrot.slane %v1089_v62, 4 }
 0x180   : > { %v1091_v31 = vadd.f32 %v1090_v61, %v1089_v62 }
 0x182   : > { %v1092_v58 = vrot.slane %v1091_v31, 2 }
 0x184   : > { %v1093_v5 = vadd.f32 %v1092_v58, %v1091_v31 }
 0x186   : > { %v1094_v0 = vrot.slane %v1093_v5, 1 }
 0x188   : > { %v1095_v30 = vadd.f32 %v1094_v0, %v1093_v5 }
 0x18a   : > { %1096 = vst [vmem:[%s299_s8] sm:$0x1] %v1095_v30 }
 0x18b PF: > { %s15_s17 = sadd.s32 1, %s1586_s17   ;;  %s1873_s15 = smov %s1582_s16 }
 0x18c   : > { %p12_p6 = scmp.ge.s32.totalorder %s15_s17, 4   ;;  %s1874_s16 = smov %s1876_s18 }
 0x18e   :  { %14 = sbr.rel (!%p12_p6) target bundleno = 2 (0x2), region = 93 }

// kernel: basic_block_forward.9
= control target key start
LH: loop header
LB: loop body
LE: loop exit
PB: predicated region body
PF: predicated region fallthrough
CT: control target
= control target key end

     0   :  { %s1238_s21 = smov 0   ;;  %s1465_s0 = inlined_call_operand.vmem [shape: bf16[512,128], index: 0, kind: input, shape index: {}]   ;;  %s1466_s1 = inlined_call_operand.vmem [shape: bf16[512,128], index: 1, kind: input, shape index: {}]   ;;  %s1467_s2 = inlined_call_operand.vmem [shape: f32[1,128], index: 2, kind: input, shape index: {}]   ;;  %s1468_s3 = inlined_call_operand.vmem [shape: f32[1,128], index: 3, kind: input, shape index: {}]   ;;  %s1469_s4 = inlined_call_operand.vmem [shape: f32[1,128], index: 4, kind: input, shape index: {}]   ;;  %s1470_s5 = inlined_call_operand.vmem [shape: f32[1,128], index: 5, kind: input, shape index: {}]   ;;  %s1471_s6 = inlined_call_operand.vmem [shape: bf16[512,128], index: 6, kind: output, shape index: {}]  }
   0x1 LB: > { %s853_s22 = sadd.s32 4294967295, %s1201_s21   ;;  %p857_p0 = scmp.ge.s32.totalorder %s1201_s21, 1  ;;  %s1201_s21 = sphi %s1238_s21, %s16_s21  }
   0x2   : > { %p224_p1 = scmp.lt.s32.totalorder %s1201_s21, 3 }
   0x4   : > { %p225_p2 = pnand %p857_p0, %p224_p1 }
   0x5   : > { %s858_s23 = sshll.u32 (!%p225_p2), %s853_s22, 5  ;;  %v1263_v0 = vld [vmem:[%s1467_s2] ss:$0 sm:$0xff] (!%p225_p2) }
   0x6   : > { %228 = sbr.rel (%p225_p2) target bundleno = 93 (0x5d), region = 44  ;;  %p260_p3 = scmp.lt.s32.totalorder (!%p225_p2), %s858_s23, 63  ;;  %v1268_v1 = vld [vmem:[%s1469_s4] ss:$0 sm:$0xff] (!%p225_p2) }
   0x7   : > { %v1277_v10 = vld [vmem:[%s1468_s3] ss:$0 sm:$0xff] (!%p225_p2) }
   0x8   : > { %v1294_v29 = vld [vmem:[%s1470_s5] ss:$0 sm:$0xff] (!%p225_p2) }
   0xd   : > { %s1473_s23 = smov (!%p260_p3, %s858_s23), 63 }
   0xe   : > { %s1246_s24 = sshll.u32 %s1473_s23, 2 }
   0xf   : > { %s1252_s27 = scalar_lea.vmem %s1465_s0, %s1246_s24  ;;  %s1258_s30 = scalar_lea.vmem %s1466_s1, %s1246_s24 }
  0x10   : > { %v935_v2 = vld [vmem:[%s1252_s27] sm:$0xff]   ;;  %v1142_v4 = vld [vmem:[%s1252_s27 + $0x8] sm:$0xff]   ;;  %v1143_v15 = vld [vmem:[%s1252_s27 + $0x10] sm:$0xff]   ;;  %s1314_s17 = scalar_lea.vmem %s1471_s6, %s1246_s24 }
  0x11   : > { %v999_v3 = vld [vmem:[%s1258_s30] sm:$0xff]   ;;  %v936_v5 = vunpack.c.l.bf16 %v935_v2  ;;  %v937_v6 = vunpack.c.h.bf16 %v935_v2  ;;  %v1157_v9 = vld [vmem:[%s1258_s30 + $0x8] sm:$0xff]   ;;  %v940_v11 = vunpack.c.l.bf16 %v1142_v4  ;;  %v941_v12 = vunpack.c.h.bf16 %v1142_v4  ;;  %v1158_v20 = vld [vmem:[%s1258_s30 + $0x10] sm:$0xff]  }
  0x12   : > { %v1000_v7 = vunpack.c.l.bf16 %v999_v3  ;;  %v1001_v8 = vunpack.c.h.bf16 %v999_v3  ;;  %v1004_v13 = vunpack.c.l.bf16 %v1157_v9  ;;  %v1005_v14 = vunpack.c.h.bf16 %v1157_v9  ;;  %v1144_v38 = vld [vmem:[%s1252_s27 + $0x18] sm:$0xff]   ;;  %v1145_v60 = vld [vmem:[%s1252_s27 + $0x20] sm:$0xff]  }
  0x13   : > { %v348_v16 = vmul.f32 %v936_v5, %v1263_v0  ;;  %v349_v17 = vmul.f32 %v937_v6, %v1263_v0  ;;  %v350_v21 = vmul.f32 %v940_v11, %v1263_v0  ;;  %v351_v22 = vmul.f32 %v941_v12, %v1263_v0  ;;  %v1159_v51 = vld [vmem:[%s1258_s30 + $0x18] sm:$0xff]   ;;  %v1160_v3 = vld [vmem:[%s1258_s30 + $0x20] sm:$0xff]  }
  0x14   : > { %v490_v18 = vmul.f32 %v1000_v7, %v1268_v1  ;;  %v491_v19 = vmul.f32 %v1001_v8, %v1268_v1  ;;  %v492_v23 = vmul.f32 %v1004_v13, %v1268_v1  ;;  %v493_v24 = vmul.f32 %v1005_v14, %v1268_v1  ;;  %v1146_v8 = vld [vmem:[%s1252_s27 + $0x28] sm:$0xff]  }
  0x15   : > { %v387_v25 = vadd.f32 %v1277_v10, %v348_v16  ;;  %v388_v26 = vadd.f32 %v1277_v10, %v349_v17  ;;  %v944_v27 = vunpack.c.l.bf16 %v1143_v15  ;;  %v945_v28 = vunpack.c.h.bf16 %v1143_v15 }
  0x16   : > { %v389_v30 = vadd.f32 %v1277_v10, %v350_v21  ;;  %v390_v31 = vadd.f32 %v1277_v10, %v351_v22  ;;  %v1008_v32 = vunpack.c.l.bf16 %v1158_v20  ;;  %v1009_v33 = vunpack.c.h.bf16 %v1158_v20  ;;  %v1161_v22 = vld [vmem:[%s1258_s30 + $0x28] sm:$0xff]  }
  0x17   : > { %v522_v34 = vadd.f32 %v490_v18, %v387_v25  ;;  %v523_v35 = vadd.f32 %v491_v19, %v388_v26  ;;  %v352_v36 = vmul.f32 %v944_v27, %v1263_v0  ;;  %v353_v37 = vmul.f32 %v945_v28, %v1263_v0 }
  0x18   : > { %v524_v39 = vadd.f32 %v492_v23, %v389_v30  ;;  %v525_v40 = vadd.f32 %v493_v24, %v390_v31  ;;  %v494_v41 = vmul.f32 %v1008_v32, %v1268_v1  ;;  %v495_v42 = vmul.f32 %v1009_v33, %v1268_v1 }
  0x19   : > { %v561_v43 = vadd.f32 %v1294_v29, %v522_v34  ;;  %v562_v44 = vadd.f32 %v1294_v29, %v523_v35  ;;  %v391_v45 = vadd.f32 %v1277_v10, %v352_v36  ;;  %v392_v46 = vadd.f32 %v1277_v10, %v353_v37  ;;  %v1147_v36 = vld [vmem:[%s1252_s27 + $0x30] sm:$0xff]  }
  0x1a   : > { %v563_v47 = vadd.f32 %v1294_v29, %v524_v39  ;;  %v564_v48 = vadd.f32 %v1294_v29, %v525_v40  ;;  %v948_v49 = vunpack.c.l.bf16 %v1144_v38  ;;  %v949_v50 = vunpack.c.h.bf16 %v1144_v38 }
  0x1b   : > { %v593_v52 = vmax.f32 %v561_v43, 0.0  ;;  %v594_v53 = vmax.f32 %v562_v44, 0.0  ;;  %v526_v54 = vadd.f32 %v494_v41, %v391_v45  ;;  %v527_v55 = vadd.f32 %v495_v42, %v392_v46  ;;  %v1162_v41 = vld [vmem:[%s1258_s30 + $0x30] sm:$0xff]  }
  0x1c   : > { %v595_v56 = vmax.f32 %v563_v47, 0.0  ;;  %v596_v57 = vmax.f32 %v564_v48, 0.0  ;;  %v354_v58 = vmul.f32 %v948_v49, %v1263_v0  ;;  %v355_v59 = vmul.f32 %v949_v50, %v1263_v0 }
  0x1d   : > { %v1065_v61 = vpack.c.bf16 %v594_v53, %v593_v52  ;;  %v565_v62 = vadd.f32 %v1294_v29, %v526_v54  ;;  %v566_v63 = vadd.f32 %v1294_v29, %v527_v55  ;;  %v1012_v2 = vunpack.c.l.bf16 %v1159_v51  ;;  %v1148_v54 = vld [vmem:[%s1252_s27 + $0x38] sm:$0xff]  }
  0x1e   : > { %v1070_v4 = vpack.c.bf16 %v596_v57, %v595_v56  ;;  %v393_v5 = vadd.f32 %v1277_v10, %v354_v58  ;;  %v394_v6 = vadd.f32 %v1277_v10, %v355_v59  ;;  %v1013_v7 = vunpack.c.h.bf16 %v1159_v51 }
  0x1f   : > { %1066 = vst [vmem:[%s1314_s17] sm:$0xff] %v1065_v61   ;;  %v597_v9 = vmax.f32 %v565_v62, 0.0  ;;  %v598_v11 = vmax.f32 %v566_v63, 0.0  ;;  %v496_v12 = vmul.f32 %v1012_v2, %v1268_v1  ;;  %v952_v13 = vunpack.c.l.bf16 %v1145_v60  ;;  %v1163_v63 = vld [vmem:[%s1258_s30 + $0x38] sm:$0xff]  }
  0x20   : > { %1172 = vst [vmem:[%s1314_s17 + $0x8] sm:$0xff] %v1070_v4   ;;  %v497_v14 = vmul.f32 %v1013_v7, %v1268_v1  ;;  %v953_v15 = vunpack.c.h.bf16 %v1145_v60  ;;  %v1016_v16 = vunpack.c.l.bf16 %v1160_v3  ;;  %v1017_v17 = vunpack.c.h.bf16 %v1160_v3 }
  0x21   : > { %v1075_v18 = vpack.c.bf16 %v598_v11, %v597_v9  ;;  %v528_v19 = vadd.f32 %v496_v12, %v393_v5  ;;  %v356_v20 = vmul.f32 %v952_v13, %v1263_v0  ;;  %v956_v21 = vunpack.c.l.bf16 %v1146_v8 }
  0x22   : > { %v529_v23 = vadd.f32 %v497_v14, %v394_v6  ;;  %v357_v24 = vmul.f32 %v953_v15, %v1263_v0  ;;  %v498_v25 = vmul.f32 %v1016_v16, %v1268_v1  ;;  %v499_v26 = vmul.f32 %v1017_v17, %v1268_v1  ;;  %v1149_v6 = vld [vmem:[%s1252_s27 + $0x40] sm:$0xff]  }
  0x23   : > { %1173 = vst [vmem:[%s1314_s17 + $0x10] sm:$0xff] %v1075_v18   ;;  %v567_v27 = vadd.f32 %v1294_v29, %v528_v19  ;;  %v395_v28 = vadd.f32 %v1277_v10, %v356_v20  ;;  %v957_v30 = vunpack.c.h.bf16 %v1146_v8  ;;  %v358_v31 = vmul.f32 %v956_v21, %v1263_v0  ;;  %v1164_v20 = vld [vmem:[%s1258_s30 + $0x40] sm:$0xff]  }
  0x24   : > { %v568_v32 = vadd.f32 %v1294_v29, %v529_v23  ;;  %v396_v33 = vadd.f32 %v1277_v10, %v357_v24  ;;  %v1020_v34 = vunpack.c.l.bf16 %v1161_v22  ;;  %v1021_v35 = vunpack.c.h.bf16 %v1161_v22 }
  0x25   : > { %v599_v37 = vmax.f32 %v567_v27, 0.0  ;;  %v530_v38 = vadd.f32 %v498_v25, %v395_v28  ;;  %v359_v39 = vmul.f32 %v957_v30, %v1263_v0  ;;  %v397_v40 = vadd.f32 %v1277_v10, %v358_v31  ;;  %v1150_v30 = vld [vmem:[%s1252_s27 + $0x48] sm:$0xff]  }
  0x26   : > { %v600_v42 = vmax.f32 %v568_v32, 0.0  ;;  %v531_v43 = vadd.f32 %v499_v26, %v396_v33  ;;  %v500_v44 = vmul.f32 %v1020_v34, %v1268_v1  ;;  %v501_v45 = vmul.f32 %v1021_v35, %v1268_v1 }
  0x27   : > { %v569_v46 = vadd.f32 %v1294_v29, %v530_v38  ;;  %v398_v47 = vadd.f32 %v1277_v10, %v359_v39  ;;  %v960_v48 = vunpack.c.l.bf16 %v1147_v36  ;;  %v961_v49 = vunpack.c.h.bf16 %v1147_v36 }
  0x28   : > { %v1080_v50 = vpack.c.bf16 %v600_v42, %v599_v37  ;;  %v570_v51 = vadd.f32 %v1294_v29, %v531_v43  ;;  %v532_v52 = vadd.f32 %v500_v44, %v397_v40  ;;  %v1024_v53 = vunpack.c.l.bf16 %v1162_v41  ;;  %v1165_v43 = vld [vmem:[%s1258_s30 + $0x48] sm:$0xff]  }
  0x29   : > { %v601_v55 = vmax.f32 %v569_v46, 0.0  ;;  %v533_v56 = vadd.f32 %v501_v45, %v398_v47  ;;  %v360_v57 = vmul.f32 %v960_v48, %v1263_v0  ;;  %v361_v58 = vmul.f32 %v961_v49, %v1263_v0  ;;  %v1151_v48 = vld [vmem:[%s1252_s27 + $0x50] sm:$0xff]  }
  0x2a   : > { %1174 = vst [vmem:[%s1314_s17 + $0x18] sm:$0xff] %v1080_v50   ;;  %v602_v59 = vmax.f32 %v570_v51, 0.0  ;;  %v571_v60 = vadd.f32 %v1294_v29, %v532_v52  ;;  %v1025_v61 = vunpack.c.h.bf16 %v1162_v41  ;;  %v502_v62 = vmul.f32 %v1024_v53, %v1268_v1 }
  0x2b   : > { %v572_v2 = vadd.f32 %v1294_v29, %v533_v56  ;;  %v399_v3 = vadd.f32 %v1277_v10, %v360_v57  ;;  %v400_v4 = vadd.f32 %v1277_v10, %v361_v58  ;;  %v964_v5 = vunpack.c.l.bf16 %v1148_v54 }
  0x2c   : > { %v1085_v7 = vpack.c.bf16 %v602_v59, %v601_v55  ;;  %v603_v8 = vmax.f32 %v571_v60, 0.0  ;;  %v503_v9 = vmul.f32 %v1025_v61, %v1268_v1  ;;  %v965_v11 = vunpack.c.h.bf16 %v1148_v54  ;;  %v1166_v61 = vld [vmem:[%s1258_s30 + $0x50] sm:$0xff]  }
  0x2d   : > { %v604_v12 = vmax.f32 %v572_v2, 0.0  ;;  %v534_v13 = vadd.f32 %v502_v62, %v399_v3  ;;  %v362_v14 = vmul.f32 %v964_v5, %v1263_v0  ;;  %v1028_v15 = vunpack.c.l.bf16 %v1163_v63 }
  0x2e   : > { %1175 = vst [vmem:[%s1314_s17 + $0x20] sm:$0xff] %v1085_v7   ;;  %v535_v16 = vadd.f32 %v503_v9, %v400_v4  ;;  %v363_v17 = vmul.f32 %v965_v11, %v1263_v0  ;;  %v1029_v18 = vunpack.c.h.bf16 %v1163_v63  ;;  %v968_v19 = vunpack.c.l.bf16 %v1149_v6  ;;  %v1152_v4 = vld [vmem:[%s1252_s27 + $0x58] sm:$0xff]  }
  0x2f   : > { %v1090_v21 = vpack.c.bf16 %v604_v12, %v603_v8  ;;  %v573_v22 = vadd.f32 %v1294_v29, %v534_v13  ;;  %v401_v23 = vadd.f32 %v1277_v10, %v362_v14  ;;  %v504_v24 = vmul.f32 %v1028_v15, %v1268_v1 }
  0x30   : > { %v574_v25 = vadd.f32 %v1294_v29, %v535_v16  ;;  %v402_v26 = vadd.f32 %v1277_v10, %v363_v17  ;;  %v505_v27 = vmul.f32 %v1029_v18, %v1268_v1  ;;  %v969_v28 = vunpack.c.h.bf16 %v1149_v6  ;;  %v1167_v18 = vld [vmem:[%s1258_s30 + $0x58] sm:$0xff]  }
  0x31   : > { %1176 = vst [vmem:[%s1314_s17 + $0x28] sm:$0xff] %v1090_v21   ;;  %v605_v31 = vmax.f32 %v573_v22, 0.0  ;;  %v536_v32 = vadd.f32 %v504_v24, %v401_v23  ;;  %v364_v33 = vmul.f32 %v968_v19, %v1263_v0  ;;  %v1032_v34 = vunpack.c.l.bf16 %v1164_v20 }
  0x32   : > { %v606_v35 = vmax.f32 %v574_v25, 0.0  ;;  %v537_v36 = vadd.f32 %v505_v27, %v402_v26  ;;  %v365_v37 = vmul.f32 %v969_v28, %v1263_v0  ;;  %v1033_v38 = vunpack.c.h.bf16 %v1164_v20  ;;  %v1153_v27 = vld [vmem:[%s1252_s27 + $0x60] sm:$0xff]  }
  0x33   : > { %v575_v39 = vadd.f32 %v1294_v29, %v536_v32  ;;  %v403_v40 = vadd.f32 %v1277_v10, %v364_v33  ;;  %v506_v41 = vmul.f32 %v1032_v34, %v1268_v1  ;;  %v972_v42 = vunpack.c.l.bf16 %v1150_v30 }
  0x34   : > { %v1095_v44 = vpack.c.bf16 %v606_v35, %v605_v31  ;;  %v576_v45 = vadd.f32 %v1294_v29, %v537_v36  ;;  %v404_v46 = vadd.f32 %v1277_v10, %v365_v37  ;;  %v507_v47 = vmul.f32 %v1033_v38, %v1268_v1  ;;  %v1168_v37 = vld [vmem:[%s1258_s30 + $0x60] sm:$0xff]  }
  0x35   : > { %v607_v49 = vmax.f32 %v575_v39, 0.0  ;;  %v538_v50 = vadd.f32 %v506_v41, %v403_v40  ;;  %v973_v51 = vunpack.c.h.bf16 %v1150_v30  ;;  %v366_v52 = vmul.f32 %v972_v42, %v1263_v0 }
  0x36   : > { %1177 = vst [vmem:[%s1314_s17 + $0x30] sm:$0xff] %v1095_v44   ;;  %v608_v53 = vmax.f32 %v576_v45, 0.0  ;;  %v539_v54 = vadd.f32 %v507_v47, %v404_v46  ;;  %v1036_v55 = vunpack.c.l.bf16 %v1165_v43  ;;  %v1037_v56 = vunpack.c.h.bf16 %v1165_v43  ;;  %v1154_v46 = vld [vmem:[%s1252_s27 + $0x68] sm:$0xff]  }
  0x37   : > { %v577_v57 = vadd.f32 %v1294_v29, %v538_v50  ;;  %v367_v58 = vmul.f32 %v973_v51, %v1263_v0  ;;  %v405_v59 = vadd.f32 %v1277_v10, %v366_v52  ;;  %v976_v60 = vunpack.c.l.bf16 %v1151_v48 }
  0x38   : > { %v1100_v62 = vpack.c.bf16 %v608_v53, %v607_v49  ;;  %v578_v63 = vadd.f32 %v1294_v29, %v539_v54  ;;  %v508_v2 = vmul.f32 %v1036_v55, %v1268_v1  ;;  %v509_v3 = vmul.f32 %v1037_v56, %v1268_v1 }
  0x39   : > { %v609_v5 = vmax.f32 %v577_v57, 0.0  ;;  %v406_v6 = vadd.f32 %v1277_v10, %v367_v58  ;;  %v977_v7 = vunpack.c.h.bf16 %v1151_v48  ;;  %v368_v8 = vmul.f32 %v976_v60, %v1263_v0 }
  0x3a   : > { %1178 = vst [vmem:[%s1314_s17 + $0x38] sm:$0xff] %v1100_v62   ;;  %v610_v9 = vmax.f32 %v578_v63, 0.0  ;;  %v540_v11 = vadd.f32 %v508_v2, %v405_v59  ;;  %v1040_v12 = vunpack.c.l.bf16 %v1166_v61  ;;  %v1041_v13 = vunpack.c.h.bf16 %v1166_v61  ;;  %v1169_v59 = vld [vmem:[%s1258_s30 + $0x68] sm:$0xff]   ;;  %v1155_v2 = vld [vmem:[%s1252_s27 + $0x70] sm:$0xff]  }
  0x3b   : > { %v541_v14 = vadd.f32 %v509_v3, %v406_v6  ;;  %v369_v15 = vmul.f32 %v977_v7, %v1263_v0  ;;  %v407_v16 = vadd.f32 %v1277_v10, %v368_v8  ;;  %v980_v17 = vunpack.c.l.bf16 %v1152_v4 }
  0x3c   : > { %v1105_v19 = vpack.c.bf16 %v610_v9, %v609_v5  ;;  %v579_v20 = vadd.f32 %v1294_v29, %v540_v11  ;;  %v510_v21 = vmul.f32 %v1040_v12, %v1268_v1  ;;  %v511_v22 = vmul.f32 %v1041_v13, %v1268_v1 }
  0x3d   : > { %v580_v23 = vadd.f32 %v1294_v29, %v541_v14  ;;  %v408_v24 = vadd.f32 %v1277_v10, %v369_v15  ;;  %v981_v25 = vunpack.c.h.bf16 %v1152_v4  ;;  %v370_v26 = vmul.f32 %v980_v17, %v1263_v0 }
  0x3e   : > { %1179 = vst [vmem:[%s1314_s17 + $0x40] sm:$0xff] %v1105_v19   ;;  %v611_v28 = vmax.f32 %v579_v20, 0.0  ;;  %v542_v30 = vadd.f32 %v510_v21, %v407_v16  ;;  %v1044_v31 = vunpack.c.l.bf16 %v1167_v18  ;;  %v1045_v32 = vunpack.c.h.bf16 %v1167_v18  ;;  %v1170_v16 = vld [vmem:[%s1258_s30 + $0x70] sm:$0xff]   ;;  %v1156_v21 = vld [vmem:[%s1252_s27 + $0x78] sm:$0xff]  }
  0x3f   : > { %v612_v33 = vmax.f32 %v580_v23, 0.0  ;;  %v543_v34 = vadd.f32 %v511_v22, %v408_v24  ;;  %v371_v35 = vmul.f32 %v981_v25, %v1263_v0  ;;  %v409_v36 = vadd.f32 %v1277_v10, %v370_v26 }
  0x40   : > { %v581_v38 = vadd.f32 %v1294_v29, %v542_v30  ;;  %v512_v39 = vmul.f32 %v1044_v31, %v1268_v1  ;;  %v513_v40 = vmul.f32 %v1045_v32, %v1268_v1  ;;  %v984_v41 = vunpack.c.l.bf16 %v1153_v27 }
  0x41   : > { %v1110_v42 = vpack.c.bf16 %v612_v33, %v611_v28  ;;  %v582_v43 = vadd.f32 %v1294_v29, %v543_v34  ;;  %v410_v44 = vadd.f32 %v1277_v10, %v371_v35  ;;  %v985_v45 = vunpack.c.h.bf16 %v1153_v27  ;;  %v1171_v35 = vld [vmem:[%s1258_s30 + $0x78] sm:$0xff]  }
  0x42   : > { %v613_v47 = vmax.f32 %v581_v38, 0.0  ;;  %v544_v48 = vadd.f32 %v512_v39, %v409_v36  ;;  %v372_v49 = vmul.f32 %v984_v41, %v1263_v0  ;;  %v1048_v50 = vunpack.c.l.bf16 %v1168_v37 }
  0x43   : > { %1180 = vst [vmem:[%s1314_s17 + $0x48] sm:$0xff] %v1110_v42   ;;  %v614_v51 = vmax.f32 %v582_v43, 0.0  ;;  %v545_v52 = vadd.f32 %v513_v40, %v410_v44  ;;  %v373_v53 = vmul.f32 %v985_v45, %v1263_v0  ;;  %v1049_v54 = vunpack.c.h.bf16 %v1168_v37 }
  0x44   : > { %v583_v55 = vadd.f32 %v1294_v29, %v544_v48  ;;  %v411_v56 = vadd.f32 %v1277_v10, %v372_v49  ;;  %v514_v57 = vmul.f32 %v1048_v50, %v1268_v1  ;;  %v988_v58 = vunpack.c.l.bf16 %v1154_v46 }
  0x45   : > { %v1115_v60 = vpack.c.bf16 %v614_v51, %v613_v47  ;;  %v584_v61 = vadd.f32 %v1294_v29, %v545_v52  ;;  %v412_v62 = vadd.f32 %v1277_v10, %v373_v53  ;;  %v515_v63 = vmul.f32 %v1049_v54, %v1268_v1 }
  0x46   : > { %v615_v3 = vmax.f32 %v583_v55, 0.0  ;;  %v546_v4 = vadd.f32 %v514_v57, %v411_v56  ;;  %v989_v5 = vunpack.c.h.bf16 %v1154_v46  ;;  %v374_v6 = vmul.f32 %v988_v58, %v1263_v0 }
  0x47   : > { %1181 = vst [vmem:[%s1314_s17 + $0x50] sm:$0xff] %v1115_v60   ;;  %v616_v7 = vmax.f32 %v584_v61, 0.0  ;;  %v547_v8 = vadd.f32 %v515_v63, %v412_v62  ;;  %v1052_v9 = vunpack.c.l.bf16 %v1169_v59  ;;  %v1053_v11 = vunpack.c.h.bf16 %v1169_v59 }
  0x48   : > { %v585_v12 = vadd.f32 %v1294_v29, %v546_v4  ;;  %v375_v13 = vmul.f32 %v989_v5, %v1263_v0  ;;  %v413_v14 = vadd.f32 %v1277_v10, %v374_v6  ;;  %v992_v15 = vunpack.c.l.bf16 %v1155_v2 }
  0x49   : > { %v1120_v17 = vpack.c.bf16 %v616_v7, %v615_v3  ;;  %v586_v18 = vadd.f32 %v1294_v29, %v547_v8  ;;  %v516_v19 = vmul.f32 %v1052_v9, %v1268_v1  ;;  %v517_v20 = vmul.f32 %v1053_v11, %v1268_v1 }
  0x4a   : > { %v617_v22 = vmax.f32 %v585_v12, 0.0  ;;  %v414_v23 = vadd.f32 %v1277_v10, %v375_v13  ;;  %v993_v24 = vunpack.c.h.bf16 %v1155_v2  ;;  %v376_v25 = vmul.f32 %v992_v15, %v1263_v0 }
  0x4b   : > { %1182 = vst [vmem:[%s1314_s17 + $0x58] sm:$0xff] %v1120_v17   ;;  %v618_v26 = vmax.f32 %v586_v18, 0.0  ;;  %v548_v27 = vadd.f32 %v516_v19, %v413_v14  ;;  %v1056_v28 = vunpack.c.l.bf16 %v1170_v16  ;;  %v1057_v30 = vunpack.c.h.bf16 %v1170_v16 }
  0x4c   : > { %v549_v31 = vadd.f32 %v517_v20, %v414_v23  ;;  %v377_v32 = vmul.f32 %v993_v24, %v1263_v0  ;;  %v415_v33 = vadd.f32 %v1277_v10, %v376_v25  ;;  %v996_v34 = vunpack.c.l.bf16 %v1156_v21 }
  0x4d   : > { %v1125_v36 = vpack.c.bf16 %v618_v26, %v617_v22  ;;  %v587_v37 = vadd.f32 %v1294_v29, %v548_v27  ;;  %v518_v38 = vmul.f32 %v1056_v28, %v1268_v1  ;;  %v519_v39 = vmul.f32 %v1057_v30, %v1268_v1 }
  0x4e   : > { %v588_v40 = vadd.f32 %v1294_v29, %v549_v31  ;;  %v416_v41 = vadd.f32 %v1277_v10, %v377_v32  ;;  %v997_v42 = vunpack.c.h.bf16 %v1156_v21  ;;  %v378_v43 = vmul.f32 %v996_v34, %v1263_v0 }
  0x4f   : > { %1183 = vst [vmem:[%s1314_s17 + $0x60] sm:$0xff] %v1125_v36   ;;  %v619_v44 = vmax.f32 %v587_v37, 0.0  ;;  %v550_v45 = vadd.f32 %v518_v38, %v415_v33  ;;  %v1060_v46 = vunpack.c.l.bf16 %v1171_v35  ;;  %v1061_v47 = vunpack.c.h.bf16 %v1171_v35 }
  0x50   : > { %v620_v48 = vmax.f32 %v588_v40, 0.0  ;;  %v551_v49 = vadd.f32 %v519_v39, %v416_v41  ;;  %v379_v50 = vmul.f32 %v997_v42, %v1263_v0  ;;  %v417_v51 = vadd.f32 %v1277_v10, %v378_v43 }
  0x51   : > { %v589_v52 = vadd.f32 %v1294_v29, %v550_v45  ;;  %v520_v53 = vmul.f32 %v1060_v46, %v1268_v1  ;;  %v521_v54 = vmul.f32 %v1061_v47, %v1268_v1 }
  0x52   : > { %v1130_v55 = vpack.c.bf16 %v620_v48, %v619_v44  ;;  %v590_v56 = vadd.f32 %v1294_v29, %v551_v49  ;;  %v418_v57 = vadd.f32 %v1277_v10, %v379_v50 }
  0x53   : > { %v621_v58 = vmax.f32 %v589_v52, 0.0  ;;  %v552_v59 = vadd.f32 %v520_v53, %v417_v51 }
  0x54   : > { %1184 = vst [vmem:[%s1314_s17 + $0x68] sm:$0xff] %v1130_v55   ;;  %v622_v60 = vmax.f32 %v590_v56, 0.0  ;;  %v553_v0 = vadd.f32 %v521_v54, %v418_v57 }
  0x55   : > { %v591_v61 = vadd.f32 %v1294_v29, %v552_v59 }
  0x56   : > { %v1135_v62 = vpack.c.bf16 %v622_v60, %v621_v58  ;;  %v592_v63 = vadd.f32 %v1294_v29, %v553_v0 }
  0x57   : > { %v623_v2 = vmax.f32 %v591_v61, 0.0 }
  0x58   : > { %1185 = vst [vmem:[%s1314_s17 + $0x70] sm:$0xff] %v1135_v62   ;;  %v624_v3 = vmax.f32 %v592_v63, 0.0 }
  0x5a   : > { %v1140_v1 = vpack.c.bf16 %v624_v3, %v623_v2 }
  0x5c   : > { %1186 = vst [vmem:[%s1314_s17 + $0x78] sm:$0xff] %v1140_v1  }
  0x5d PF: > { %s16_s21 = sadd.s32 1, %s1201_s21  }
  0x5e   : > { %p13_p4 = scmp.ge.s32.totalorder %s16_s21, 4  }
  0x60   :  { %15 = sbr.rel (!%p13_p4) target bundleno = 1 (0x1), region = 77 }

// kernel: basic_block_forward.7
= control target key start
LH: loop header
LB: loop body
LE: loop exit
PB: predicated region body
PF: predicated region fallthrough
CT: control target
= control target key end

     0   :  { %s4509_s15 = smov 0   ;;  %s4511_s16 = smov 0   ;;  %s5443_s0 = inlined_call_operand.vmem [shape: bf16[512,1152], index: 0, kind: input, shape index: {}]   ;;  %s5444_s1 = inlined_call_operand.vmem [shape: bf16[1152,128], index: 1, kind: input, shape index: {}]   ;;  %s5445_s2 = inlined_call_operand.vmem [shape: bf16[512,128], index: 2, kind: output, shape index: {0}]   ;;  %s5446_s3 = inlined_call_operand.vmem [shape: f32[2,1,128], index: 3, kind: output, shape index: {1}]   ;;  %s5447_s4 = inlined_call_operand.vmem [shape: f32[2,1,128], index: 4, kind: output, shape index: {2}]  }
   0x1   :  { %s4513_s17 = smov 0  }
   0x2 LB: > { %s34_s18 = sadd.s32 1, %s4478_s16  ;;  %p3237_p0 = scmp.ge.s32.totalorder %s4482_s17, 1  ;;  %s4482_s17 = sphi %s4513_s17, %s15_s17   ;;  %s4478_s16 = sphi %s4511_s16, %s5449_s16   ;;  %s4474_s15 = sphi %s4509_s15, %s5448_s15  }
   0x3   : > { %p36_p1 = scmp.ge.s32.totalorder %s34_s18, 2  ;;  %p217_p2 = scmp.lt.s32.totalorder %s4482_s17, 3 }
   0x5   : > { %s5451_s18 = smov (%p36_p1, %s34_s18), 0  ;;  %p218_p3 = pnand %p3237_p0, %p217_p2 }
   0x6   : > { %v4180_v0 = vld [vmem:[%s5444_s1 + $0x40] sm:$0xff] (!%p218_p3)   ;;  %s3238_s21 = sshll.u32 (!%p218_p3), %s4474_s15, 5  ;;  %v4182_v2 = vld [vmem:[%s5444_s1 + $0x48] sm:$0xff] (!%p218_p3)   ;;  %v4184_v4 = vld [vmem:[%s5444_s1 + $0x50] sm:$0xff] (!%p218_p3)   ;;  %p301_p5 = scmp.lt.s32.totalorder (!%p218_p3), %s4474_s15, 1 }
   0x7   : > { %221 = sbr.rel (%p218_p3) target bundleno = 641 (0x281), region = 28  ;;  %v4181_v1 = vld [vmem:[%s5444_s1] sm:$0xff] (!%p218_p3)   ;;  %3619 = vmatprep.subr.bf16.mxu0 (!%p218_p3), %v4180_v0  ;;  %4139 = vmatprep.subr.bf16.mxu1 (!%p218_p3), %v4180_v0  ;;  %p273_p4 = scmp.lt.s32.totalorder (!%p218_p3), %s3238_s21, 63  ;;  %v4183_v3 = vld [vmem:[%s5444_s1 + $0x8] sm:$0xff] (!%p218_p3)   ;;  %v4185_v5 = vld [vmem:[%s5444_s1 + $0x10] sm:$0xff] (!%p218_p3)  }
   0x8   : > { %3620 = vmatpush3.bf16.msra.mxu0 (!%p218_p3), %v4181_v1  ;;  %4147 = vmatpush3.bf16.msra.mxu1 (!%p218_p3), %v4181_v1  ;;  %v4186_v6 = vld [vmem:[%s5444_s1 + $0x58] sm:$0xff] (!%p218_p3)   ;;  %v4188_v8 = vld [vmem:[%s5444_s1 + $0x60] sm:$0xff] (!%p218_p3)   ;;  %v4190_v10 = vld [vmem:[%s5444_s1 + $0x68] sm:$0xff] (!%p218_p3)  }
   0x9   : > { %3621 = vmatprep.subr.bf16.mxu0 (!%p218_p3), %v4182_v2  ;;  %4140 = vmatprep.subr.bf16.mxu1 (!%p218_p3), %v4182_v2  ;;  %v4187_v7 = vld [vmem:[%s5444_s1 + $0x18] sm:$0xff] (!%p218_p3)   ;;  %v4189_v9 = vld [vmem:[%s5444_s1 + $0x20] sm:$0xff] (!%p218_p3)   ;;  %v4191_v13 = vld [vmem:[%s5444_s1 + $0x28] sm:$0xff] (!%p218_p3)  }
   0xa   : > { %v4192_v14 = vld [vmem:[%s5444_s1 + $0x70] sm:$0xff] (!%p218_p3)   ;;  %v4194_v16 = vld [vmem:[%s5444_s1 + $0x78] sm:$0xff] (!%p218_p3)   ;;  %v4202_v18 = vld [vmem:[%s5444_s1 + $0xc0] sm:$0xff] (!%p218_p3)  }
   0xb   : > { %v4193_v15 = vld [vmem:[%s5444_s1 + $0x30] sm:$0xff] (!%p218_p3)   ;;  %v4195_v17 = vld [vmem:[%s5444_s1 + $0x38] sm:$0xff] (!%p218_p3)   ;;  %v4203_v21 = vld [vmem:[%s5444_s1 + $0x140] sm:$0xff] (!%p218_p3)  }
   0xc   : > { %3622 = vmatpush3.bf16.msra.mxu0 (!%p218_p3), %v4183_v3  ;;  %4148 = vmatpush3.bf16.msra.mxu1 (!%p218_p3), %v4183_v3  ;;  %v4204_v22 = vld [vmem:[%s5444_s1 + $0x80] sm:$0xff] (!%p218_p3)   ;;  %v4206_v24 = vld [vmem:[%s5444_s1 + $0xc8] sm:$0xff] (!%p218_p3)   ;;  %v4214_v32 = vld [vmem:[%s5444_s1 + $0xd0] sm:$0xff] (!%p218_p3)  }
   0xd   : > { %3623 = vmatprep.subr.bf16.mxu0 (!%p218_p3), %v4184_v4  ;;  %4141 = vmatprep.subr.bf16.mxu1 (!%p218_p3), %v4184_v4  ;;  %v4205_v23 = vld [vmem:[%s5444_s1 + $0x100] sm:$0xff] (!%p218_p3)   ;;  %v4217_v27 = vld [vmem:[%s5444_s1 + $0x148] sm:$0xff] (!%p218_p3)   ;;  %v4215_v33 = vld [vmem:[%s5444_s1 + $0x90] sm:$0xff] (!%p218_p3)  }
   0xe   : > { %s5453_s21 = smov (!%p273_p4, %s3238_s21), 63  ;;  %v4207_v28 = vld [vmem:[%s5444_s1 + $0x88] sm:$0xff]   ;;  %v4216_v34 = vld [vmem:[%s5444_s1 + $0xd8] sm:$0xff]   ;;  %v4226_v38 = vld [vmem:[%s5444_s1 + $0xe0] sm:$0xff]   ;;  %s5455_s15 = smov (!%p301_p5, %s4474_s15), 1 }
   0xf   : > { %s4155_s8 = smul.u32 36, %s5453_s21  ;;  %v4219_v29 = vld [vmem:[%s5444_s1 + $0x108] sm:$0xff]   ;;  %v4218_v37 = vld [vmem:[%s5444_s1 + $0x98] sm:$0xff]   ;;  %v4237_v41 = vld [vmem:[%s5444_s1 + $0x150] sm:$0xff]   ;;  %s306_s5 = scalar_lea.vmem %s5446_s3, %s5455_s15 }
  0x10   : > { %3624 = vmatpush3.bf16.msra.mxu0 %v4185_v5  ;;  %4149 = vmatpush3.bf16.msra.mxu1 %v4185_v5  ;;  %v4227_v42 = vld [vmem:[%s5444_s1 + $0xa0] sm:$0xff]   ;;  %v4228_v43 = vld [vmem:[%s5444_s1 + $0xe8] sm:$0xff]   ;;  %v4239_v44 = vld [vmem:[%s5444_s1 + $0x110] sm:$0xff]  }
  0x11   : > { %3625 = vmatprep.subr.bf16.mxu0 %v4186_v6  ;;  %4142 = vmatprep.subr.bf16.mxu1 %v4186_v6  ;;  %s4563_s19 = scalar_lea.vmem %s5443_s0, %s4155_s8  ;;  %v4229_v47 = vld [vmem:[%s5444_s1 + $0xa8] sm:$0xff]   ;;  %v4236_v50 = vld [vmem:[%s5444_s1 + $0xf0] sm:$0xff]   ;;  %v4240_v53 = vld [vmem:[%s5444_s1 + $0xf8] sm:$0xff]   ;;  %s312_s8 = scalar_lea.vmem %s5447_s4, %s5455_s15 }
  0x12   : > { %v4198_v11 = vld [vmem:[%s4563_s19 + $0x4] ss:$36 sps:$4 sm:$0xff]   ;;  %v4208_v25 = vld [vmem:[%s4563_s19 + $0x4c] ss:$36 sps:$4 sm:$0xff]   ;;  %v4220_v35 = vld [vmem:[%s4563_s19 + $0x94] ss:$36 sps:$4 sm:$0xff]  }
  0x13   : > { %v4201_v12 = vld [vmem:[%s4563_s19 + $0x364] ss:$36 sps:$4 sm:$0xff]   ;;  %1886 = vmatprep.mubr.bf16.mxu0 %v4198_v11  ;;  %v4210_v26 = vld [vmem:[%s4563_s19 + $0x3ac] ss:$36 sps:$4 sm:$0xff]   ;;  %v4222_v36 = vld [vmem:[%s4563_s19 + $0x3f4] ss:$36 sps:$4 sm:$0xff]  }
  0x14   : > { %3626 = vmatpush3.bf16.msra.mxu0 %v4187_v7  ;;  %4150 = vmatpush3.bf16.msra.mxu1 %v4187_v7  ;;  %v4196_v19 = vld [vmem:[%s4563_s19] ss:$36 sps:$4 sm:$0xff]   ;;  %v4212_v30 = vld [vmem:[%s4563_s19 + $0x48] ss:$36 sps:$4 sm:$0xff]   ;;  %v4224_v39 = vld [vmem:[%s4563_s19 + $0x90] ss:$36 sps:$4 sm:$0xff]  }
  0x15   : > { %3627 = vmatprep.subr.bf16.mxu0 %v4188_v8  ;;  %4143 = vmatprep.subr.bf16.mxu1 %v4188_v8  ;;  %v4199_v20 = vld [vmem:[%s4563_s19 + $0x360] ss:$36 sps:$4 sm:$0xff]   ;;  %v4213_v31 = vld [vmem:[%s4563_s19 + $0x3a8] ss:$36 sps:$4 sm:$0xff]   ;;  %v4225_v40 = vld [vmem:[%s4563_s19 + $0x3f0] ss:$36 sps:$4 sm:$0xff]  }
  0x16   : > { %1982 = vmatprep.mubr.bf16.mxu1 %v4201_v12  ;;  %v4230_v45 = vld [vmem:[%s4563_s19 + $0xdc] ss:$36 sps:$4 sm:$0xff]   ;;  %v4238_v51 = vld [vmem:[%s5444_s1 + $0xb0] sm:$0xff]   ;;  %v4242_v52 = vld [vmem:[%s4563_s19 + $0x124] ss:$36 sps:$4 sm:$0xff]  }
  0x17   : > { %v4232_v46 = vld [vmem:[%s4563_s19 + $0x43c] ss:$36 sps:$4 sm:$0xff]   ;;  %v4246_v56 = vld [vmem:[%s4563_s19 + $0xc] ss:$36 sps:$4 sm:$0xff]   ;;  %v4254_v0 = vld [vmem:[%s4563_s19 + $0x54] ss:$36 sps:$4 sm:$0xff]  }
  0x18   : > { %3628 = vmatpush3.bf16.msra.mxu0 %v4189_v9  ;;  %4151 = vmatpush3.bf16.msra.mxu1 %v4189_v9  ;;  %v4234_v48 = vld [vmem:[%s4563_s19 + $0xd8] ss:$36 sps:$4 sm:$0xff]   ;;  %v4244_v58 = vld [vmem:[%s4563_s19 + $0x8] ss:$36 sps:$4 sm:$0xff]   ;;  %v4247_v59 = vld [vmem:[%s4563_s19 + $0x120] ss:$36 sps:$4 sm:$0xff]  }
  0x19   : > { %3629 = vmatprep.subr.bf16.mxu0 %v4190_v10  ;;  %4144 = vmatprep.subr.bf16.mxu1 %v4190_v10  ;;  %v4235_v49 = vld [vmem:[%s4563_s19 + $0x438] ss:$36 sps:$4 sm:$0xff]   ;;  %v4248_v60 = vld [vmem:[%s5444_s1 + $0x1c0] sm:$0xff]   ;;  %v4252_v62 = vld [vmem:[%s4563_s19 + $0x16c] ss:$36 sps:$4 sm:$0xff]  }
  0x1a   : > { %v4250_v54 = vld [vmem:[%s5444_s1 + $0x158] sm:$0xff]   ;;  %v4249_v61 = vld [vmem:[%s5444_s1 + $0x180] sm:$0xff]   ;;  %v4265_v2 = vld [vmem:[%s5444_s1 + $0x1c8] sm:$0xff]  }
  0x1b   : > { %v4251_v55 = vld [vmem:[%s5444_s1 + $0x118] sm:$0xff]   ;;  %v4264_v63 = vld [vmem:[%s5444_s1 + $0x160] sm:$0xff]   ;;  %v4267_v3 = vld [vmem:[%s5444_s1 + $0x188] sm:$0xff]  }
  0x1c   : > { %3630 = vmatpush3.bf16.msra.mxu0 %v4191_v13  ;;  %4152 = vmatpush3.bf16.msra.mxu1 %v4191_v13  ;;  %v4241_v57 = vld [vmem:[%s5444_s1 + $0xb8] sm:$0xff]   ;;  %v4266_v1 = vld [vmem:[%s5444_s1 + $0x120] sm:$0xff]   ;;  %v4256_v4 = vld [vmem:[%s4563_s19 + $0x168] ss:$36 sps:$4 sm:$0xff]  }
  0x1d   : > { %3631 = vmatprep.subr.bf16.mxu0 %v4192_v14  ;;  %4145 = vmatprep.subr.bf16.mxu1 %v4192_v14  ;;  %v4274_v5 = vld [vmem:[%s5444_s1 + $0x168] sm:$0xff]   ;;  %v4257_v7 = vld [vmem:[%s4563_s19 + $0x50] ss:$36 sps:$4 sm:$0xff]   ;;  %v4260_v9 = vld [vmem:[%s4563_s19 + $0x9c] ss:$36 sps:$4 sm:$0xff]  }
  0x1e   : > { %v4275_v6 = vld [vmem:[%s5444_s1 + $0x128] sm:$0xff]   ;;  %v4258_v8 = vld [vmem:[%s4563_s19 + $0x1b4] ss:$36 sps:$4 sm:$0xff]   ;;  %v4268_v14 = vld [vmem:[%s4563_s19 + $0x1fc] ss:$36 sps:$4 sm:$0xff]  }
  0x1f   : > { %v4282_v10 = vld [vmem:[%s5444_s1 + $0x1d0] sm:$0xff]   ;;  %v4263_v13 = vld [vmem:[%s4563_s19 + $0x98] ss:$36 sps:$4 sm:$0xff]  }
  0x20   : > { %3632 = vmatpush3.bf16.msra.mxu0 %v4193_v15  ;;  %4153 = vmatpush3.bf16.msra.mxu1 %v4193_v15  ;;  %v4283_v11 = vld [vmem:[%s5444_s1 + $0x190] sm:$0xff]  }
  0x21   : > { %3633 = vmatprep.subr.bf16.mxu0 %v4194_v16  ;;  %4146 = vmatprep.subr.bf16.mxu1 %v4194_v16  ;;  %v4262_v12 = vld [vmem:[%s4563_s19 + $0x1b0] ss:$36 sps:$4 sm:$0xff]  }
  0x22   : > { %v4290_v15 = vld [vmem:[%s5444_s1 + $0x170] sm:$0xff]  }
  0x23   : > { %v4291_v16 = vld [vmem:[%s5444_s1 + $0x130] sm:$0xff]  }
  0x24   : > { %3634 = vmatpush3.bf16.msra.mxu0 %v4195_v17  ;;  %4154 = vmatpush3.bf16.msra.mxu1 %v4195_v17  ;;  %v4270_v17 = vld [vmem:[%s4563_s19 + $0xe4] ss:$36 sps:$4 sm:$0xff]  }
  0x25   : > { %3731 = vmatprep.subr.bf16.mxu1 %v4202_v18  ;;  %3843 = vmatprep.subr.bf16.mxu0 %v4203_v21  ;;  %v4298_v18 = vld [vmem:[%s5444_s1 + $0x1d8] sm:$0xff]  }
  0x26   : > { %v4300_v21 = vld [vmem:[%s5444_s1 + $0x178] sm:$0xff]  }
  0x27   : > { %1887 = vmatmul.mubr.bf16.vlgmr.msra.gmra.mrb[0].mxu0 %v4196_v19  ;;  %1983 = vmatmul.mubr.bf16.vlgmr.msra.gmra.mrb[0].mxu1 %v4199_v20  ;;  %v4299_v19 = vld [vmem:[%s5444_s1 + $0x198] sm:$0xff]  }
  0x28   : > { %3732 = vmatpush3.bf16.msra.mxu1 %v4204_v22  ;;  %3844 = vmatpush3.bf16.msra.mxu0 %v4205_v23  ;;  %v4272_v20 = vld [vmem:[%s4563_s19 + $0x1f8] ss:$36 sps:$4 sm:$0xff]   ;;  %v4273_v23 = vld [vmem:[%s4563_s19 + $0xe0] ss:$36 sps:$4 sm:$0xff]  }
  0x29   : > { %3733 = vmatprep.subr.bf16.mxu1 %v4206_v24  ;;  %1894 = vmatprep.mubr.bf16.mxu0 %v4208_v25  ;;  %v4301_v22 = vld [vmem:[%s5444_s1 + $0x138] sm:$0xff]   ;;  %v4276_v24 = vld [vmem:[%s4563_s19 + $0x244] ss:$36 sps:$4 sm:$0xff]   ;;  %v4278_v25 = vld [vmem:[%s4563_s19 + $0x12c] ss:$36 sps:$4 sm:$0xff]  }
  0x2a   : > { %1990 = vmatprep.mubr.bf16.mxu1 %v4210_v26  ;;  %3845 = vmatprep.subr.bf16.mxu0 %v4217_v27  ;;  %v4314_v26 = vld [vmem:[%s5444_s1 + $0x1e0] sm:$0xff]  }
  0x2b   : > { %v4280_v27 = vld [vmem:[%s4563_s19 + $0x240] ss:$36 sps:$4 sm:$0xff]  }
  0x2c   : > { %3734 = vmatpush3.bf16.msra.mxu1 %v4207_v28  ;;  %3846 = vmatpush3.bf16.msra.mxu0 %v4219_v29  ;;  %v4315_v28 = vld [vmem:[%s5444_s1 + $0x200] sm:$0xff]  }
  0x2d   : > { %3735 = vmatprep.subr.bf16.mxu1 %v4214_v32  ;;  %3847 = vmatprep.subr.bf16.mxu0 %v4237_v41  ;;  %v4316_v29 = vld [vmem:[%s5444_s1 + $0x1a0] sm:$0xff]   ;;  %v4286_v32 = vld [vmem:[%s4563_s19 + $0x174] ss:$36 sps:$4 sm:$0xff]  }
  0x2e   : > { %v4344_v41 = vld [vmem:[%s5444_s1 + $0x1f0] sm:$0xff]  }
  0x2f   : > { %1895 = vmatmul.mubr.bf16.gmra.mrb[4].mxu0 %v4212_v30  ;;  %1991 = vmatmul.mubr.bf16.gmra.mrb[4].mxu1 %v4213_v31  ;;  %v4281_v30 = vld [vmem:[%s4563_s19 + $0x128] ss:$36 sps:$4 sm:$0xff]  }
  0x30   : > { %3736 = vmatpush3.bf16.msra.mxu1 %v4215_v33  ;;  %1902 = vmatprep.mubr.bf16.mxu0 %v4220_v35  ;;  %v4284_v31 = vld [vmem:[%s4563_s19 + $0x28c] ss:$36 sps:$4 sm:$0xff]  }
  0x31   : > { %3737 = vmatprep.subr.bf16.mxu1 %v4216_v34  ;;  %1998 = vmatprep.mubr.bf16.mxu1 %v4222_v36  ;;  %v4329_v33 = vld [vmem:[%s5444_s1 + $0x1e8] sm:$0xff]   ;;  %v4289_v35 = vld [vmem:[%s4563_s19 + $0x170] ss:$36 sps:$4 sm:$0xff]  }
  0x32   : > { %3848 = vmatpush3.bf16.msra.mxu0 %v4239_v44  ;;  %v4288_v34 = vld [vmem:[%s4563_s19 + $0x288] ss:$36 sps:$4 sm:$0xff]  }
  0x33   : > { %3849 = vmatprep.subr.bf16.mxu0 %v4250_v54  ;;  %v4331_v36 = vld [vmem:[%s5444_s1 + $0x1a8] sm:$0xff]   ;;  %v4319_v54 = vld [vmem:[%s4563_s19 + $0x5c] ss:$36 sps:$4 sm:$0xff]  }
  0x34   : > { %3738 = vmatpush3.bf16.msra.mxu1 %v4218_v37  ;;  %v4292_v37 = vld [vmem:[%s4563_s19 + $0x2d4] ss:$36 sps:$4 sm:$0xff]   ;;  %v4304_v44 = vld [vmem:[%s4563_s19 + $0x204] ss:$36 sps:$4 sm:$0xff]  }
  0x35   : > { %3739 = vmatprep.subr.bf16.mxu1 %v4226_v38  ;;  %v4294_v38 = vld [vmem:[%s4563_s19 + $0x1bc] ss:$36 sps:$4 sm:$0xff]  }
  0x36   : > { %3850 = vmatpush3.bf16.msra.mxu0 %v4251_v55  ;;  %v4330_v55 = vld [vmem:[%s5444_s1 + $0x208] sm:$0xff]  }
  0x37   : > { %1903 = vmatmul.mubr.bf16.gmra.mrb[8].mxu0 %v4224_v39  ;;  %1999 = vmatmul.mubr.bf16.gmra.mrb[8].mxu1 %v4225_v40  ;;  %v4296_v39 = vld [vmem:[%s4563_s19 + $0x2d0] ss:$36 sps:$4 sm:$0xff]   ;;  %v4297_v40 = vld [vmem:[%s4563_s19 + $0x1b8] ss:$36 sps:$4 sm:$0xff]  }
  0x38   : > { %3740 = vmatpush3.bf16.msra.mxu1 %v4227_v42  ;;  %1910 = vmatprep.mubr.bf16.mxu0 %v4230_v45  ;;  %v4302_v42 = vld [vmem:[%s4563_s19 + $0x31c] ss:$36 sps:$4 sm:$0xff]  }
  0x39   : > { %3741 = vmatprep.subr.bf16.mxu1 %v4228_v43  ;;  %2006 = vmatprep.mubr.bf16.mxu1 %v4232_v46  ;;  %v4346_v43 = vld [vmem:[%s5444_s1 + $0x1b0] sm:$0xff]   ;;  %v4306_v45 = vld [vmem:[%s4563_s19 + $0x318] ss:$36 sps:$4 sm:$0xff]   ;;  %v4307_v46 = vld [vmem:[%s4563_s19 + $0x200] ss:$36 sps:$4 sm:$0xff]  }
  0x3a   : > { %3851 = vmatprep.subr.bf16.mxu0 %v4264_v63  ;;  %v4327_v63 = vld [vmem:[%s4563_s19 + $0x2d8] ss:$36 sps:$4 sm:$0xff]  }
  0x3b   : > { %3852 = vmatpush3.bf16.msra.mxu0 %v4266_v1  ;;  %v4332_v1 = vld [vmem:[%s4563_s19 + $0x324] ss:$36 sps:$4 sm:$0xff]  }
  0x3c   : > { %3742 = vmatpush3.bf16.msra.mxu1 %v4229_v47  ;;  %3853 = vmatprep.subr.bf16.mxu0 %v4274_v5  ;;  %v4359_v47 = vld [vmem:[%s5444_s1 + $0x1f8] sm:$0xff]   ;;  %v4337_v5 = vld [vmem:[%s4563_s19 + $0xe8] ss:$36 sps:$4 sm:$0xff]  }
  0x3d   : > { %3743 = vmatprep.subr.bf16.mxu1 %v4236_v50  ;;  %v4312_v50 = vld [vmem:[%s4563_s19 + $0x14] ss:$36 sps:$4 sm:$0xff]  }
  0x3f   : > { %1911 = vmatmul.mubr.bf16.gmra.mrb[12].mxu0 %v4234_v48  ;;  %2007 = vmatmul.mubr.bf16.gmra.mrb[12].mxu1 %v4235_v49  ;;  %v4308_v48 = vld [vmem:[%s4563_s19 + $0x24c] ss:$36 sps:$4 sm:$0xff]   ;;  %v4361_v49 = vld [vmem:[%s5444_s1 + $0x1b8] sm:$0xff]  }
  0x40   : > { %3744 = vmatpush3.bf16.msra.mxu1 %v4238_v51  ;;  %1918 = vmatprep.mubr.bf16.mxu0 %v4242_v52  ;;  %v4310_v51 = vld [vmem:[%s4563_s19 + $0x10] ss:$36 sps:$4 sm:$0xff]   ;;  %v4313_v52 = vld [vmem:[%s4563_s19 + $0x248] ss:$36 sps:$4 sm:$0xff]  }
  0x41   : > { %3745 = vmatprep.subr.bf16.mxu1 %v4240_v53  ;;  %2047 = vmatprep.mubr.bf16.mxu1 %v4246_v56  ;;  %v4317_v53 = vld [vmem:[%s4563_s19 + $0x294] ss:$36 sps:$4 sm:$0xff]  }
  0x42   : > { %3854 = vmatpush3.bf16.msra.mxu0 %v4275_v6  ;;  %v4345_v56 = vld [vmem:[%s5444_s1 + $0x210] sm:$0xff]  }
  0x43   : > { %3855 = vmatprep.subr.bf16.mxu0 %v4290_v15  ;;  %v4400_v6 = vld [vmem:[%s5444_s1 + $0x230] sm:$0xff]   ;;  %v4352_v15 = vld [vmem:[%s4563_s19 + $0x178] ss:$36 sps:$4 sm:$0xff]  }
  0x44   : > { %3746 = vmatpush3.bf16.msra.mxu1 %v4241_v57  ;;  %v4321_v57 = vld [vmem:[%s4563_s19 + $0x290] ss:$36 sps:$4 sm:$0xff]  }
  0x45   : > { %3955 = vmatprep.subr.bf16.mxu1 %v4248_v60  ;;  %v4325_v60 = vld [vmem:[%s4563_s19 + $0xa4] ss:$36 sps:$4 sm:$0xff]  }
  0x46   : > { %3856 = vmatpush3.bf16.msra.mxu0 %v4291_v16  ;;  %v4353_v16 = vld [vmem:[%s4563_s19 + $0x3fc] ss:$36 sps:$4 sm:$0xff]  }
  0x47   : > { %1919 = vmatmul.mubr.bf16.gmra.mrb[16].mxu0 %v4247_v59  ;;  %2048 = vmatmul.mubr.bf16.vlgmr.msra.gmra.mrb[16].mxu1 %v4244_v58  ;;  %v4322_v58 = vld [vmem:[%s4563_s19 + $0x58] ss:$36 sps:$4 sm:$0xff]  }
  0x48   : > { %3956 = vmatpush3.bf16.msra.mxu1 %v4249_v61  ;;  %1926 = vmatprep.mubr.bf16.mxu0 %v4252_v62  ;;  %v4323_v59 = vld [vmem:[%s4563_s19 + $0x2dc] ss:$36 sps:$4 sm:$0xff]  }
  0x49   : > { %2055 = vmatprep.mubr.bf16.mxu1 %v4254_v0  ;;  %3957 = vmatprep.subr.bf16.mxu1 %v4265_v2  ;;  %v4360_v61 = vld [vmem:[%s5444_s1 + $0x218] sm:$0xff]   ;;  %v4374_v62 = vld [vmem:[%s5444_s1 + $0x220] sm:$0xff]   ;;  %v4334_v2 = vld [vmem:[%s4563_s19 + $0xec] ss:$36 sps:$4 sm:$0xff]  }
  0x4a   : > { %3857 = vmatprep.subr.bf16.mxu0 %v4300_v21  ;;  %v4328_v0 = vld [vmem:[%s4563_s19 + $0xa0] ss:$36 sps:$4 sm:$0xff]   ;;  %v4364_v21 = vld [vmem:[%s4563_s19 + $0x20c] ss:$36 sps:$4 sm:$0xff]  }
  0x4b   : > { %3858 = vmatpush3.bf16.msra.mxu0 %v4301_v22  ;;  %v4366_v22 = vld [vmem:[%s4563_s19 + $0x440] ss:$36 sps:$4 sm:$0xff]  }
  0x4c   : > { %3958 = vmatpush3.bf16.msra.mxu1 %v4267_v3  ;;  %4091 = vmatprep.subr.bf16.mxu0 %v4315_v28  ;;  %v4387_v3 = vld [vmem:[%s5444_s1 + $0x228] sm:$0xff]  }
  0x4d   : > { %3959 = vmatprep.subr.bf16.mxu1 %v4282_v10  ;;  %v4342_v10 = vld [vmem:[%s4563_s19 + $0x368] ss:$36 sps:$4 sm:$0xff]  }
  0x4f   : > { %1927 = vmatmul.mubr.bf16.gmra.mrb[20].mxu0 %v4256_v4  ;;  %2056 = vmatmul.mubr.bf16.gmra.mrb[20].mxu1 %v4257_v7  ;;  %v4336_v4 = vld [vmem:[%s4563_s19 + $0x320] ss:$36 sps:$4 sm:$0xff]   ;;  %v4338_v7 = vld [vmem:[%s4563_s19 + $0x36c] ss:$36 sps:$4 sm:$0xff]  }
  0x50   : > { %1934 = vmatprep.mubr.bf16.mxu0 %v4258_v8  ;;  %2063 = vmatprep.mubr.bf16.mxu1 %v4260_v9  ;;  %v4340_v8 = vld [vmem:[%s4563_s19 + $0x134] ss:$36 sps:$4 sm:$0xff]  }
  0x51   : > { %3960 = vmatpush3.bf16.msra.mxu1 %v4283_v11  ;;  %v4413_v9 = vld [vmem:[%s5444_s1 + $0x238] sm:$0xff]   ;;  %v4343_v11 = vld [vmem:[%s4563_s19 + $0x130] ss:$36 sps:$4 sm:$0xff]  }
  0x52   : > { %3961 = vmatprep.subr.bf16.mxu1 %v4298_v18  ;;  %v4357_v18 = vld [vmem:[%s4563_s19 + $0x3f8] ss:$36 sps:$4 sm:$0xff]  }
  0x55   : > { %3962 = vmatpush3.bf16.msra.mxu1 %v4299_v19  ;;  %v4358_v19 = vld [vmem:[%s4563_s19 + $0x1c0] ss:$36 sps:$4 sm:$0xff]  }
  0x56   : > { %3963 = vmatprep.subr.bf16.mxu1 %v4314_v26  ;;  %v4370_v26 = vld [vmem:[%s4563_s19 + $0x18] ss:$36 sps:$4 sm:$0xff]  }
  0x57   : > { %1935 = vmatmul.mubr.bf16.gmra.mrb[24].mxu0 %v4262_v12  ;;  %2064 = vmatmul.mubr.bf16.gmra.mrb[24].mxu1 %v4263_v13  ;;  %v4347_v12 = vld [vmem:[%s4563_s19 + $0x3b4] ss:$36 sps:$4 sm:$0xff]   ;;  %v4349_v13 = vld [vmem:[%s4563_s19 + $0x17c] ss:$36 sps:$4 sm:$0xff]  }
  0x58   : > { %1942 = vmatprep.mubr.bf16.mxu0 %v4268_v14  ;;  %2071 = vmatprep.mubr.bf16.mxu1 %v4270_v17  ;;  %v4351_v14 = vld [vmem:[%s4563_s19 + $0x3b0] ss:$36 sps:$4 sm:$0xff]   ;;  %v4355_v17 = vld [vmem:[%s4563_s19 + $0x1c4] ss:$36 sps:$4 sm:$0xff]  }
  0x59   : > { %3964 = vmatpush3.bf16.msra.mxu1 %v4316_v29  ;;  %v4377_v29 = vld [vmem:[%s4563_s19 + $0x64] ss:$36 sps:$4 sm:$0xff]  }
  0x5a   : > { %3965 = vmatprep.subr.bf16.mxu1 %v4329_v33  ;;  %v4383_v33 = vld [vmem:[%s4563_s19 + $0xac] ss:$36 sps:$4 sm:$0xff]  }
  0x5d   : > { %3966 = vmatpush3.bf16.msra.mxu1 %v4331_v36  ;;  %v4388_v36 = vld [vmem:[%s4563_s19 + $0x32c] ss:$36 sps:$4 sm:$0xff]  }
  0x5e   : > { %3967 = vmatprep.subr.bf16.mxu1 %v4344_v41  ;;  %v4396_v41 = vld [vmem:[%s4563_s19 + $0x13c] ss:$36 sps:$4 sm:$0xff]  }
  0x5f   : > { %1943 = vmatmul.mubr.bf16.gmra.mrb[28].mxu0 %v4272_v20  ;;  %2072 = vmatmul.mubr.bf16.gmra.mrb[28].mxu1 %v4273_v23  ;;  %v4362_v20 = vld [vmem:[%s4563_s19 + $0x444] ss:$36 sps:$4 sm:$0xff]  }
  0x60   : > { %1950 = vmatprep.mubr.bf16.mxu0 %v4276_v24  ;;  %2079 = vmatprep.mubr.bf16.mxu1 %v4278_v25  ;;  %v4367_v23 = vld [vmem:[%s4563_s19 + $0x208] ss:$36 sps:$4 sm:$0xff]   ;;  %v4368_v24 = vld [vmem:[%s4563_s19 + $0x254] ss:$36 sps:$4 sm:$0xff]   ;;  %v4372_v25 = vld [vmem:[%s4563_s19 + $0x1c] ss:$36 sps:$4 sm:$0xff]  }
  0x61   : > { %3968 = vmatpush3.bf16.msra.mxu1 %v4346_v43  ;;  %v4399_v43 = vld [vmem:[%s4563_s19 + $0x138] ss:$36 sps:$4 sm:$0xff]  }
  0x62   : > { %3969 = vmatprep.subr.bf16.mxu1 %v4359_v47  ;;  %v4406_v47 = vld [vmem:[%s4563_s19 + $0x180] ss:$36 sps:$4 sm:$0xff]  }
  0x65   : > { %3970 = vmatpush3.bf16.msra.mxu1 %v4361_v49  ;;  %v4409_v49 = vld [vmem:[%s4563_s19 + $0x1cc] ss:$36 sps:$4 sm:$0xff]  }
  0x67   : > { %1951 = vmatmul.mubr.bf16.gmra.mrb[32].mxu0 %v4280_v27  ;;  %2080 = vmatmul.mubr.bf16.gmra.mrb[32].mxu1 %v4281_v30  ;;  %v4373_v27 = vld [vmem:[%s4563_s19 + $0x250] ss:$36 sps:$4 sm:$0xff]   ;;  %v4379_v30 = vld [vmem:[%s4563_s19 + $0x298] ss:$36 sps:$4 sm:$0xff]  }
  0x68   : > { %1958 = vmatprep.mubr.bf16.mxu0 %v4284_v31  ;;  %2087 = vmatprep.mubr.bf16.mxu1 %v4286_v32  ;;  %v4380_v31 = vld [vmem:[%s4563_s19 + $0x60] ss:$36 sps:$4 sm:$0xff]  }
  0x69   : > { %v4381_v32 = vld [vmem:[%s4563_s19 + $0x2e4] ss:$36 sps:$4 sm:$0xff]  }
  0x6f   : > { %1959 = vmatmul.mubr.bf16.gmra.mrb[36].mxu0 %v4288_v34  ;;  %2088 = vmatmul.mubr.bf16.gmra.mrb[36].mxu1 %v4289_v35  ;;  %v4385_v34 = vld [vmem:[%s4563_s19 + $0x2e0] ss:$36 sps:$4 sm:$0xff]   ;;  %v4386_v35 = vld [vmem:[%s4563_s19 + $0xa8] ss:$36 sps:$4 sm:$0xff]  }
  0x70   : > { %1966 = vmatprep.mubr.bf16.mxu0 %v4292_v37  ;;  %2095 = vmatprep.mubr.bf16.mxu1 %v4294_v38  ;;  %v4390_v37 = vld [vmem:[%s4563_s19 + $0xf4] ss:$36 sps:$4 sm:$0xff]   ;;  %v4392_v38 = vld [vmem:[%s4563_s19 + $0x328] ss:$36 sps:$4 sm:$0xff]  }
  0x77   : > { %1967 = vmatmul.mubr.bf16.gmra.mrb[40].mxu0 %v4296_v39  ;;  %2096 = vmatmul.mubr.bf16.gmra.mrb[40].mxu1 %v4297_v40  ;;  %v4393_v39 = vld [vmem:[%s4563_s19 + $0xf0] ss:$36 sps:$4 sm:$0xff]  }
  0x78   : > { %1974 = vmatprep.mubr.bf16.mxu0 %v4302_v42  ;;  %2103 = vmatprep.mubr.bf16.mxu1 %v4304_v44  ;;  %v4394_v40 = vld [vmem:[%s4563_s19 + $0x374] ss:$36 sps:$4 sm:$0xff]   ;;  %v4401_v44 = vld [vmem:[%s4563_s19 + $0x3bc] ss:$36 sps:$4 sm:$0xff]  }
  0x79   : > { %v4398_v42 = vld [vmem:[%s4563_s19 + $0x370] ss:$36 sps:$4 sm:$0xff]  }
  0x7f   : > { %1975 = vmatmul.mubr.bf16.gmra.mrb[44].mxu0 %v4306_v45  ;;  %2104 = vmatmul.mubr.bf16.gmra.mrb[44].mxu1 %v4307_v46  ;;  %v4403_v45 = vld [vmem:[%s4563_s19 + $0x184] ss:$36 sps:$4 sm:$0xff]   ;;  %v4405_v46 = vld [vmem:[%s4563_s19 + $0x3b8] ss:$36 sps:$4 sm:$0xff]  }
  0x80   : > { %2111 = vmatprep.mubr.bf16.mxu1 %v4308_v48  ;;  %2208 = vmatprep.mubr.bf16.mxu0 %v4312_v50  ;;  %v4407_v48 = vld [vmem:[%s4563_s19 + $0x404] ss:$36 sps:$4 sm:$0xff]  }
  0x81   : > { %v4411_v50 = vld [vmem:[%s4563_s19 + $0x400] ss:$36 sps:$4 sm:$0xff]  }
  0x87   : > { %2112 = vmatmul.mubr.bf16.gmra.mrb[48].mxu1 %v4313_v52  ;;  %2209 = vmatmul.mubr.bf16.vlgmr.msra.gmra.mrb[48].mxu0 %v4310_v51  ;;  %v4412_v51 = vld [vmem:[%s4563_s19 + $0x1c8] ss:$36 sps:$4 sm:$0xff]  }
  0x88   : > { %4092 = vmatpush3.bf16.msra.mxu0 %v4315_v28  ;;  %2119 = vmatprep.mubr.bf16.mxu1 %v4317_v53  ;;  %v4375_v28 = vld [vmem:[%s4563_s19 + $0x29c] ss:$36 sps:$4 sm:$0xff]   ;;  %v4414_v52 = vld [vmem:[%s4563_s19 + $0x44c] ss:$36 sps:$4 sm:$0xff]   ;;  %v4416_v53 = vld [vmem:[%s4563_s19 + $0x214] ss:$36 sps:$4 sm:$0xff]  }
  0x89   : > { %2216 = vmatprep.mubr.bf16.mxu0 %v4319_v54  ;;  %4093 = vmatprep.subr.bf16.mxu0 %v4330_v55 }
  0x8c   : > { %4094 = vmatpush3.bf16.msra.mxu0 %v4330_v55 }
  0x8d   : > { %4095 = vmatprep.subr.bf16.mxu0 %v4345_v56 }
  0x8f   : > { %2120 = vmatmul.mubr.bf16.gmra.mrb[52].mxu1 %v4321_v57  ;;  %2217 = vmatmul.mubr.bf16.gmra.mrb[52].mxu0 %v4322_v58  ;;  %v4418_v58 = vld [vmem:[%s4563_s19 + $0x448] ss:$36 sps:$4 sm:$0xff]  }
  0x90   : > { %2127 = vmatprep.mubr.bf16.mxu1 %v4323_v59  ;;  %2224 = vmatprep.mubr.bf16.mxu0 %v4325_v60  ;;  %v4419_v59 = vld [vmem:[%s4563_s19 + $0x210] ss:$36 sps:$4 sm:$0xff]  }
  0x91   : > { %4096 = vmatpush3.bf16.msra.mxu0 %v4345_v56 }
  0x92   : > { %4097 = vmatprep.subr.bf16.mxu0 %v4360_v61 }
  0x95   : > { %4098 = vmatpush3.bf16.msra.mxu0 %v4360_v61 }
  0x96   : > { %4099 = vmatprep.subr.bf16.mxu0 %v4374_v62 }
  0x97   : > { %2128 = vmatmul.mubr.bf16.gmra.mrb[56].mxu1 %v4327_v63  ;;  %2225 = vmatmul.mubr.bf16.gmra.mrb[56].mxu0 %v4328_v0  ;;  %v4420_v0 = vld [vmem:[%s4563_s19 + $0x25c] ss:$36 sps:$4 sm:$0xff]  }
  0x98   : > { %2135 = vmatprep.mubr.bf16.mxu1 %v4332_v1  ;;  %2232 = vmatprep.mubr.bf16.mxu0 %v4334_v2  ;;  %v4422_v1 = vld [vmem:[%s4563_s19 + $0x20] ss:$36 sps:$4 sm:$0xff]  }
  0x99   : > { %4100 = vmatpush3.bf16.msra.mxu0 %v4374_v62 }
  0x9a   : > { %4101 = vmatprep.subr.bf16.mxu0 %v4387_v3 }
  0x9d   : > { %4102 = vmatpush3.bf16.msra.mxu0 %v4387_v3 }
  0x9e   : > { %4103 = vmatprep.subr.bf16.mxu0 %v4400_v6 }
  0x9f   : > { %2136 = vmatmul.mubr.bf16.gmra.mrb[60].mxu1 %v4336_v4  ;;  %2233 = vmatmul.mubr.bf16.gmra.mrb[60].mxu0 %v4337_v5 }
  0xa0   : > { %2143 = vmatprep.mubr.bf16.mxu1 %v4338_v7  ;;  %2240 = vmatprep.mubr.bf16.mxu0 %v4340_v8 }
  0xa1   : > { %4104 = vmatpush3.bf16.msra.mxu0 %v4400_v6 }
  0xa2   : > { %4105 = vmatprep.subr.bf16.mxu0 %v4413_v9 }
  0xa5   : > { %4106 = vmatpush3.bf16.msra.mxu0 %v4413_v9 }
  0xa7   : > { %2144 = vmatmul.mubr.bf16.gmra.mrb[64].mxu1 %v4342_v10  ;;  %2241 = vmatmul.mubr.bf16.gmra.mrb[64].mxu0 %v4343_v11  ;;  %v4423_v10 = vld [vmem:[%s4563_s19 + $0x258] ss:$36 sps:$4 sm:$0xff]   ;;  %v4424_v11 = vld [vmem:[%s4563_s19 + $0x68] ss:$36 sps:$4 sm:$0xff]  }
  0xa8   : > { %2151 = vmatprep.mubr.bf16.mxu1 %v4347_v12  ;;  %2248 = vmatprep.mubr.bf16.mxu0 %v4349_v13 }
  0xaf   : > { %2152 = vmatmul.mubr.bf16.gmra.mrb[68].mxu1 %v4351_v14  ;;  %2249 = vmatmul.mubr.bf16.gmra.mrb[68].mxu0 %v4352_v15 }
  0xb0   : > { %2159 = vmatprep.mubr.bf16.mxu1 %v4353_v16  ;;  %2256 = vmatprep.mubr.bf16.mxu0 %v4355_v17  ;;  %v4425_v16 = vld [vmem:[%s4563_s19 + $0x2a4] ss:$36 sps:$4 sm:$0xff]   ;;  %v4427_v17 = vld [vmem:[%s4563_s19 + $0xb0] ss:$36 sps:$4 sm:$0xff]  }
  0xb7   : > { %2160 = vmatmul.mubr.bf16.gmra.mrb[72].mxu1 %v4357_v18  ;;  %2257 = vmatmul.mubr.bf16.gmra.mrb[72].mxu0 %v4358_v19 }
  0xb8   : > { %2167 = vmatprep.mubr.bf16.mxu1 %v4362_v20  ;;  %2264 = vmatprep.mubr.bf16.mxu0 %v4364_v21 }
  0xbf   : > { %2168 = vmatmul.mubr.bf16.gmra.mrb[76].mxu1 %v4366_v22  ;;  %2265 = vmatmul.mubr.bf16.gmra.mrb[76].mxu0 %v4367_v23 }
  0xc0   : > { %2272 = vmatprep.mubr.bf16.mxu0 %v4368_v24  ;;  %2369 = vmatprep.mubr.bf16.mxu1 %v4372_v25 }
  0xc7   : > { %2273 = vmatmul.mubr.bf16.gmra.mrb[80].mxu0 %v4373_v27  ;;  %2370 = vmatmul.mubr.bf16.vlgmr.msra.gmra.mrb[80].mxu1 %v4370_v26  ;;  %v4428_v26 = vld [vmem:[%s4563_s19 + $0x2a0] ss:$36 sps:$4 sm:$0xff]   ;;  %v4429_v27 = vld [vmem:[%s4563_s19 + $0xf8] ss:$36 sps:$4 sm:$0xff]  }
  0xc8   : > { %2280 = vmatprep.mubr.bf16.mxu0 %v4375_v28  ;;  %2377 = vmatprep.mubr.bf16.mxu1 %v4377_v29 }
  0xcf   : > { %2281 = vmatmul.mubr.bf16.gmra.mrb[84].mxu0 %v4379_v30  ;;  %2378 = vmatmul.mubr.bf16.gmra.mrb[84].mxu1 %v4380_v31 }
  0xd0   : > { %2288 = vmatprep.mubr.bf16.mxu0 %v4381_v32  ;;  %2385 = vmatprep.mubr.bf16.mxu1 %v4383_v33  ;;  %v4430_v32 = vld [vmem:[%s4563_s19 + $0x2ec] ss:$36 sps:$4 sm:$0xff]   ;;  %v4432_v33 = vld [vmem:[%s4563_s19 + $0x140] ss:$36 sps:$4 sm:$0xff]  }
  0xd7   : > { %2289 = vmatmul.mubr.bf16.gmra.mrb[88].mxu0 %v4385_v34  ;;  %2386 = vmatmul.mubr.bf16.gmra.mrb[88].mxu1 %v4386_v35 }
  0xd8   : > { %2296 = vmatprep.mubr.bf16.mxu0 %v4388_v36  ;;  %2393 = vmatprep.mubr.bf16.mxu1 %v4390_v37 }
  0xdf   : > { %2297 = vmatmul.mubr.bf16.gmra.mrb[92].mxu0 %v4392_v38  ;;  %2394 = vmatmul.mubr.bf16.gmra.mrb[92].mxu1 %v4393_v39 }
  0xe0   : > { %2304 = vmatprep.mubr.bf16.mxu0 %v4394_v40  ;;  %2401 = vmatprep.mubr.bf16.mxu1 %v4396_v41 }
  0xe7   : > { %2305 = vmatmul.mubr.bf16.gmra.mrb[96].mxu0 %v4398_v42  ;;  %2402 = vmatmul.mubr.bf16.gmra.mrb[96].mxu1 %v4399_v43  ;;  %v4433_v42 = vld [vmem:[%s4563_s19 + $0x2e8] ss:$36 sps:$4 sm:$0xff]  }
  0xe8   : > { %2312 = vmatprep.mubr.bf16.mxu0 %v4401_v44  ;;  %2409 = vmatprep.mubr.bf16.mxu1 %v4403_v45  ;;  %v4434_v43 = vld [vmem:[%s4563_s19 + $0x188] ss:$36 sps:$4 sm:$0xff]  }
  0xef   : > { %2313 = vmatmul.mubr.bf16.gmra.mrb[100].mxu0 %v4405_v46  ;;  %2410 = vmatmul.mubr.bf16.gmra.mrb[100].mxu1 %v4406_v47 }
  0xf0   : > { %2320 = vmatprep.mubr.bf16.mxu0 %v4407_v48  ;;  %2417 = vmatprep.mubr.bf16.mxu1 %v4409_v49  ;;  %v4435_v48 = vld [vmem:[%s4563_s19 + $0x334] ss:$36 sps:$4 sm:$0xff]  }
  0xf1   : > { %v4437_v49 = vld [vmem:[%s4563_s19 + $0x1d0] ss:$36 sps:$4 sm:$0xff]  }
  0xf7   : > { %2321 = vmatmul.mubr.bf16.gmra.mrb[104].mxu0 %v4411_v50  ;;  %2418 = vmatmul.mubr.bf16.gmra.mrb[104].mxu1 %v4412_v51 }
  0xf8   : > { %2328 = vmatprep.mubr.bf16.mxu0 %v4414_v52  ;;  %2425 = vmatprep.mubr.bf16.mxu1 %v4416_v53 }
  0xfa   : > { %v3635_v54 = vpop.f32.mrb[0].mxu0  ;;  %v3707_v55 = vpop.f32.mrb[0].mxu1 }
  0xfb   : > { %v3636_v56 = vpop.f32.mrb[1].mxu0  ;;  %v3708_v57 = vpop.f32.mrb[1].mxu1 }
  0xfc   : > { %v4866_v60 = vadd.f32 %v3636_v56, %v3635_v54  ;;  %v4868_v61 = vadd.f32 %v3708_v57, %v3707_v55  ;;  %v3638_v62 = vpop.f32.mrb[2].mxu0  ;;  %v3710_v63 = vpop.f32.mrb[2].mxu1 }
  0xfd   : > { %v3639_v2 = vpop.f32.mrb[3].mxu0  ;;  %v3711_v3 = vpop.f32.mrb[3].mxu1 }
  0xfe   : > { %v4872_v4 = vadd.f32 %v3639_v2, %v3638_v62  ;;  %v4874_v5 = vadd.f32 %v3711_v3, %v3710_v63  ;;  %v4440_v2 = vld [vmem:[%s4563_s19 + $0x37c] ss:$36 sps:$4 sm:$0xff]  }
  0xff   : > { %2329 = vmatmul.mubr.bf16.gmra.mrb[108].mxu0 %v4418_v58  ;;  %2426 = vmatmul.mubr.bf16.gmra.mrb[108].mxu1 %v4419_v59  ;;  %v4438_v58 = vld [vmem:[%s4563_s19 + $0x330] ss:$36 sps:$4 sm:$0xff]   ;;  %v4439_v59 = vld [vmem:[%s4563_s19 + $0x218] ss:$36 sps:$4 sm:$0xff]   ;;  %v4442_v3 = vld [vmem:[%s4563_s19 + $0x260] ss:$36 sps:$4 sm:$0xff]  }
 0x100   : > { %2433 = vmatprep.mubr.bf16.mxu1 %v4420_v0  ;;  %4107 = vmatprep.mubr.bf16.mxu0 %v4422_v1 }
 0x102   : > { %v3641_v6 = vpop.f32.mrb[4].mxu0  ;;  %v3713_v7 = vpop.f32.mrb[4].mxu1 }
 0x103   : > { %v3642_v8 = vpop.f32.mrb[5].mxu0  ;;  %v3714_v9 = vpop.f32.mrb[5].mxu1 }
 0x104   : > { %v4878_v12 = vadd.f32 %v3642_v8, %v3641_v6  ;;  %v4880_v13 = vadd.f32 %v3714_v9, %v3713_v7  ;;  %v3644_v14 = vpop.f32.mrb[6].mxu0  ;;  %v3716_v15 = vpop.f32.mrb[6].mxu1 }
 0x105   : > { %v3645_v18 = vpop.f32.mrb[7].mxu0  ;;  %v3717_v19 = vpop.f32.mrb[7].mxu1 }
 0x106   : > { %v4884_v20 = vadd.f32 %v3645_v18, %v3644_v14  ;;  %v4886_v21 = vadd.f32 %v3717_v19, %v3716_v15  ;;  %v4443_v18 = vld [vmem:[%s4563_s19 + $0x378] ss:$36 sps:$4 sm:$0xff]   ;;  %v4444_v19 = vld [vmem:[%s4563_s19 + $0x2a8] ss:$36 sps:$4 sm:$0xff]  }
 0x107   : > { %2434 = vmatmul.mubr.bf16.gmra.mrb[112].mxu1 %v4423_v10  ;;  %4108 = vmatmul.mubr.bf16.vlgmr.msra.gmra.mrb[112].mxu0 %v4424_v11 }
 0x108   : > { %2441 = vmatprep.mubr.bf16.mxu1 %v4425_v16  ;;  %4111 = vmatprep.mubr.bf16.mxu0 %v4427_v17 }
 0x10a   : > { %v3647_v22 = vpop.f32.mrb[8].mxu0  ;;  %v3719_v23 = vpop.f32.mrb[8].mxu1 }
 0x10b   : > { %v3648_v24 = vpop.f32.mrb[9].mxu0  ;;  %v3720_v25 = vpop.f32.mrb[9].mxu1 }
 0x10c   : > { %v4890_v28 = vadd.f32 %v3648_v24, %v3647_v22  ;;  %v4892_v29 = vadd.f32 %v3720_v25, %v3719_v23  ;;  %v3650_v30 = vpop.f32.mrb[10].mxu0  ;;  %v3722_v31 = vpop.f32.mrb[10].mxu1  ;;  %v4445_v25 = vld [vmem:[%s4563_s19 + $0x3c4] ss:$36 sps:$4 sm:$0xff]  }
 0x10d   : > { %v3651_v34 = vpop.f32.mrb[11].mxu0  ;;  %v3723_v35 = vpop.f32.mrb[11].mxu1 }
 0x10e   : > { %v4896_v36 = vadd.f32 %v3651_v34, %v3650_v30  ;;  %v4898_v37 = vadd.f32 %v3723_v35, %v3722_v31 }
 0x10f   : > { %2442 = vmatmul.mubr.bf16.gmra.mrb[116].mxu1 %v4428_v26  ;;  %4112 = vmatmul.mubr.bf16.gmra.mrb[116].mxu0 %v4429_v27  ;;  %v4447_v26 = vld [vmem:[%s4563_s19 + $0x2f0] ss:$36 sps:$4 sm:$0xff]  }
 0x110   : > { %2449 = vmatprep.mubr.bf16.mxu1 %v4430_v32  ;;  %4115 = vmatprep.mubr.bf16.mxu0 %v4432_v33 }
 0x112   : > { %v3653_v38 = vpop.f32.mrb[12].mxu0  ;;  %v3725_v39 = vpop.f32.mrb[12].mxu1 }
 0x113   : > { %v3654_v40 = vpop.f32.mrb[13].mxu0  ;;  %v3726_v41 = vpop.f32.mrb[13].mxu1 }
 0x114   : > { %v4902_v44 = vadd.f32 %v3654_v40, %v3653_v38  ;;  %v4904_v45 = vadd.f32 %v3726_v41, %v3725_v39  ;;  %v3656_v46 = vpop.f32.mrb[14].mxu0  ;;  %v3728_v47 = vpop.f32.mrb[14].mxu1  ;;  %v4448_v40 = vld [vmem:[%s4563_s19 + $0x3c0] ss:$36 sps:$4 sm:$0xff]   ;;  %v4449_v41 = vld [vmem:[%s4563_s19 + $0x338] ss:$36 sps:$4 sm:$0xff]  }
 0x115   : > { %v3657_v50 = vpop.f32.mrb[15].mxu0  ;;  %v3729_v51 = vpop.f32.mrb[15].mxu1 }
 0x116   : > { %v4908_v52 = vadd.f32 %v3657_v50, %v3656_v46  ;;  %v4910_v53 = vadd.f32 %v3729_v51, %v3728_v47  ;;  %v4450_v47 = vld [vmem:[%s4563_s19 + $0x40c] ss:$36 sps:$4 sm:$0xff]  }
 0x117   : > { %2450 = vmatmul.mubr.bf16.gmra.mrb[120].mxu1 %v4433_v42  ;;  %4116 = vmatmul.mubr.bf16.gmra.mrb[120].mxu0 %v4434_v43 }
 0x118   : > { %2457 = vmatprep.mubr.bf16.mxu1 %v4435_v48  ;;  %4119 = vmatprep.mubr.bf16.mxu0 %v4437_v49  ;;  %v4452_v48 = vld [vmem:[%s4563_s19 + $0x380] ss:$36 sps:$4 sm:$0xff]  }
 0x11a   : > { %v3659_v54 = vpop.f32.mrb[16].mxu0  ;;  %v3747_v55 = vpop.f32.mrb[16].mxu1 }
 0x11b   : > { %v3660_v56 = vpop.f32.mrb[17].mxu0  ;;  %v3748_v57 = vpop.f32.mrb[17].mxu1 }
 0x11c   : > { %v4914_v62 = vadd.f32 %v3660_v56, %v3659_v54  ;;  %v3749_v63 = vadd.f32 %v3748_v57, %v3747_v55  ;;  %v3662_v0 = vpop.f32.mrb[18].mxu0  ;;  %v3750_v1 = vpop.f32.mrb[18].mxu1 }
 0x11d   : > { %v3663_v6 = vpop.f32.mrb[19].mxu0  ;;  %v3751_v7 = vpop.f32.mrb[19].mxu1 }
 0x11e   : > { %v4919_v8 = vadd.f32 %v3749_v63, %v4866_v60  ;;  %v4921_v9 = vadd.f32 %v3663_v6, %v3662_v0  ;;  %v3752_v10 = vadd.f32 %v3751_v7, %v3750_v1  ;;  %v4453_v63 = vld [vmem:[%s4563_s19 + $0x408] ss:$36 sps:$4 sm:$0xff]   ;;  %v4455_v6 = vld [vmem:[%s4563_s19 + $0x454] ss:$36 sps:$4 sm:$0xff]  }
 0x11f   : > { %2458 = vmatmul.mubr.bf16.gmra.mrb[124].mxu1 %v4438_v58  ;;  %4120 = vmatmul.mubr.bf16.gmra.mrb[124].mxu0 %v4439_v59  ;;  %v4454_v0 = vld [vmem:[%s4563_s19 + $0x3c8] ss:$36 sps:$4 sm:$0xff]   ;;  %v4457_v7 = vld [vmem:[%s4563_s19 + $0x410] ss:$36 sps:$4 sm:$0xff]  }
 0x120   : > { %v4924_v11 = vadd.f32 %v3752_v10, %v4872_v4  ;;  %2465 = vmatprep.mubr.bf16.mxu1 %v4440_v2  ;;  %4123 = vmatprep.mubr.bf16.mxu0 %v4442_v3 }
 0x122   : > { %v3665_v14 = vpop.f32.mrb[20].mxu0  ;;  %v3753_v15 = vpop.f32.mrb[20].mxu1 }
 0x123   : > { %v3666_v16 = vpop.f32.mrb[21].mxu0  ;;  %v3754_v17 = vpop.f32.mrb[21].mxu1 }
 0x124   : > { %v4928_v60 = vadd.f32 %v3666_v16, %v3665_v14  ;;  %v3755_v22 = vadd.f32 %v3754_v17, %v3753_v15  ;;  %v3668_v23 = vpop.f32.mrb[22].mxu0  ;;  %v3756_v24 = vpop.f32.mrb[22].mxu1 }
 0x125   : > { %v3669_v27 = vpop.f32.mrb[23].mxu0  ;;  %v3757_v4 = vpop.f32.mrb[23].mxu1 }
 0x126   : > { %v4933_v30 = vadd.f32 %v3755_v22, %v4878_v12  ;;  %v4935_v31 = vadd.f32 %v3669_v27, %v3668_v23  ;;  %v3758_v32 = vadd.f32 %v3757_v4, %v3756_v24  ;;  %v4458_v24 = vld [vmem:[%s4563_s19 + $0x450] ss:$36 sps:$4 sm:$0xff]  }
 0x127   : > { %2466 = vmatmul.mubr.bf16.gmra.mrb[128].mxu1 %v4443_v18  ;;  %4124 = vmatmul.mubr.bf16.gmra.mrb[128].mxu0 %v4444_v19 }
 0x128   : > { %v4938_v33 = vadd.f32 %v3758_v32, %v4884_v20  ;;  %2473 = vmatprep.mubr.bf16.mxu1 %v4445_v25  ;;  %4127 = vmatprep.mubr.bf16.mxu0 %v4447_v26  ;;  %v4459_v25 = vld [vmem:[%s4563_s19 + $0x458] ss:$36 sps:$4 sm:$0xff]   ;;  %s3241_s19 = sshll.u32 %s5453_s21, 2 }
 0x129   : > { %s5209_s29 = scalar_lea.vmem %s5445_s2, %s3241_s19 }
 0x12a   : > { %v3671_v34 = vpop.f32.mrb[24].mxu0  ;;  %v3759_v35 = vpop.f32.mrb[24].mxu1 }
 0x12b   : > { %v3672_v38 = vpop.f32.mrb[25].mxu0  ;;  %v3760_v39 = vpop.f32.mrb[25].mxu1 }
 0x12c   : > { %v4942_v12 = vadd.f32 %v3672_v38, %v3671_v34  ;;  %v3761_v42 = vadd.f32 %v3760_v39, %v3759_v35  ;;  %v3674_v43 = vpop.f32.mrb[26].mxu0  ;;  %v3762_v46 = vpop.f32.mrb[26].mxu1 }
 0x12d   : > { %v3675_v49 = vpop.f32.mrb[27].mxu0  ;;  %v3763_v20 = vpop.f32.mrb[27].mxu1 }
 0x12e   : > { %v4947_v50 = vadd.f32 %v3761_v42, %v4890_v28  ;;  %v4949_v51 = vadd.f32 %v3675_v49, %v3674_v43  ;;  %v3764_v54 = vadd.f32 %v3763_v20, %v3762_v46 }
 0x12f   : > { %2474 = vmatmul.mubr.bf16.gmra.mrb[132].mxu1 %v4448_v40  ;;  %4128 = vmatmul.mubr.bf16.gmra.mrb[132].mxu0 %v4449_v41 }
 0x130   : > { %v4952_v55 = vadd.f32 %v3764_v54, %v4896_v36  ;;  %2481 = vmatprep.mubr.bf16.mxu1 %v4450_v47  ;;  %4131 = vmatprep.mubr.bf16.mxu0 %v4452_v48 }
 0x132   : > { %v3677_v56 = vpop.f32.mrb[28].mxu0  ;;  %v3765_v57 = vpop.f32.mrb[28].mxu1 }
 0x133   : > { %v3678_v58 = vpop.f32.mrb[29].mxu0  ;;  %v3766_v59 = vpop.f32.mrb[29].mxu1 }
 0x134   : > { %v4956_v28 = vadd.f32 %v3678_v58, %v3677_v56  ;;  %v3767_v1 = vadd.f32 %v3766_v59, %v3765_v57  ;;  %v3680_v2 = vpop.f32.mrb[30].mxu0  ;;  %v3768_v3 = vpop.f32.mrb[30].mxu1 }
 0x135   : > { %v3681_v10 = vpop.f32.mrb[31].mxu0  ;;  %v3769_v36 = vpop.f32.mrb[31].mxu1 }
 0x136   : > { %v4961_v14 = vadd.f32 %v3767_v1, %v4902_v44  ;;  %v4963_v15 = vadd.f32 %v3681_v10, %v3680_v2  ;;  %v3770_v16 = vadd.f32 %v3769_v36, %v3768_v3 }
 0x137   : > { %2482 = vmatmul.mubr.bf16.gmra.mrb[136].mxu1 %v4453_v63  ;;  %4132 = vmatmul.mubr.bf16.gmra.mrb[136].mxu0 %v4454_v0 }
 0x138   : > { %v4966_v17 = vadd.f32 %v3770_v16, %v4908_v52  ;;  %2489 = vmatprep.mubr.bf16.mxu1 %v4455_v6  ;;  %4135 = vmatprep.mubr.bf16.mxu0 %v4457_v7 }
 0x13a   : > { %v3683_v18 = vpop.f32.mrb[32].mxu0  ;;  %v3771_v19 = vpop.f32.mrb[32].mxu1 }
 0x13b   : > { %v3684_v22 = vpop.f32.mrb[33].mxu0  ;;  %v3772_v23 = vpop.f32.mrb[33].mxu1 }
 0x13c   : > { %v4970_v26 = vadd.f32 %v3684_v22, %v3683_v18  ;;  %v3773_v44 = vadd.f32 %v3772_v23, %v3771_v19  ;;  %v3686_v27 = vpop.f32.mrb[34].mxu0  ;;  %v3774_v4 = vpop.f32.mrb[34].mxu1 }
 0x13d   : > { %v3687_v32 = vpop.f32.mrb[35].mxu0  ;;  %v3775_v34 = vpop.f32.mrb[35].mxu1 }
 0x13e   : > { %v4973_v35 = vadd.f32 %v3773_v44, %v4914_v62  ;;  %v3688_v52 = vadd.f32 %v3687_v32, %v3686_v27  ;;  %v3776_v38 = vadd.f32 %v3775_v34, %v3774_v4 }
 0x13f   : > { %2490 = vmatmul.mubr.bf16.gmra.mrb[140].mxu1 %v4458_v24  ;;  %4136 = vmatmul.mubr.bf16.gmra.mrb[140].mxu0 %v4459_v25 }
 0x140   : > { %v4976_v39 = vadd.f32 %v3776_v38, %v4921_v9 }
 0x142   : > { %v3689_v40 = vpop.f32.mrb[36].mxu0  ;;  %v3777_v41 = vpop.f32.mrb[36].mxu1 }
 0x143   : > { %v3690_v42 = vpop.f32.mrb[37].mxu0  ;;  %v3778_v43 = vpop.f32.mrb[37].mxu1 }
 0x144   : > { %v4978_v46 = vadd.f32 %v3690_v42, %v3689_v40  ;;  %v3779_v47 = vadd.f32 %v3778_v43, %v3777_v41  ;;  %v3692_v48 = vpop.f32.mrb[38].mxu0  ;;  %v3780_v49 = vpop.f32.mrb[38].mxu1 }
 0x145   : > { %v3693_v20 = vpop.f32.mrb[39].mxu0  ;;  %v3781_v54 = vpop.f32.mrb[39].mxu1 }
 0x146   : > { %v4981_v62 = vadd.f32 %v3779_v47, %v4928_v60  ;;  %v3694_v56 = vadd.f32 %v3693_v20, %v3692_v48  ;;  %v3782_v57 = vadd.f32 %v3781_v54, %v3780_v49 }
 0x148   : > { %v4984_v58 = vadd.f32 %v3782_v57, %v4935_v31 }
 0x14a   : > { %v3695_v9 = vpop.f32.mrb[40].mxu0  ;;  %v3783_v59 = vpop.f32.mrb[40].mxu1 }
 0x14b   : > { %v3696_v63 = vpop.f32.mrb[41].mxu0  ;;  %v3784_v0 = vpop.f32.mrb[41].mxu1 }
 0x14c   : > { %v4986_v1 = vadd.f32 %v3696_v63, %v3695_v9  ;;  %v3785_v2 = vadd.f32 %v3784_v0, %v3783_v59  ;;  %v3698_v3 = vpop.f32.mrb[42].mxu0  ;;  %v3786_v6 = vpop.f32.mrb[42].mxu1 }
 0x14d   : > { %v3699_v7 = vpop.f32.mrb[43].mxu0  ;;  %v3787_v10 = vpop.f32.mrb[43].mxu1 }
 0x14e   : > { %v4989_v36 = vadd.f32 %v3785_v2, %v4942_v12  ;;  %v4991_v60 = vadd.f32 %v3699_v7, %v3698_v3  ;;  %v3788_v16 = vadd.f32 %v3787_v10, %v3786_v6 }
 0x150   : > { %v4994_v31 = vadd.f32 %v3788_v16, %v4949_v51 }
 0x152   : > { %v3701_v18 = vpop.f32.mrb[44].mxu0  ;;  %v3789_v19 = vpop.f32.mrb[44].mxu1 }
 0x153   : > { %v3702_v22 = vpop.f32.mrb[45].mxu0  ;;  %v3790_v23 = vpop.f32.mrb[45].mxu1 }
 0x154   : > { %v4996_v24 = vadd.f32 %v3702_v22, %v3701_v18  ;;  %v3791_v25 = vadd.f32 %v3790_v23, %v3789_v19  ;;  %v3704_v44 = vpop.f32.mrb[46].mxu0  ;;  %v3792_v27 = vpop.f32.mrb[46].mxu1 }
 0x155   : > { %v3705_v4 = vpop.f32.mrb[47].mxu0  ;;  %v3793_v32 = vpop.f32.mrb[47].mxu1 }
 0x156   : > { %v4999_v12 = vadd.f32 %v3791_v25, %v4956_v28  ;;  %v5001_v34 = vadd.f32 %v3705_v4, %v3704_v44  ;;  %v3794_v38 = vadd.f32 %v3793_v32, %v3792_v27 }
 0x158   : > { %v5004_v51 = vadd.f32 %v3794_v38, %v4963_v15 }
 0x15a   : > { %v3795_v40 = vpop.f32.mrb[48].mxu1  ;;  %v3859_v41 = vpop.f32.mrb[48].mxu0 }
 0x15b   : > { %v3796_v42 = vpop.f32.mrb[49].mxu1  ;;  %v3860_v43 = vpop.f32.mrb[49].mxu0 }
 0x15c   : > { %v3797_v47 = vadd.f32 %v3796_v42, %v3795_v40  ;;  %v3861_v48 = vadd.f32 %v3860_v43, %v3859_v41  ;;  %v3798_v49 = vpop.f32.mrb[50].mxu1  ;;  %v3862_v20 = vpop.f32.mrb[50].mxu0 }
 0x15d   : > { %v3799_v54 = vpop.f32.mrb[51].mxu1  ;;  %v3863_v57 = vpop.f32.mrb[51].mxu0 }
 0x15e   : > { %v5007_v9 = vadd.f32 %v3797_v47, %v4970_v26  ;;  %v5010_v28 = vadd.f32 %v3861_v48, %v4919_v8  ;;  %v3800_v59 = vadd.f32 %v3799_v54, %v3798_v49  ;;  %v3864_v63 = vadd.f32 %v3863_v57, %v3862_v20 }
 0x160   : > { %v5012_v15 = vadd.f32 %v3800_v59, %v3688_v52  ;;  %v5015_v0 = vadd.f32 %v3864_v63, %v4924_v11 }
 0x162   : > { %v3801_v2 = vpop.f32.mrb[52].mxu1  ;;  %v3865_v3 = vpop.f32.mrb[52].mxu0 }
 0x163   : > { %v3802_v6 = vpop.f32.mrb[53].mxu1  ;;  %v3866_v7 = vpop.f32.mrb[53].mxu0 }
 0x164   : > { %v3803_v10 = vadd.f32 %v3802_v6, %v3801_v2  ;;  %v3867_v16 = vadd.f32 %v3866_v7, %v3865_v3  ;;  %v3804_v18 = vpop.f32.mrb[54].mxu1  ;;  %v3868_v19 = vpop.f32.mrb[54].mxu0 }
 0x165   : > { %v3805_v26 = vpop.f32.mrb[55].mxu1  ;;  %v3869_v22 = vpop.f32.mrb[55].mxu0 }
 0x166   : > { %v5018_v8 = vadd.f32 %v3803_v10, %v4978_v46  ;;  %v5021_v23 = vadd.f32 %v3867_v16, %v4933_v30  ;;  %v3806_v52 = vadd.f32 %v3805_v26, %v3804_v18  ;;  %v3870_v25 = vadd.f32 %v3869_v22, %v3868_v19 }
 0x168   : > { %v5023_v11 = vadd.f32 %v3806_v52, %v3694_v56  ;;  %v5026_v44 = vadd.f32 %v3870_v25, %v4938_v33 }
 0x16a   : > { %v3807_v27 = vpop.f32.mrb[56].mxu1  ;;  %v3871_v4 = vpop.f32.mrb[56].mxu0 }
 0x16b   : > { %v3808_v32 = vpop.f32.mrb[57].mxu1  ;;  %v3872_v38 = vpop.f32.mrb[57].mxu0 }
 0x16c   : > { %v3809_v40 = vadd.f32 %v3808_v32, %v3807_v27  ;;  %v3873_v41 = vadd.f32 %v3872_v38, %v3871_v4  ;;  %v3810_v42 = vpop.f32.mrb[58].mxu1  ;;  %v3874_v43 = vpop.f32.mrb[58].mxu0 }
 0x16d   : > { %v3811_v46 = vpop.f32.mrb[59].mxu1  ;;  %v3875_v47 = vpop.f32.mrb[59].mxu0 }
 0x16e   : > { %v5029_v30 = vadd.f32 %v3809_v40, %v4986_v1  ;;  %v5032_v48 = vadd.f32 %v3873_v41, %v4947_v50  ;;  %v3812_v56 = vadd.f32 %v3811_v46, %v3810_v42  ;;  %v3876_v49 = vadd.f32 %v3875_v47, %v3874_v43 }
 0x170   : > { %v5035_v33 = vadd.f32 %v3812_v56, %v4991_v60  ;;  %v5038_v20 = vadd.f32 %v3876_v49, %v4952_v55 }
 0x172   : > { %v3813_v54 = vpop.f32.mrb[60].mxu1  ;;  %v3877_v57 = vpop.f32.mrb[60].mxu0 }
 0x173   : > { %v3814_v59 = vpop.f32.mrb[61].mxu1  ;;  %v3878_v63 = vpop.f32.mrb[61].mxu0 }
 0x174   : > { %v3815_v2 = vadd.f32 %v3814_v59, %v3813_v54  ;;  %v3879_v3 = vadd.f32 %v3878_v63, %v3877_v57  ;;  %v3816_v6 = vpop.f32.mrb[62].mxu1  ;;  %v3880_v1 = vpop.f32.mrb[62].mxu0 }
 0x175   : > { %v3817_v7 = vpop.f32.mrb[63].mxu1  ;;  %v3881_v10 = vpop.f32.mrb[63].mxu0 }
 0x176   : > { %v5041_v50 = vadd.f32 %v3815_v2, %v4996_v24  ;;  %v5044_v16 = vadd.f32 %v3879_v3, %v4961_v14  ;;  %v3818_v60 = vadd.f32 %v3817_v7, %v3816_v6  ;;  %v3882_v18 = vadd.f32 %v3881_v10, %v3880_v1 }
 0x178   : > { %v5047_v55 = vadd.f32 %v3818_v60, %v5001_v34  ;;  %v5050_v19 = vadd.f32 %v3882_v18, %v4966_v17 }
 0x17a   : > { %v3819_v26 = vpop.f32.mrb[64].mxu1  ;;  %v3883_v22 = vpop.f32.mrb[64].mxu0 }
 0x17b   : > { %v3820_v52 = vpop.f32.mrb[65].mxu1  ;;  %v3884_v25 = vpop.f32.mrb[65].mxu0 }
 0x17c   : > { %v3821_v27 = vadd.f32 %v3820_v52, %v3819_v26  ;;  %v3885_v4 = vadd.f32 %v3884_v25, %v3883_v22  ;;  %v3822_v32 = vpop.f32.mrb[66].mxu1  ;;  %v3886_v24 = vpop.f32.mrb[66].mxu0 }
 0x17d   : > { %v3823_v38 = vpop.f32.mrb[67].mxu1  ;;  %v3887_v40 = vpop.f32.mrb[67].mxu0 }
 0x17e   : > { %v5053_v14 = vadd.f32 %v3821_v27, %v4868_v61  ;;  %v5056_v41 = vadd.f32 %v3885_v4, %v4973_v35  ;;  %v3824_v34 = vadd.f32 %v3823_v38, %v3822_v32  ;;  %v3888_v42 = vadd.f32 %v3887_v40, %v3886_v24 }
 0x180   : > { %v5059_v17 = vadd.f32 %v3824_v34, %v4874_v5  ;;  %v5062_v43 = vadd.f32 %v3888_v42, %v4976_v39 }
 0x182   : > { %v3825_v46 = vpop.f32.mrb[68].mxu1  ;;  %v3889_v47 = vpop.f32.mrb[68].mxu0 }
 0x183   : > { %v3826_v56 = vpop.f32.mrb[69].mxu1  ;;  %v3890_v49 = vpop.f32.mrb[69].mxu0 }
 0x184   : > { %v3827_v54 = vadd.f32 %v3826_v56, %v3825_v46  ;;  %v3891_v57 = vadd.f32 %v3890_v49, %v3889_v47  ;;  %v3828_v59 = vpop.f32.mrb[70].mxu1  ;;  %v3892_v61 = vpop.f32.mrb[70].mxu0 }
 0x185   : > { %v3829_v63 = vpop.f32.mrb[71].mxu1  ;;  %v3893_v2 = vpop.f32.mrb[71].mxu0 }
 0x186   : > { %v5065_v35 = vadd.f32 %v3827_v54, %v4880_v13  ;;  %v5068_v3 = vadd.f32 %v3891_v57, %v4981_v62  ;;  %v3830_v5 = vadd.f32 %v3829_v63, %v3828_v59  ;;  %v3894_v6 = vadd.f32 %v3893_v2, %v3892_v61 }
 0x188   : > { %v5071_v39 = vadd.f32 %v3830_v5, %v4886_v21  ;;  %v5074_v1 = vadd.f32 %v3894_v6, %v4984_v58 }
 0x18a   : > { %v3831_v7 = vpop.f32.mrb[72].mxu1  ;;  %v3895_v10 = vpop.f32.mrb[72].mxu0 }
 0x18b   : > { %v3832_v60 = vpop.f32.mrb[73].mxu1  ;;  %v3896_v18 = vpop.f32.mrb[73].mxu0 }
 0x18c   : > { %v3833_v26 = vadd.f32 %v3832_v60, %v3831_v7  ;;  %v3897_v22 = vadd.f32 %v3896_v18, %v3895_v10  ;;  %v3834_v52 = vpop.f32.mrb[74].mxu1  ;;  %v3898_v13 = vpop.f32.mrb[74].mxu0 }
 0x18d   : > { %v3835_v25 = vpop.f32.mrb[75].mxu1  ;;  %v3899_v27 = vpop.f32.mrb[75].mxu0 }
 0x18e   : > { %v5077_v62 = vadd.f32 %v3833_v26, %v4892_v29  ;;  %v5080_v4 = vadd.f32 %v3897_v22, %v4989_v36  ;;  %v3836_v21 = vadd.f32 %v3835_v25, %v3834_v52  ;;  %v3900_v32 = vadd.f32 %v3899_v27, %v3898_v13 }
 0x190   : > { %v5083_v58 = vadd.f32 %v3836_v21, %v4898_v37  ;;  %v5086_v24 = vadd.f32 %v3900_v32, %v4994_v31 }
 0x192   : > { %v3837_v38 = vpop.f32.mrb[76].mxu1  ;;  %v3901_v40 = vpop.f32.mrb[76].mxu0 }
 0x193   : > { %v3838_v34 = vpop.f32.mrb[77].mxu1  ;;  %v3902_v42 = vpop.f32.mrb[77].mxu0 }
 0x194   : > { %v3839_v46 = vadd.f32 %v3838_v34, %v3837_v38  ;;  %v3903_v47 = vadd.f32 %v3902_v42, %v3901_v40  ;;  %v3840_v56 = vpop.f32.mrb[78].mxu1  ;;  %v3904_v29 = vpop.f32.mrb[78].mxu0 }
 0x195   : > { %v3841_v49 = vpop.f32.mrb[79].mxu1  ;;  %v3905_v54 = vpop.f32.mrb[79].mxu0 }
 0x196   : > { %v5089_v36 = vadd.f32 %v3839_v46, %v4904_v45  ;;  %v5092_v57 = vadd.f32 %v3903_v47, %v4999_v12  ;;  %v3842_v37 = vadd.f32 %v3841_v49, %v3840_v56  ;;  %v3906_v59 = vadd.f32 %v3905_v54, %v3904_v29 }
 0x198   : > { %v5095_v31 = vadd.f32 %v3842_v37, %v4910_v53  ;;  %v5098_v61 = vadd.f32 %v3906_v59, %v5004_v51 }
 0x19a   : > { %v3907_v63 = vpop.f32.mrb[80].mxu0  ;;  %v3971_v2 = vpop.f32.mrb[80].mxu1 }
 0x19b   : > { %v3908_v5 = vpop.f32.mrb[81].mxu0  ;;  %v3972_v6 = vpop.f32.mrb[81].mxu1 }
 0x19c   : > { %v3909_v7 = vadd.f32 %v3908_v5, %v3907_v63  ;;  %v3973_v10 = vadd.f32 %v3972_v6, %v3971_v2  ;;  %v3910_v60 = vpop.f32.mrb[82].mxu0  ;;  %v3974_v45 = vpop.f32.mrb[82].mxu1 }
 0x19d   : > { %v3911_v18 = vpop.f32.mrb[83].mxu0  ;;  %v3975_v26 = vpop.f32.mrb[83].mxu1 }
 0x19e   : > { %v5101_v12 = vadd.f32 %v3909_v7, %v5007_v9  ;;  %v3912_v22 = vadd.f32 %v3911_v18, %v3910_v60  ;;  %v3976_v52 = vadd.f32 %v3975_v26, %v3974_v45  ;;  %v5104_v53 = vadd.f32 %v3973_v10, %v5010_v28 }
 0x1a0   : > { %v5107_v51 = vadd.f32 %v3912_v22, %v5012_v15  ;;  %v5110_v13 = vadd.f32 %v3976_v52, %v5015_v0 }
 0x1a2   : > { %v3913_v25 = vpop.f32.mrb[84].mxu0  ;;  %v3977_v27 = vpop.f32.mrb[84].mxu1 }
 0x1a3   : > { %v3914_v21 = vpop.f32.mrb[85].mxu0  ;;  %v3978_v32 = vpop.f32.mrb[85].mxu1 }
 0x1a4   : > { %v3915_v38 = vadd.f32 %v3914_v21, %v3913_v25  ;;  %v3979_v40 = vadd.f32 %v3978_v32, %v3977_v27  ;;  %v3916_v34 = vpop.f32.mrb[86].mxu0  ;;  %v3980_v9 = vpop.f32.mrb[86].mxu1 }
 0x1a5   : > { %v3917_v42 = vpop.f32.mrb[87].mxu0  ;;  %v3981_v46 = vpop.f32.mrb[87].mxu1 }
 0x1a6   : > { %v5113_v47 = vadd.f32 %v3915_v38, %v5018_v8  ;;  %v3918_v28 = vadd.f32 %v3917_v42, %v3916_v34  ;;  %v3982_v56 = vadd.f32 %v3981_v46, %v3980_v9  ;;  %v5116_v15 = vadd.f32 %v3979_v40, %v5021_v23 }
 0x1a8   : > { %v5119_v0 = vadd.f32 %v3918_v28, %v5023_v11  ;;  %v5122_v29 = vadd.f32 %v3982_v56, %v5026_v44 }
 0x1aa   : > { %v3919_v49 = vpop.f32.mrb[88].mxu0  ;;  %v3983_v54 = vpop.f32.mrb[88].mxu1 }
 0x1ab   : > { %v3920_v37 = vpop.f32.mrb[89].mxu0  ;;  %v3984_v59 = vpop.f32.mrb[89].mxu1 }
 0x1ac   : > { %v3921_v63 = vadd.f32 %v3920_v37, %v3919_v49  ;;  %v3985_v2 = vadd.f32 %v3984_v59, %v3983_v54  ;;  %v3922_v5 = vpop.f32.mrb[90].mxu0  ;;  %v3986_v8 = vpop.f32.mrb[90].mxu1 }
 0x1ad   : > { %v3923_v6 = vpop.f32.mrb[91].mxu0  ;;  %v3987_v7 = vpop.f32.mrb[91].mxu1 }
 0x1ae   : > { %v5125_v10 = vadd.f32 %v3921_v63, %v5029_v30  ;;  %v3924_v23 = vadd.f32 %v3923_v6, %v3922_v5  ;;  %v3988_v60 = vadd.f32 %v3987_v7, %v3986_v8  ;;  %v5128_v11 = vadd.f32 %v3985_v2, %v5032_v48 }
 0x1b0   : > { %v5131_v44 = vadd.f32 %v3924_v23, %v5035_v33  ;;  %v5134_v45 = vadd.f32 %v3988_v60, %v5038_v20 }
 0x1b2   : > { %v3925_v18 = vpop.f32.mrb[92].mxu0  ;;  %v3989_v26 = vpop.f32.mrb[92].mxu1 }
 0x1b3   : > { %v3926_v22 = vpop.f32.mrb[93].mxu0  ;;  %v3990_v52 = vpop.f32.mrb[93].mxu1 }
 0x1b4   : > { %v3927_v25 = vadd.f32 %v3926_v22, %v3925_v18  ;;  %v3991_v27 = vadd.f32 %v3990_v52, %v3989_v26  ;;  %v3928_v21 = vpop.f32.mrb[94].mxu0  ;;  %v3992_v30 = vpop.f32.mrb[94].mxu1 }
 0x1b5   : > { %v3929_v32 = vpop.f32.mrb[95].mxu0  ;;  %v3993_v38 = vpop.f32.mrb[95].mxu1 }
 0x1b6   : > { %v5137_v40 = vadd.f32 %v3927_v25, %v5041_v50  ;;  %v3930_v48 = vadd.f32 %v3929_v32, %v3928_v21  ;;  %v3994_v34 = vadd.f32 %v3993_v38, %v3992_v30  ;;  %v5140_v33 = vadd.f32 %v3991_v27, %v5044_v16 }
 0x1b8   : > { %v5143_v20 = vadd.f32 %v3930_v48, %v5047_v55  ;;  %v5146_v9 = vadd.f32 %v3994_v34, %v5050_v19 }
 0x1ba   : > { %v3931_v42 = vpop.f32.mrb[96].mxu0  ;;  %v3995_v46 = vpop.f32.mrb[96].mxu1 }
 0x1bb   : > { %v3932_v28 = vpop.f32.mrb[97].mxu0  ;;  %v3996_v56 = vpop.f32.mrb[97].mxu1 }
 0x1bc   : > { %v3933_v49 = vadd.f32 %v3932_v28, %v3931_v42  ;;  %v3997_v54 = vadd.f32 %v3996_v56, %v3995_v46  ;;  %v3934_v37 = vpop.f32.mrb[98].mxu0  ;;  %v3998_v50 = vpop.f32.mrb[98].mxu1 }
 0x1bd   : > { %v3935_v59 = vpop.f32.mrb[99].mxu0  ;;  %v3999_v63 = vpop.f32.mrb[99].mxu1 }
 0x1be   : > { %v5149_v2 = vadd.f32 %v3933_v49, %v5053_v14  ;;  %v3936_v16 = vadd.f32 %v3935_v59, %v3934_v37  ;;  %v4000_v5 = vadd.f32 %v3999_v63, %v3998_v50  ;;  %v5152_v55 = vadd.f32 %v3997_v54, %v5056_v41 }
 0x1c0   : > { %v5155_v19 = vadd.f32 %v3936_v16, %v5059_v17  ;;  %v5158_v8 = vadd.f32 %v4000_v5, %v5062_v43 }
 0x1c2   : > { %v3937_v6 = vpop.f32.mrb[100].mxu0  ;;  %v4001_v7 = vpop.f32.mrb[100].mxu1 }
 0x1c3   : > { %v3938_v23 = vpop.f32.mrb[101].mxu0  ;;  %v4002_v60 = vpop.f32.mrb[101].mxu1 }
 0x1c4   : > { %v3939_v18 = vadd.f32 %v3938_v23, %v3937_v6  ;;  %v4003_v26 = vadd.f32 %v4002_v60, %v4001_v7  ;;  %v3940_v22 = vpop.f32.mrb[102].mxu0  ;;  %v4004_v14 = vpop.f32.mrb[102].mxu1 }
 0x1c5   : > { %v3941_v52 = vpop.f32.mrb[103].mxu0  ;;  %v4005_v25 = vpop.f32.mrb[103].mxu1 }
 0x1c6   : > { %v5161_v27 = vadd.f32 %v3939_v18, %v5065_v35  ;;  %v3942_v41 = vadd.f32 %v3941_v52, %v3940_v22  ;;  %v4006_v21 = vadd.f32 %v4005_v25, %v4004_v14  ;;  %v5164_v17 = vadd.f32 %v4003_v26, %v5068_v3 }
 0x1c8   : > { %v5167_v43 = vadd.f32 %v3942_v41, %v5071_v39  ;;  %v5170_v30 = vadd.f32 %v4006_v21, %v5074_v1 }
 0x1ca   : > { %v3943_v32 = vpop.f32.mrb[104].mxu0  ;;  %v4007_v38 = vpop.f32.mrb[104].mxu1 }
 0x1cb   : > { %v3944_v48 = vpop.f32.mrb[105].mxu0  ;;  %v4008_v34 = vpop.f32.mrb[105].mxu1 }
 0x1cc   : > { %v3945_v42 = vadd.f32 %v3944_v48, %v3943_v32  ;;  %v4009_v46 = vadd.f32 %v4008_v34, %v4007_v38  ;;  %v3946_v28 = vpop.f32.mrb[106].mxu0  ;;  %v4010_v35 = vpop.f32.mrb[106].mxu1 }
 0x1cd   : > { %v3947_v56 = vpop.f32.mrb[107].mxu0  ;;  %v4011_v49 = vpop.f32.mrb[107].mxu1 }
 0x1ce   : > { %v5173_v54 = vadd.f32 %v3945_v42, %v5077_v62  ;;  %v3948_v3 = vadd.f32 %v3947_v56, %v3946_v28  ;;  %v4012_v37 = vadd.f32 %v4011_v49, %v4010_v35  ;;  %v5176_v39 = vadd.f32 %v4009_v46, %v5080_v4 }
 0x1d0   : > { %v5179_v1 = vadd.f32 %v3948_v3, %v5083_v58  ;;  %v5182_v50 = vadd.f32 %v4012_v37, %v5086_v24 }
 0x1d2   : > { %v3949_v59 = vpop.f32.mrb[108].mxu0  ;;  %v4013_v63 = vpop.f32.mrb[108].mxu1 }
 0x1d3   : > { %v3950_v16 = vpop.f32.mrb[109].mxu0  ;;  %v4014_v5 = vpop.f32.mrb[109].mxu1 }
 0x1d4   : > { %v3951_v6 = vadd.f32 %v3950_v16, %v3949_v59  ;;  %v4015_v7 = vadd.f32 %v4014_v5, %v4013_v63  ;;  %v3952_v62 = vpop.f32.mrb[110].mxu0  ;;  %v4016_v23 = vpop.f32.mrb[110].mxu1 }
 0x1d5   : > { %v3953_v60 = vpop.f32.mrb[111].mxu0  ;;  %v4017_v18 = vpop.f32.mrb[111].mxu1 }
 0x1d6   : > { %v5185_v4 = vadd.f32 %v3951_v6, %v5089_v36  ;;  %v3954_v26 = vadd.f32 %v3953_v60, %v3952_v62  ;;  %v4018_v58 = vadd.f32 %v4017_v18, %v4016_v23  ;;  %v5188_v22 = vadd.f32 %v4015_v7, %v5092_v57 }
 0x1d8   : > { %v5191_v24 = vadd.f32 %v3954_v26, %v5095_v31  ;;  %v5194_v14 = vadd.f32 %v4018_v58, %v5098_v61 }
 0x1da   : > { %v4019_v52 = vpop.f32.mrb[112].mxu1  ;;  %v4109_v25 = vpop.f32.mrb[112].mxu0 }
 0x1db   : > { %v5197_v41 = vadd.f32 %v4109_v25, %v5116_v15  ;;  %v4020_v21 = vpop.f32.mrb[113].mxu1  ;;  %v2532_v32 = vpop.f32.mrb[113].mxu0 }
 0x1dc   : > { %v4021_v36 = vadd.f32 %v4020_v21, %v4019_v52  ;;  %v5201_v38 = vadd.f32 %v2532_v32, %v5104_v53  ;;  %v4022_v57 = vpop.f32.mrb[114].mxu1  ;;  %v4110_v48 = vpop.f32.mrb[114].mxu0 }
 0x1dd   : > { %v5204_v31 = vadd.f32 %v4110_v48, %v5122_v29  ;;  %v4023_v34 = vpop.f32.mrb[115].mxu1  ;;  %v2535_v61 = vpop.f32.mrb[115].mxu0 }
 0x1de   : > { %v4024_v15 = vadd.f32 %v4023_v34, %v4022_v57  ;;  %v5212_v42 = vadd.f32 %v2535_v61, %v5110_v13  ;;  %v5215_v53 = vadd.f32 %v4021_v36, %v5101_v12 }
 0x1df   : > { %v3532_v29 = vpack.c.bf16 %v5204_v31, %v5197_v41 }
 0x1e0   : > { %v3527_v46 = vpack.c.bf16 %v5212_v42, %v5201_v38  ;;  %v2918_v28 = vadd.f32 %v5212_v42, %v5201_v38  ;;  %v5224_v35 = vadd.f32 %v4024_v15, %v5107_v51 }
 0x1e1   : > { %3604 = vst [vmem:[%s5209_s29 + $0x8] sm:$0xff] %v3532_v29  }
 0x1e2   : > { %3528 = vst [vmem:[%s5209_s29] sm:$0xff] %v3527_v46   ;;  %v2919_v13 = vadd.f32 %v2918_v28, %v5197_v41  ;;  %v4025_v56 = vpop.f32.mrb[116].mxu1  ;;  %v4113_v49 = vpop.f32.mrb[116].mxu0 }
 0x1e3   : > { %v5230_v12 = vadd.f32 %v4113_v49, %v5140_v33  ;;  %v4026_v3 = vpop.f32.mrb[117].mxu1  ;;  %v2548_v37 = vpop.f32.mrb[117].mxu0 }
 0x1e4   : > { %v4027_v59 = vadd.f32 %v4026_v3, %v4025_v56  ;;  %v5233_v63 = vadd.f32 %v2548_v37, %v5128_v11  ;;  %v2920_v51 = vadd.f32 %v2919_v13, %v5204_v31  ;;  %v4028_v16 = vpop.f32.mrb[118].mxu1  ;;  %v4114_v5 = vpop.f32.mrb[118].mxu0 }
 0x1e5   : > { %v5237_v6 = vadd.f32 %v4114_v5, %v5146_v9  ;;  %v4029_v7 = vpop.f32.mrb[119].mxu1  ;;  %v2551_v62 = vpop.f32.mrb[119].mxu0 }
 0x1e6   : > { %v2921_v33 = vadd.f32 %v2920_v51, %v5233_v63  ;;  %v4030_v23 = vadd.f32 %v4029_v7, %v4028_v16  ;;  %v5241_v60 = vadd.f32 %v2551_v62, %v5134_v45  ;;  %v2444_v18 = vadd.f32 %v4027_v59, %v5113_v47 }
 0x1e7   : > { %v3542_v11 = vpack.c.bf16 %v5237_v6, %v5230_v12 }
 0x1e8   : > { %v3537_v26 = vpack.c.bf16 %v5241_v60, %v5233_v63  ;;  %v2922_v58 = vadd.f32 %v2921_v33, %v5241_v60  ;;  %v2447_v9 = vadd.f32 %v4030_v23, %v5119_v0 }
 0x1e9   : > { %3606 = vst [vmem:[%s5209_s29 + $0x18] sm:$0xff] %v3542_v11  }
 0x1ea   : > { %3605 = vst [vmem:[%s5209_s29 + $0x10] sm:$0xff] %v3537_v26   ;;  %v2923_v52 = vadd.f32 %v2922_v58, %v5230_v12  ;;  %v4031_v25 = vpop.f32.mrb[120].mxu1  ;;  %v4117_v21 = vpop.f32.mrb[120].mxu0 }
 0x1eb   : > { %v5254_v45 = vadd.f32 %v4117_v21, %v5164_v17  ;;  %v4032_v47 = vpop.f32.mrb[121].mxu1  ;;  %v2564_v32 = vpop.f32.mrb[121].mxu0 }
 0x1ec   : > { %v4033_v36 = vadd.f32 %v4032_v47, %v4031_v25  ;;  %v5257_v57 = vadd.f32 %v2564_v32, %v5152_v55  ;;  %v2924_v48 = vadd.f32 %v2923_v52, %v5237_v6  ;;  %v4034_v0 = vpop.f32.mrb[122].mxu1  ;;  %v4118_v34 = vpop.f32.mrb[122].mxu0 }
 0x1ed   : > { %v5261_v61 = vadd.f32 %v4118_v34, %v5170_v30  ;;  %v4035_v15 = vpop.f32.mrb[123].mxu1  ;;  %v2567_v29 = vpop.f32.mrb[123].mxu0 }
 0x1ee   : > { %v2925_v17 = vadd.f32 %v2924_v48, %v5257_v57  ;;  %v4036_v46 = vadd.f32 %v4035_v15, %v4034_v0  ;;  %v5265_v28 = vadd.f32 %v2567_v29, %v5158_v8  ;;  %v2452_v13 = vadd.f32 %v4033_v36, %v5125_v10 }
 0x1ef   : > { %v3552_v55 = vpack.c.bf16 %v5261_v61, %v5254_v45 }
 0x1f0   : > { %v3547_v56 = vpack.c.bf16 %v5265_v28, %v5257_v57  ;;  %v2926_v49 = vadd.f32 %v2925_v17, %v5265_v28  ;;  %v5274_v30 = vadd.f32 %v4036_v46, %v5131_v44 }
 0x1f1   : > { %3608 = vst [vmem:[%s5209_s29 + $0x28] sm:$0xff] %v3552_v55  }
 0x1f2   : > { %3607 = vst [vmem:[%s5209_s29 + $0x20] sm:$0xff] %v3547_v56   ;;  %v2927_v3 = vadd.f32 %v2926_v49, %v5254_v45  ;;  %v4037_v37 = vpop.f32.mrb[124].mxu1  ;;  %v4121_v8 = vpop.f32.mrb[124].mxu0 }
 0x1f3   : > { %v5280_v59 = vadd.f32 %v4121_v8, %v5188_v22  ;;  %v4038_v10 = vpop.f32.mrb[125].mxu1  ;;  %v2580_v51 = vpop.f32.mrb[125].mxu0 }
 0x1f4   : > { %v4039_v16 = vadd.f32 %v4038_v10, %v4037_v37  ;;  %v5283_v5 = vadd.f32 %v2580_v51, %v5176_v39  ;;  %v2928_v44 = vadd.f32 %v2927_v3, %v5261_v61  ;;  %v4040_v7 = vpop.f32.mrb[126].mxu1  ;;  %v4122_v62 = vpop.f32.mrb[126].mxu0 }
 0x1f5   : > { %v5287_v33 = vadd.f32 %v4122_v62, %v5194_v14  ;;  %v4041_v23 = vpop.f32.mrb[127].mxu1  ;;  %v2583_v11 = vpop.f32.mrb[127].mxu0 }
 0x1f6   : > { %v2929_v22 = vadd.f32 %v2928_v44, %v5283_v5  ;;  %v4042_v26 = vadd.f32 %v4041_v23, %v4040_v7  ;;  %v5291_v58 = vadd.f32 %v2583_v11, %v5182_v50  ;;  %v2460_v52 = vadd.f32 %v4039_v16, %v5137_v40 }
 0x1f7   : > { %v3562_v39 = vpack.c.bf16 %v5287_v33, %v5280_v59 }
 0x1f8   : > { %v3557_v25 = vpack.c.bf16 %v5291_v58, %v5283_v5  ;;  %v2930_v21 = vadd.f32 %v2929_v22, %v5291_v58  ;;  %v2463_v14 = vadd.f32 %v4042_v26, %v5143_v20 }
 0x1f9   : > { %3610 = vst [vmem:[%s5209_s29 + $0x38] sm:$0xff] %v3562_v39  }
 0x1fa   : > { %3609 = vst [vmem:[%s5209_s29 + $0x30] sm:$0xff] %v3557_v25   ;;  %v2931_v47 = vadd.f32 %v2930_v21, %v5280_v59  ;;  %v4043_v32 = vpop.f32.mrb[128].mxu1  ;;  %v4125_v36 = vpop.f32.mrb[128].mxu0 }
 0x1fb   : > { %v5303_v50 = vadd.f32 %v4125_v36, %v2444_v18  ;;  %v4044_v48 = vpop.f32.mrb[129].mxu1  ;;  %v2596_v40 = vpop.f32.mrb[129].mxu0 }
 0x1fc   : > { %v4045_v0 = vadd.f32 %v4044_v48, %v4043_v32  ;;  %v5306_v34 = vadd.f32 %v2596_v40, %v5215_v53  ;;  %v2932_v15 = vadd.f32 %v2931_v47, %v5287_v33  ;;  %v4046_v29 = vpop.f32.mrb[130].mxu1  ;;  %v4126_v20 = vpop.f32.mrb[130].mxu0 }
 0x1fd   : > { %v5309_v17 = vadd.f32 %v4126_v20, %v2447_v9  ;;  %v4047_v46 = vpop.f32.mrb[131].mxu1  ;;  %v2599_v55 = vpop.f32.mrb[131].mxu0 }
 0x1fe   : > { %v2933_v56 = vadd.f32 %v2932_v15, %v5306_v34  ;;  %v4048_v18 = vadd.f32 %v4047_v46, %v4046_v29  ;;  %v5313_v49 = vadd.f32 %v2599_v55, %v5224_v35  ;;  %v2468_v3 = vadd.f32 %v4045_v0, %v5149_v2 }
 0x1ff   : > { %v3572_v53 = vpack.c.bf16 %v5309_v17, %v5303_v50 }
 0x200   : > { %v3567_v37 = vpack.c.bf16 %v5313_v49, %v5306_v34  ;;  %v2934_v8 = vadd.f32 %v2933_v56, %v5313_v49  ;;  %v2471_v9 = vadd.f32 %v4048_v18, %v5155_v19 }
 0x201   : > { %3612 = vst [vmem:[%s5209_s29 + $0x48] sm:$0xff] %v3572_v53  }
 0x202   : > { %3611 = vst [vmem:[%s5209_s29 + $0x40] sm:$0xff] %v3567_v37   ;;  %v2935_v10 = vadd.f32 %v2934_v8, %v5303_v50  ;;  %v4049_v51 = vpop.f32.mrb[132].mxu1  ;;  %v4129_v16 = vpop.f32.mrb[132].mxu0 }
 0x203   : > { %v5325_v35 = vadd.f32 %v4129_v16, %v2460_v52  ;;  %v4050_v44 = vpop.f32.mrb[133].mxu1  ;;  %v2612_v2 = vpop.f32.mrb[133].mxu0 }
 0x204   : > { %v4051_v7 = vadd.f32 %v4050_v44, %v4049_v51  ;;  %v5327_v62 = vadd.f32 %v2612_v2, %v2452_v13  ;;  %v2936_v23 = vadd.f32 %v2935_v10, %v5309_v17  ;;  %v4052_v11 = vpop.f32.mrb[134].mxu1  ;;  %v4130_v22 = vpop.f32.mrb[134].mxu0 }
 0x205   : > { %v5330_v19 = vadd.f32 %v4130_v22, %v2463_v14  ;;  %v4053_v26 = vpop.f32.mrb[135].mxu1  ;;  %v2615_v39 = vpop.f32.mrb[135].mxu0 }
 0x206   : > { %v2937_v25 = vadd.f32 %v2936_v23, %v5327_v62  ;;  %v4054_v21 = vadd.f32 %v4053_v26, %v4052_v11  ;;  %v5334_v52 = vadd.f32 %v2615_v39, %v5274_v30  ;;  %v2476_v47 = vadd.f32 %v4051_v7, %v5161_v27 }
 0x207   : > { %v3582_v13 = vpack.c.bf16 %v5330_v19, %v5325_v35 }
 0x208   : > { %v3577_v32 = vpack.c.bf16 %v5334_v52, %v5327_v62  ;;  %v2938_v36 = vadd.f32 %v2937_v25, %v5334_v52  ;;  %v2479_v14 = vadd.f32 %v4054_v21, %v5167_v43 }
 0x209   : > { %3614 = vst [vmem:[%s5209_s29 + $0x58] sm:$0xff] %v3582_v13  }
 0x20a   : > { %3613 = vst [vmem:[%s5209_s29 + $0x50] sm:$0xff] %v3577_v32   ;;  %v2939_v48 = vadd.f32 %v2938_v36, %v5325_v35  ;;  %v4055_v40 = vpop.f32.mrb[136].mxu1  ;;  %v4133_v0 = vpop.f32.mrb[136].mxu0 }
 0x20b   : > { %v5346_v30 = vadd.f32 %v4133_v0, %v2476_v47  ;;  %v4056_v15 = vpop.f32.mrb[137].mxu1  ;;  %v2628_v27 = vpop.f32.mrb[137].mxu0 }
 0x20c   : > { %v4057_v29 = vadd.f32 %v4056_v15, %v4055_v40  ;;  %v5348_v20 = vadd.f32 %v2628_v27, %v2468_v3  ;;  %v2940_v46 = vadd.f32 %v2939_v48, %v5330_v19  ;;  %v4058_v55 = vpop.f32.mrb[138].mxu1  ;;  %v4134_v56 = vpop.f32.mrb[138].mxu0 }
 0x20d   : > { %v5351_v43 = vadd.f32 %v4134_v56, %v2479_v14  ;;  %v4059_v18 = vpop.f32.mrb[139].mxu1  ;;  %v2631_v53 = vpop.f32.mrb[139].mxu0 }
 0x20e   : > { %v2941_v37 = vadd.f32 %v2940_v46, %v5348_v20  ;;  %v4060_v8 = vadd.f32 %v4059_v18, %v4058_v55  ;;  %v2632_v10 = vadd.f32 %v2631_v53, %v2471_v9  ;;  %v2484_v51 = vadd.f32 %v4057_v29, %v5173_v54 }
 0x20f   : > { %v3592_v16 = vpack.c.bf16 %v5351_v43, %v5346_v30 }
 0x210   : > { %v3587_v3 = vpack.c.bf16 %v2632_v10, %v5348_v20  ;;  %v2942_v44 = vadd.f32 %v2941_v37, %v2632_v10  ;;  %v2487_v2 = vadd.f32 %v4060_v8, %v5179_v1 }
 0x211   : > { %3616 = vst [vmem:[%s5209_s29 + $0x68] sm:$0xff] %v3592_v16  }
 0x212   : > { %3615 = vst [vmem:[%s5209_s29 + $0x60] sm:$0xff] %v3587_v3   ;;  %v2943_v7 = vadd.f32 %v2942_v44, %v5346_v30  ;;  %v4061_v23 = vpop.f32.mrb[140].mxu1  ;;  %v4137_v11 = vpop.f32.mrb[140].mxu0 }
 0x213   : > { %v4062_v22 = vpop.f32.mrb[141].mxu1  ;;  %v2644_v26 = vpop.f32.mrb[141].mxu0 }
 0x214   : > { %v4063_v39 = vadd.f32 %v4062_v22, %v4061_v23  ;;  %v2645_v9 = vadd.f32 %v2644_v26, %v2484_v51  ;;  %v2944_v54 = vadd.f32 %v2943_v7, %v5351_v43  ;;  %v4064_v25 = vpop.f32.mrb[142].mxu1  ;;  %v4138_v21 = vpop.f32.mrb[142].mxu0 }
 0x215   : > { %v4065_v47 = vpop.f32.mrb[143].mxu1  ;;  %v2647_v13 = vpop.f32.mrb[143].mxu0 }
 0x216   : > { %v2492_v1 = vadd.f32 %v4063_v39, %v5185_v4  ;;  %v2945_v32 = vadd.f32 %v2944_v54, %v2645_v9  ;;  %v4066_v36 = vadd.f32 %v4065_v47, %v4064_v25  ;;  %v2648_v14 = vadd.f32 %v2647_v13, %v2487_v2 }
 0x218   : > { %v2653_v48 = vadd.f32 %v4137_v11, %v2492_v1  ;;  %v2495_v40 = vadd.f32 %v4066_v36, %v5191_v24  ;;  %v3597_v0 = vpack.c.bf16 %v2648_v14, %v2645_v9  ;;  %v2946_v15 = vadd.f32 %v2945_v32, %v2648_v14 }
 0x21a   : > { %v2656_v27 = vadd.f32 %v4138_v21, %v2495_v40  ;;  %3617 = vst [vmem:[%s5209_s29 + $0x70] sm:$0xff] %v3597_v0   ;;  %v2947_v29 = vadd.f32 %v2946_v15, %v2653_v48 }
 0x21c   : > { %v3602_v46 = vpack.c.bf16 %v2656_v27, %v2653_v48  ;;  %v2948_v55 = vadd.f32 %v2947_v29, %v2656_v27 }
 0x21e   : > { %3618 = vst [vmem:[%s5209_s29 + $0x78] sm:$0xff] %v3602_v46   ;;  %v2949_v56 = vrot.slane %v2948_v55, 4 }
 0x220   : > { %v2950_v18 = vadd.f32 %v2949_v56, %v2948_v55 }
 0x222   : > { %v2951_v53 = vrot.slane %v2950_v18, 2 }
 0x224   : > { %v2952_v4 = vadd.f32 %v2951_v53, %v2950_v18 }
 0x226   : > { %v2953_v37 = vrot.slane %v2952_v4, 1 }
 0x228   : > { %v2954_v24 = vadd.f32 %v2953_v37, %v2952_v4 }
 0x22a   : > { %v2956_v8 = vmul.f32 0.00390625, %v2954_v24  ;;  %2989 = vst [vmem:[%s306_s5] sm:$0x1] %v2954_v24 }
 0x22c   : > { %v2965_v51 = vsub.f32 %v5257_v57, %v2956_v8  ;;  %v2966_v16 = vsub.f32 %v5265_v28, %v2956_v8  ;;  %v2967_v3 = vsub.f32 %v5254_v45, %v2956_v8  ;;  %v2968_v44 = vsub.f32 %v5261_v61, %v2956_v8 }
 0x22d   : > { %v2969_v2 = vsub.f32 %v5283_v5, %v2956_v8  ;;  %v2970_v7 = vsub.f32 %v5291_v58, %v2956_v8  ;;  %v2971_v23 = vsub.f32 %v5280_v59, %v2956_v8  ;;  %v2972_v11 = vsub.f32 %v5287_v33, %v2956_v8 }
 0x22e   : > { %v2973_v22 = vsub.f32 %v5306_v34, %v2956_v8  ;;  %v2974_v26 = vsub.f32 %v5313_v49, %v2956_v8  ;;  %v2975_v57 = vsub.f32 %v5303_v50, %v2956_v8  ;;  %v2976_v28 = vsub.f32 %v5309_v17, %v2956_v8 }
 0x22f   : > { %v2977_v45 = vsub.f32 %v5327_v62, %v2956_v8  ;;  %v2978_v61 = vsub.f32 %v5334_v52, %v2956_v8  ;;  %v2979_v5 = vsub.f32 %v5325_v35, %v2956_v8  ;;  %v2980_v58 = vsub.f32 %v5330_v19, %v2956_v8 }
 0x230   : > { %v2981_v59 = vsub.f32 %v5348_v20, %v2956_v8  ;;  %v5392_v39 = vsub.f32 %v2632_v10, %v2956_v8  ;;  %v5395_v33 = vsub.f32 %v5346_v30, %v2956_v8  ;;  %v5398_v34 = vsub.f32 %v5351_v43, %v2956_v8 }
 0x231   : > { %v5400_v50 = vsub.f32 %v2645_v9, %v2956_v8  ;;  %v5402_v17 = vsub.f32 %v2648_v14, %v2956_v8  ;;  %v5404_v49 = vsub.f32 %v2653_v48, %v2956_v8  ;;  %v5406_v62 = vsub.f32 %v2656_v27, %v2956_v8 }
 0x232   : > { %v2957_v35 = vsub.f32 %v5201_v38, %v2956_v8  ;;  %v2958_v19 = vsub.f32 %v5212_v42, %v2956_v8  ;;  %v2959_v52 = vsub.f32 %v5197_v41, %v2956_v8  ;;  %v2960_v10 = vsub.f32 %v5204_v31, %v2956_v8 }
 0x233   : > { %v2961_v43 = vsub.f32 %v5233_v63, %v2956_v8  ;;  %v2962_v25 = vsub.f32 %v5241_v60, %v2956_v8  ;;  %v2963_v13 = vsub.f32 %v5230_v12, %v2956_v8  ;;  %v2964_v42 = vsub.f32 %v5237_v6, %v2956_v8 }
 0x234   : > { %v2990_v20 = vmul.f32 %v2957_v35, %v2957_v35  ;;  %v2991_v30 = vmul.f32 %v2958_v19, %v2958_v19  ;;  %v2992_v9 = vmul.f32 %v2959_v52, %v2959_v52  ;;  %v2993_v21 = vmul.f32 %v2960_v10, %v2960_v10 }
 0x235   : > { %v2994_v1 = vmul.f32 %v2961_v43, %v2961_v43  ;;  %v2995_v32 = vmul.f32 %v2962_v25, %v2962_v25  ;;  %v2996_v36 = vmul.f32 %v2963_v13, %v2963_v13  ;;  %v2997_v48 = vmul.f32 %v2964_v42, %v2964_v42 }
 0x236   : > { %v3022_v54 = vadd.f32 %v2991_v30, %v2990_v20  ;;  %v2998_v40 = vmul.f32 %v2965_v51, %v2965_v51  ;;  %v2999_v0 = vmul.f32 %v2966_v16, %v2966_v16  ;;  %v3000_v27 = vmul.f32 %v2967_v3, %v2967_v3 }
 0x237   : > { %v3001_v29 = vmul.f32 %v2968_v44, %v2968_v44  ;;  %v3002_v55 = vmul.f32 %v2969_v2, %v2969_v2  ;;  %v3003_v56 = vmul.f32 %v2970_v7, %v2970_v7  ;;  %v3004_v53 = vmul.f32 %v2971_v23, %v2971_v23 }
 0x238   : > { %v3023_v47 = vadd.f32 %v3022_v54, %v2992_v9  ;;  %v3005_v4 = vmul.f32 %v2972_v11, %v2972_v11  ;;  %v3006_v24 = vmul.f32 %v2973_v22, %v2973_v22  ;;  %v3007_v35 = vmul.f32 %v2974_v26, %v2974_v26 }
 0x239   : > { %v3008_v51 = vmul.f32 %v2975_v57, %v2975_v57  ;;  %v3009_v16 = vmul.f32 %v2976_v28, %v2976_v28  ;;  %v3010_v3 = vmul.f32 %v2977_v45, %v2977_v45  ;;  %v3011_v44 = vmul.f32 %v2978_v61, %v2978_v61 }
 0x23a   : > { %v3024_v38 = vadd.f32 %v3023_v47, %v2993_v21  ;;  %v3012_v2 = vmul.f32 %v2979_v5, %v2979_v5  ;;  %v3013_v7 = vmul.f32 %v2980_v58, %v2980_v58  ;;  %v3014_v23 = vmul.f32 %v2981_v59, %v2981_v59 }
 0x23b   : > { %v3015_v11 = vmul.f32 %v5392_v39, %v5392_v39  ;;  %v3016_v26 = vmul.f32 %v5395_v33, %v5395_v33  ;;  %v3017_v28 = vmul.f32 %v5398_v34, %v5398_v34  ;;  %v3018_v61 = vmul.f32 %v5400_v50, %v5400_v50 }
 0x23c   : > { %v3025_v41 = vadd.f32 %v3024_v38, %v2994_v1  ;;  %v3019_v58 = vmul.f32 %v5402_v17, %v5402_v17  ;;  %v3020_v39 = vmul.f32 %v5404_v49, %v5404_v49  ;;  %v3021_v33 = vmul.f32 %v5406_v62, %v5406_v62 }
 0x23e   : > { %v3026_v14 = vadd.f32 %v3025_v41, %v2995_v32 }
 0x240   : > { %v3027_v31 = vadd.f32 %v3026_v14, %v2996_v36 }
 0x242   : > { %v3028_v63 = vadd.f32 %v3027_v31, %v2997_v48 }
 0x244   : > { %v3029_v15 = vadd.f32 %v3028_v63, %v2998_v40 }
 0x246   : > { %v3030_v60 = vadd.f32 %v3029_v15, %v2999_v0 }
 0x248   : > { %v3031_v46 = vadd.f32 %v3030_v60, %v3000_v27 }
 0x24a   : > { %v3032_v12 = vadd.f32 %v3031_v46, %v3001_v29 }
 0x24c   : > { %v3033_v18 = vadd.f32 %v3032_v12, %v3002_v55 }
 0x24e   : > { %v3034_v6 = vadd.f32 %v3033_v18, %v3003_v56 }
 0x250   : > { %v3035_v37 = vadd.f32 %v3034_v6, %v3004_v53 }
 0x252   : > { %v3036_v8 = vadd.f32 %v3035_v37, %v3005_v4 }
 0x254   : > { %v3037_v19 = vadd.f32 %v3036_v8, %v3006_v24 }
 0x256   : > { %v3038_v52 = vadd.f32 %v3037_v19, %v3007_v35 }
 0x258   : > { %v3039_v20 = vadd.f32 %v3038_v52, %v3008_v51 }
 0x25a   : > { %v3040_v30 = vadd.f32 %v3039_v20, %v3009_v16 }
 0x25c   : > { %v3041_v10 = vadd.f32 %v3040_v30, %v3010_v3 }
 0x25e   : > { %v3042_v43 = vadd.f32 %v3041_v10, %v3011_v44 }
 0x260   : > { %v3043_v9 = vadd.f32 %v3042_v43, %v3012_v2 }
 0x262   : > { %v3044_v54 = vadd.f32 %v3043_v9, %v3013_v7 }
 0x264   : > { %v3045_v22 = vadd.f32 %v3044_v54, %v3014_v23 }
 0x266   : > { %v3046_v57 = vadd.f32 %v3045_v22, %v3015_v11 }
 0x268   : > { %v3047_v45 = vadd.f32 %v3046_v57, %v3016_v26 }
 0x26a   : > { %v3048_v5 = vadd.f32 %v3047_v45, %v3017_v28 }
 0x26c   : > { %v3049_v59 = vadd.f32 %v3048_v5, %v3018_v61 }
 0x26e   : > { %v3050_v25 = vadd.f32 %v3049_v59, %v3019_v58 }
 0x270   : > { %v3051_v21 = vadd.f32 %v3050_v25, %v3020_v39 }
 0x272   : > { %v3052_v47 = vadd.f32 %v3051_v21, %v3021_v33 }
 0x274   : > { %v3053_v34 = vrot.slane %v3052_v47, 4 }
 0x276   : > { %v3054_v13 = vadd.f32 %v3053_v34, %v3052_v47 }
 0x278   : > { %v3055_v1 = vrot.slane %v3054_v13, 2 }
 0x27a   : > { %v3056_v38 = vadd.f32 %v3055_v1, %v3054_v13 }
 0x27c   : > { %v3057_v42 = vrot.slane %v3056_v38, 1 }
 0x27e   : > { %v3058_v50 = vadd.f32 %v3057_v42, %v3056_v38 }
 0x280   : > { %3059 = vst [vmem:[%s312_s8] sm:$0x1] %v3058_v50 }
 0x281 PF: > { %s15_s17 = sadd.s32 1, %s4482_s17   ;;  %s5448_s15 = smov %s4478_s16 }
 0x282   : > { %p12_p6 = scmp.ge.s32.totalorder %s15_s17, 4   ;;  %s5449_s16 = smov %s5451_s18 }
 0x284   :  { %14 = sbr.rel (!%p12_p6) target bundleno = 2 (0x2), region = 93 }

</bundles_post_ra>
